<compile_context>
chip_gen: v5e
topology: v5e:2x2
jax: 0.10.0
libtpu: 0.0.40
codegen_flags: <defaults>
</compile_context>

<pallas_src>
import jax
import jax.numpy as jnp
from jax.experimental import pallas as pl
from jax.experimental.pallas import tpu as pltpu


# --------------------------------------------------------------------------
# Kernel 1: z = (relu((adj @ x) @ W1 + rowsum(adj) * b1)) @ W2p + b2p
# Grid: (row tiles of adj, K tiles over N).  Accumulates adj@x and rowsum(adj)
# across the K axis; projections + activations run once per row tile in the
# finalize phase.
# --------------------------------------------------------------------------
def _gcn_layer1_kernel(adj_ref, x_ref, w1_ref, b1_ref, w2p_ref, b2p_ref,
                       z_ref, acc_ref, rowsum_ref):
    k = pl.program_id(1)

    @pl.when(k == 0)
    def _():
        acc_ref[...] = jnp.zeros_like(acc_ref)
        rowsum_ref[...] = jnp.zeros_like(rowsum_ref)

    a = adj_ref[...]                                   # bf16 [tm, tk]
    acc_ref[...] += jnp.dot(a, x_ref[...],             # bf16 MXU, f32 acc
                            preferred_element_type=jnp.float32)
    rowsum_ref[...] += jnp.sum(a.astype(jnp.float32), axis=1, keepdims=True)

    @pl.when(k == pl.num_programs(1) - 1)
    def _():
        # (adj@x) @ W1 + rowsum(adj) * b1   (exact bias for general adj)
        h = jnp.dot(acc_ref[...].astype(jnp.bfloat16), w1_ref[...],
                    preferred_element_type=jnp.float32)
        h = h + rowsum_ref[...] * b1_ref[...]          # [tm,1]*[1,H] broadcast
        h = jnp.maximum(h, 0.0)                        # ReLU
        # (dropout = identity in inference)
        z = jnp.dot(h.astype(jnp.bfloat16), w2p_ref[...],
                    preferred_element_type=jnp.float32) + b2p_ref[...]
        z_ref[...] = z.astype(z_ref.dtype)             # lane-dense bf16 store


# --------------------------------------------------------------------------
# Kernel 2: out = sigmoid(adj @ z)   (z already contains linear2 bias)
# --------------------------------------------------------------------------
def _gcn_layer2_kernel(adj_ref, z_ref, out_ref, acc_ref):
    k = pl.program_id(1)

    @pl.when(k == 0)
    def _():
        acc_ref[...] = jnp.zeros_like(acc_ref)

    acc_ref[...] += jnp.dot(adj_ref[...], z_ref[...],
                            preferred_element_type=jnp.float32)

    @pl.when(k == pl.num_programs(1) - 1)
    def _():
        out_ref[...] = jax.nn.sigmoid(acc_ref[...])    # lane-dense f32 store


def _pick_tile(n, target, granule):
    """Largest multiple of `granule` that divides n and is <= target, else n."""
    if n <= target:
        return n
    t = (min(target, n) // granule) * granule
    while t >= granule:
        if n % t == 0:
            return t
        t -= granule
    return n


def gcn_forward(adj, x, w1, b1, w2, b2, *, tm=256, tk=256):
    """adj: [N, N], x: [N, F_in], w1: [F_in, H], b1: [1, H],
    w2: [H, F_out], b2: [1, F_out] -> [N, F_out] (float32)."""
    n, f_in = x.shape
    hidden = w1.shape[1]
    f_out = w2.shape[1]
    f_pad = max(128, ((f_out + 127) // 128) * 128)     # lane-dense output width

    # Row-tile granule 8 (sublane), K-tile granule 128 (lane).
    tm = _pick_tile(n, tm, 8)
    tk = _pick_tile(n, tk, 128)
    grid = (n // tm, n // tk)

    # bf16 MXU operands (f32 accumulation in-kernel); biases stay f32.
    adj_b = adj.astype(jnp.bfloat16)
    x_b = x.astype(jnp.bfloat16)
    w1_b = w1.astype(jnp.bfloat16)
    b1_f = b1.reshape(1, hidden).astype(jnp.float32)
    w2p = jnp.pad(w2.astype(jnp.bfloat16), ((0, 0), (0, f_pad - f_out)))
    b2p = jnp.pad(b2.reshape(1, f_out).astype(jnp.float32),
                  ((0, 0), (0, f_pad - f_out)))

    cparams = pltpu.CompilerParams(
        dimension_semantics=("parallel", "arbitrary"))

    # ---- layer 1 (fused linear1 -> aggregate -> relu -> linear2) ----
    z = pl.pallas_call(
        _gcn_layer1_kernel,
        out_shape=jax.ShapeDtypeStruct((n, f_pad), jnp.bfloat16),
        grid_spec=pltpu.PrefetchScalarGridSpec(
            num_scalar_prefetch=0,
            grid=grid,
            in_specs=[
                pl.BlockSpec((tm, tk), lambda i, k: (i, k)),         # adj
                pl.BlockSpec((tk, f_in), lambda i, k: (k, 0)),       # x
                pl.BlockSpec((f_in, hidden), lambda i, k: (0, 0)),   # W1
                pl.BlockSpec((1, hidden), lambda i, k: (0, 0)),      # b1
                pl.BlockSpec((hidden, f_pad), lambda i, k: (0, 0)),  # W2 (padded)
                pl.BlockSpec((1, f_pad), lambda i, k: (0, 0)),       # b2 (padded)
            ],
            out_specs=pl.BlockSpec((tm, f_pad), lambda i, k: (i, 0)),
            scratch_shapes=[pltpu.VMEM((tm, f_in), jnp.float32),     # adj@x acc
                            pltpu.VMEM((tm, 1), jnp.float32)],       # rowsum acc
        ),
        compiler_params=cparams,
    )(adj_b, x_b, w1_b, b1_f, w2p, b2p)

    # ---- layer 2 (aggregate -> sigmoid) ----
    out_pad = pl.pallas_call(
        _gcn_layer2_kernel,
        out_shape=jax.ShapeDtypeStruct((n, f_pad), jnp.float32),
        grid_spec=pltpu.PrefetchScalarGridSpec(
            num_scalar_prefetch=0,
            grid=grid,
            in_specs=[
                pl.BlockSpec((tm, tk), lambda i, k: (i, k)),         # adj
                pl.BlockSpec((tk, f_pad), lambda i, k: (k, 0)),      # z
            ],
            out_specs=pl.BlockSpec((tm, f_pad), lambda i, k: (i, 0)),
            scratch_shapes=[pltpu.VMEM((tm, f_pad), jnp.float32)],
        ),
        compiler_params=cparams,
    )(adj_b, z)

    # Padding lanes hold sigmoid(0)=0.5 -> slicing them off is mandatory.
    return out_pad[:, :f_out]


def init_linear_params(key, in_dim, out_dim):
    """Deterministic init mimicking nn.Linear (uniform +-1/sqrt(in_dim)).
    Returns weight already transposed to [in_dim, out_dim]."""
    kw, kb = jax.random.split(key)
    bound = 1.0 / jnp.sqrt(jnp.float32(in_dim))
    w = jax.random.uniform(kw, (in_dim, out_dim), jnp.float32, -bound, bound)
    b = jax.random.uniform(kb, (1, out_dim), jnp.float32, -bound, bound)
    return w, b


if __name__ == "__main__":
    # Small synthetic problem; N chosen so the (row-tile, K-tile) grid is
    # actually exercised (grid = (2, 2) with 256-wide tiles).
    N, F_IN, HIDDEN, F_OUT = 512, 32, 64, 16

    key = jax.random.PRNGKey(0)
    k_adj, k_x, k_l1, k_l2 = jax.random.split(key, 4)

    # Dense, row-normalized adjacency with self loops (synthetic).
    a_raw = (jax.random.uniform(k_adj, (N, N)) < 0.1).astype(jnp.float32)
    a_raw = a_raw + jnp.eye(N, dtype=jnp.float32)
    adj = a_raw / jnp.sum(a_raw, axis=1, keepdims=True)

    x = jax.random.normal(k_x, (N, F_IN), jnp.float32)

    w1, b1 = init_linear_params(k_l1, F_IN, HIDDEN)
    w2, b2 = init_linear_params(k_l2, HIDDEN, F_OUT)

    gcn = jax.jit(gcn_forward)
    out = gcn(adj, x, w1, b1, w2, b2)
    jax.block_until_ready(out)

    # Pure-JAX f32 reference (original association / torch semantics).
    h_ref = jnp.maximum(adj @ (x @ w1 + b1), 0.0)
    ref = jax.nn.sigmoid(adj @ (h_ref @ w2 + b2))

    assert out.shape == (N, F_OUT)
    max_err = float(jnp.max(jnp.abs(out - ref)))
    # bf16 MXU operands with f32 accumulation -> relaxed tolerance vs f32 ref.
    assert max_err < 2e-2, f"max abs error {max_err}"

    print("KERNEL_OK")
</pallas_src>

<mosaic_0001>
module attributes {stable_mosaic.version = 11 : i64} {
  func.func @_gcn_layer1_kernel(%arg0: i32, %arg1: i32, %arg2: memref<256x256xbf16, #tpu.memory_space<vmem>>, %arg3: memref<256x32xbf16, #tpu.memory_space<vmem>>, %arg4: memref<32x64xbf16, #tpu.memory_space<vmem>>, %arg5: memref<1x64xf32, #tpu.memory_space<vmem>>, %arg6: memref<64x128xbf16, #tpu.memory_space<vmem>>, %arg7: memref<1x128xf32, #tpu.memory_space<vmem>>, %arg8: memref<256x128xbf16, #tpu.memory_space<vmem>>, %arg9: memref<256x32xf32, #tpu.memory_space<vmem>>, %arg10: memref<256x1xf32, #tpu.memory_space<vmem>>) attributes {dimension_semantics = [#tpu.dimension_semantics<parallel>, #tpu.dimension_semantics<arbitrary>], iteration_bounds = array<i64: 2, 2>, scalar_prefetch = 0 : i64, scratch_operands = 2 : i64, tpu.core_type = #tpu.core_type<tc>, window_params = [{transform_indices = @transform_0, window_bounds = array<i64: 256, 256>}, {transform_indices = @transform_1, window_bounds = array<i64: 256, 32>}, {pipeline_mode = #tpu.pipeline_mode<synchronous>, transform_indices = @transform_2, window_bounds = array<i64: 32, 64>}, {pipeline_mode = #tpu.pipeline_mode<synchronous>, transform_indices = @transform_3, window_bounds = array<i64: 1, 64>}, {pipeline_mode = #tpu.pipeline_mode<synchronous>, transform_indices = @transform_4, window_bounds = array<i64: 64, 128>}, {pipeline_mode = #tpu.pipeline_mode<synchronous>, transform_indices = @transform_5, window_bounds = array<i64: 1, 128>}, {transform_indices = @transform_6, window_bounds = array<i64: 256, 128>}]} {
    %c0_i32 = arith.constant 0 : i32
    %0 = arith.cmpi eq, %arg1, %c0_i32 : i32
    %1 = arith.extui %0 : i1 to i32
    %c0_i32_0 = arith.constant 0 : i32
    %2 = arith.cmpi ne, %1, %c0_i32_0 : i32
    scf.if %2 {
      %cst_14 = arith.constant 0.000000e+00 : f32
      %18 = vector.broadcast %cst_14 : f32 to vector<256x32xf32>
      %c0_15 = arith.constant 0 : index
      %c0_16 = arith.constant 0 : index
      %19 = vector.load %arg9[%c0_15, %c0_16] : memref<256x32xf32, #tpu.memory_space<vmem>>, vector<256x32xf32>
      tpu.vector_store %arg9[%c0_15, %c0_16], %18 {strides = array<i32>} : memref<256x32xf32, #tpu.memory_space<vmem>>, vector<256x32xf32>,
      %cst_17 = arith.constant 0.000000e+00 : f32
      %20 = vector.broadcast %cst_17 : f32 to vector<256x1xf32>
      %c0_18 = arith.constant 0 : index
      %c0_19 = arith.constant 0 : index
      %21 = vector.load %arg10[%c0_18, %c0_19] : memref<256x1xf32, #tpu.memory_space<vmem>>, vector<256x1xf32>
      tpu.vector_store %arg10[%c0_18, %c0_19], %20 {strides = array<i32>} : memref<256x1xf32, #tpu.memory_space<vmem>>, vector<256x1xf32>,
    } else {
    }
    %c0 = arith.constant 0 : index
    %c0_1 = arith.constant 0 : index
    %3 = vector.load %arg2[%c0, %c0_1] : memref<256x256xbf16, #tpu.memory_space<vmem>>, vector<256x256xbf16>
    %c0_2 = arith.constant 0 : index
    %c0_3 = arith.constant 0 : index
    %4 = vector.load %arg9[%c0_2, %c0_3] : memref<256x32xf32, #tpu.memory_space<vmem>>, vector<256x32xf32>
    %c0_4 = arith.constant 0 : index
    %c0_5 = arith.constant 0 : index
    %5 = vector.load %arg3[%c0_4, %c0_5] : memref<256x32xbf16, #tpu.memory_space<vmem>>, vector<256x32xbf16>
    %cst = arith.constant dense<0.000000e+00> : vector<256x32xf32>
    %6 = tpu.matmul %3, %5, %cst {dimension_numbers = #tpu.dot_dimension_numbers<[1], [0], [0], [1], [0, 0, 1, 1], [], []>} : vector<256x256xbf16>, vector<256x32xbf16>, vector<256x32xf32> -> vector<256x32xf32>
    %7 = arith.addf %4, %6 : vector<256x32xf32>
    %c0_6 = arith.constant 0 : index
    %c0_7 = arith.constant 0 : index
    %8 = vector.load %arg9[%c0_6, %c0_7] : memref<256x32xf32, #tpu.memory_space<vmem>>, vector<256x32xf32>
    tpu.vector_store %arg9[%c0_6, %c0_7], %7 {strides = array<i32>} : memref<256x32xf32, #tpu.memory_space<vmem>>, vector<256x32xf32>,
    %c0_8 = arith.constant 0 : index
    %c0_9 = arith.constant 0 : index
    %9 = vector.load %arg10[%c0_8, %c0_9] : memref<256x1xf32, #tpu.memory_space<vmem>>, vector<256x1xf32>
    %10 = arith.extf %3 : vector<256x256xbf16> to vector<256x256xf32>
    %cst_10 = arith.constant dense<0.000000e+00> : vector<256xf32>
    %11 = vector.multi_reduction <add>, %10, %cst_10 [1] : vector<256x256xf32> to vector<256xf32>
    %12 = vector.shape_cast %11 : vector<256xf32> to vector<256x1xf32>
    %13 = arith.addf %9, %12 : vector<256x1xf32>
    %c0_11 = arith.constant 0 : index
    %c0_12 = arith.constant 0 : index
    %14 = vector.load %arg10[%c0_11, %c0_12] : memref<256x1xf32, #tpu.memory_space<vmem>>, vector<256x1xf32>
    tpu.vector_store %arg10[%c0_11, %c0_12], %13 {strides = array<i32>} : memref<256x1xf32, #tpu.memory_space<vmem>>, vector<256x1xf32>,
    %c1_i32 = arith.constant 1 : i32
    %15 = arith.cmpi eq, %arg1, %c1_i32 : i32
    %16 = arith.extui %15 : i1 to i32
    %c0_i32_13 = arith.constant 0 : i32
    %17 = arith.cmpi ne, %16, %c0_i32_13 : i32
    scf.if %17 {
      %c0_14 = arith.constant 0 : index
      %c0_15 = arith.constant 0 : index
      %18 = vector.load %arg9[%c0_14, %c0_15] : memref<256x32xf32, #tpu.memory_space<vmem>>, vector<256x32xf32>
      %19 = arith.truncf %18 : vector<256x32xf32> to vector<256x32xbf16>
      %c0_16 = arith.constant 0 : index
      %c0_17 = arith.constant 0 : index
      %20 = vector.load %arg4[%c0_16, %c0_17] : memref<32x64xbf16, #tpu.memory_space<vmem>>, vector<32x64xbf16>
      %cst_18 = arith.constant dense<0.000000e+00> : vector<256x64xf32>
      %21 = tpu.matmul %19, %20, %cst_18 {dimension_numbers = #tpu.dot_dimension_numbers<[1], [0], [0], [1], [0, 0, 1, 1], [], []>} : vector<256x32xbf16>, vector<32x64xbf16>, vector<256x64xf32> -> vector<256x64xf32>
      %c0_19 = arith.constant 0 : index
      %c0_20 = arith.constant 0 : index
      %22 = vector.load %arg10[%c0_19, %c0_20] : memref<256x1xf32, #tpu.memory_space<vmem>>, vector<256x1xf32>
      %c0_21 = arith.constant 0 : index
      %c0_22 = arith.constant 0 : index
      %23 = vector.load %arg5[%c0_21, %c0_22] : memref<1x64xf32, #tpu.memory_space<vmem>>, vector<1x64xf32>
      %24 = vector.broadcast %22 : vector<256x1xf32> to vector<256x64xf32>
      %25 = vector.broadcast %23 : vector<1x64xf32> to vector<256x64xf32>
      %26 = arith.mulf %24, %25 : vector<256x64xf32>
      %27 = arith.addf %21, %26 : vector<256x64xf32>
      %cst_23 = arith.constant 0.000000e+00 : f32
      %28 = vector.broadcast %cst_23 : f32 to vector<256x64xf32>
      %29 = arith.maximumf %27, %28 : vector<256x64xf32>
      %30 = arith.truncf %29 : vector<256x64xf32> to vector<256x64xbf16>
      %c0_24 = arith.constant 0 : index
      %c0_25 = arith.constant 0 : index
      %31 = vector.load %arg6[%c0_24, %c0_25] : memref<64x128xbf16, #tpu.memory_space<vmem>>, vector<64x128xbf16>
      %cst_26 = arith.constant dense<0.000000e+00> : vector<256x128xf32>
      %32 = tpu.matmul %30, %31, %cst_26 {dimension_numbers = #tpu.dot_dimension_numbers<[1], [0], [0], [1], [0, 0, 1, 1], [], []>} : vector<256x64xbf16>, vector<64x128xbf16>, vector<256x128xf32> -> vector<256x128xf32>
      %c0_27 = arith.constant 0 : index
      %c0_28 = arith.constant 0 : index
      %33 = vector.load %arg7[%c0_27, %c0_28] : memref<1x128xf32, #tpu.memory_space<vmem>>, vector<1x128xf32>
      %34 = vector.broadcast %33 : vector<1x128xf32> to vector<256x128xf32>
      %35 = arith.addf %32, %34 : vector<256x128xf32>
      %36 = arith.truncf %35 : vector<256x128xf32> to vector<256x128xbf16>
      %c0_29 = arith.constant 0 : index
      %c0_30 = arith.constant 0 : index
      %37 = vector.load %arg8[%c0_29, %c0_30] : memref<256x128xbf16, #tpu.memory_space<vmem>>, vector<256x128xbf16>
      tpu.vector_store %arg8[%c0_29, %c0_30], %36 {strides = array<i32>} : memref<256x128xbf16, #tpu.memory_space<vmem>>, vector<256x128xbf16>,
    } else {
    }
    return
  }
  func.func @transform_0(%arg0: i32, %arg1: i32) -> (i32, i32) {
    %c0_i32 = arith.constant 0 : i32
    return %arg0, %arg1 : i32, i32
  }
  func.func @transform_1(%arg0: i32, %arg1: i32) -> (i32, i32) {
    %c0_i32 = arith.constant 0 : i32
    %c0_i32_0 = arith.constant 0 : i32
    return %arg1, %c0_i32 : i32, i32
  }
  func.func @transform_2(%arg0: i32, %arg1: i32) -> (i32, i32) {
    %c0_i32 = arith.constant 0 : i32
    %c0_i32_0 = arith.constant 0 : i32
    %c0_i32_1 = arith.constant 0 : i32
    return %c0_i32, %c0_i32_0 : i32, i32
  }
  func.func @transform_3(%arg0: i32, %arg1: i32) -> (i32, i32) {
    %c0_i32 = arith.constant 0 : i32
    %c0_i32_0 = arith.constant 0 : i32
    %c0_i32_1 = arith.constant 0 : i32
    return %c0_i32, %c0_i32_0 : i32, i32
  }
  func.func @transform_4(%arg0: i32, %arg1: i32) -> (i32, i32) {
    %c0_i32 = arith.constant 0 : i32
    %c0_i32_0 = arith.constant 0 : i32
    %c0_i32_1 = arith.constant 0 : i32
    return %c0_i32, %c0_i32_0 : i32, i32
  }
  func.func @transform_5(%arg0: i32, %arg1: i32) -> (i32, i32) {
    %c0_i32 = arith.constant 0 : i32
    %c0_i32_0 = arith.constant 0 : i32
    %c0_i32_1 = arith.constant 0 : i32
    return %c0_i32, %c0_i32_0 : i32, i32
  }
  func.func @transform_6(%arg0: i32, %arg1: i32) -> (i32, i32) {
    %c0_i32 = arith.constant 0 : i32
    %c0_i32_0 = arith.constant 0 : i32
    return %arg0, %c0_i32 : i32, i32
  }
}

module attributes {stable_mosaic.version = 11 : i64} {
  func.func @_gcn_layer2_kernel(%arg0: i32, %arg1: i32, %arg2: memref<256x256xbf16, #tpu.memory_space<vmem>>, %arg3: memref<256x128xbf16, #tpu.memory_space<vmem>>, %arg4: memref<256x128xf32, #tpu.memory_space<vmem>>, %arg5: memref<256x128xf32, #tpu.memory_space<vmem>>) attributes {dimension_semantics = [#tpu.dimension_semantics<parallel>, #tpu.dimension_semantics<arbitrary>], iteration_bounds = array<i64: 2, 2>, scalar_prefetch = 0 : i64, scratch_operands = 1 : i64, tpu.core_type = #tpu.core_type<tc>, window_params = [{transform_indices = @transform_0, window_bounds = array<i64: 256, 256>}, {transform_indices = @transform_1, window_bounds = array<i64: 256, 128>}, {transform_indices = @transform_2, window_bounds = array<i64: 256, 128>}]} {
    %c0_i32 = arith.constant 0 : i32
    %0 = arith.cmpi eq, %arg1, %c0_i32 : i32
    %1 = arith.extui %0 : i1 to i32
    %c0_i32_0 = arith.constant 0 : i32
    %2 = arith.cmpi ne, %1, %c0_i32_0 : i32
    scf.if %2 {
      %cst_9 = arith.constant 0.000000e+00 : f32
      %12 = vector.broadcast %cst_9 : f32 to vector<256x128xf32>
      %c0_10 = arith.constant 0 : index
      %c0_11 = arith.constant 0 : index
      %13 = vector.load %arg5[%c0_10, %c0_11] : memref<256x128xf32, #tpu.memory_space<vmem>>, vector<256x128xf32>
      tpu.vector_store %arg5[%c0_10, %c0_11], %12 {strides = array<i32>} : memref<256x128xf32, #tpu.memory_space<vmem>>, vector<256x128xf32>,
    } else {
    }
    %c0 = arith.constant 0 : index
    %c0_1 = arith.constant 0 : index
    %3 = vector.load %arg5[%c0, %c0_1] : memref<256x128xf32, #tpu.memory_space<vmem>>, vector<256x128xf32>
    %c0_2 = arith.constant 0 : index
    %c0_3 = arith.constant 0 : index
    %4 = vector.load %arg2[%c0_2, %c0_3] : memref<256x256xbf16, #tpu.memory_space<vmem>>, vector<256x256xbf16>
    %c0_4 = arith.constant 0 : index
    %c0_5 = arith.constant 0 : index
    %5 = vector.load %arg3[%c0_4, %c0_5] : memref<256x128xbf16, #tpu.memory_space<vmem>>, vector<256x128xbf16>
    %cst = arith.constant dense<0.000000e+00> : vector<256x128xf32>
    %6 = tpu.matmul %4, %5, %cst {dimension_numbers = #tpu.dot_dimension_numbers<[1], [0], [0], [1], [0, 0, 1, 1], [], []>} : vector<256x256xbf16>, vector<256x128xbf16>, vector<256x128xf32> -> vector<256x128xf32>
    %7 = arith.addf %3, %6 : vector<256x128xf32>
    %c0_6 = arith.constant 0 : index
    %c0_7 = arith.constant 0 : index
    %8 = vector.load %arg5[%c0_6, %c0_7] : memref<256x128xf32, #tpu.memory_space<vmem>>, vector<256x128xf32>
    tpu.vector_store %arg5[%c0_6, %c0_7], %7 {strides = array<i32>} : memref<256x128xf32, #tpu.memory_space<vmem>>, vector<256x128xf32>,
    %c1_i32 = arith.constant 1 : i32
    %9 = arith.cmpi eq, %arg1, %c1_i32 : i32
    %10 = arith.extui %9 : i1 to i32
    %c0_i32_8 = arith.constant 0 : i32
    %11 = arith.cmpi ne, %10, %c0_i32_8 : i32
    scf.if %11 {
      %c0_9 = arith.constant 0 : index
      %c0_10 = arith.constant 0 : index
      %12 = vector.load %arg5[%c0_9, %c0_10] : memref<256x128xf32, #tpu.memory_space<vmem>>, vector<256x128xf32>
      %13 = arith.negf %12 : vector<256x128xf32>
      %14 = math.exp %13 : vector<256x128xf32>
      %cst_11 = arith.constant 1.000000e+00 : f32
      %15 = vector.broadcast %cst_11 : f32 to vector<256x128xf32>
      %16 = arith.addf %15, %14 : vector<256x128xf32>
      %17 = arith.divf %15, %16 : vector<256x128xf32>
      %c0_12 = arith.constant 0 : index
      %c0_13 = arith.constant 0 : index
      %18 = vector.load %arg4[%c0_12, %c0_13] : memref<256x128xf32, #tpu.memory_space<vmem>>, vector<256x128xf32>
      tpu.vector_store %arg4[%c0_12, %c0_13], %17 {strides = array<i32>} : memref<256x128xf32, #tpu.memory_space<vmem>>, vector<256x128xf32>,
    } else {
    }
    return
  }
  func.func @transform_0(%arg0: i32, %arg1: i32) -> (i32, i32) {
    %c0_i32 = arith.constant 0 : i32
    return %arg0, %arg1 : i32, i32
  }
  func.func @transform_1(%arg0: i32, %arg1: i32) -> (i32, i32) {
    %c0_i32 = arith.constant 0 : i32
    %c0_i32_0 = arith.constant 0 : i32
    return %arg1, %c0_i32 : i32, i32
  }
  func.func @transform_2(%arg0: i32, %arg1: i32) -> (i32, i32) {
    %c0_i32 = arith.constant 0 : i32
    %c0_i32_0 = arith.constant 0 : i32
    return %arg0, %c0_i32 : i32, i32
  }
}

</mosaic_0001>

<bundles_post_ra>
// kernel: gcn_forward.3
= control target key start
LH: loop header
LB: loop body
LE: loop exit
PB: predicated region body
PF: predicated region fallthrough
CT: control target
= control target key end

     0   :  { %s2306_s9 = smov 0   ;;  %s2308_s10 = smov 0   ;;  %s3258_s0 = inlined_call_operand.vmem [shape: bf16[512,512], index: 0, kind: input, shape index: {}]   ;;  %s3259_s1 = inlined_call_operand.vmem [shape: bf16[512,128], index: 1, kind: input, shape index: {}]   ;;  %s3260_s2 = inlined_call_operand.vmem [shape: f32[512,128], index: 2, kind: output, shape index: {}]  }
   0x1   :  { %s2310_s11 = smov 0   ;;  %s2312_s12 = smov 0  }
   0x2   :  { %s2314_s13 = smov 0   ;;  %s2316_s14 = smov 0  }
   0x3   :  { %s2318_s15 = smov 0  }
   0x4 LB: > { %s21_s16 = sadd.s32 1, %s2280_s13  ;;  %s24_s17 = sadd.s32 1, %s2284_s14  ;;  %s2288_s15 = sphi %s2318_s15, %s12_s15   ;;  %s2284_s14 = sphi %s2316_s14, %s3383_s14   ;;  %s2280_s13 = sphi %s2314_s13, %s3382_s13   ;;  %s2276_s12 = sphi %s2312_s12, %s3381_s12   ;;  %s2272_s11 = sphi %s2310_s11, %s3380_s11   ;;  %s2268_s10 = sphi %s2308_s10, %s3379_s10   ;;  %s2264_s9 = sphi %s2306_s9, %s3378_s9  }
   0x5   : > { %p22_p0 = scmp.ge.s32.totalorder %s21_s16, 2  ;;  %p40_p1 = scmp.ne.s32.totalorder %s2268_s10, %s2264_s9 }
   0x6   : > { %p41_p2 = scmp.eq.s32.totalorder %s2288_s15, 0  ;;  %s33_s21 = sadd.s32 1, %s2268_s10 }
   0x7   : > { %s3385_s16 = smov (%p22_p0, %s21_s16), 0  ;;  %s3387_s17 = smov (!%p22_p0, %s24_s17), %s2284_s14 }
   0x8   : > { %p42_p3 = por %p41_p2, %p40_p1  ;;  %p26_p4 = scmp.ge.s32.totalorder %s3387_s17, 2 }
   0x9   : > { %s29_s18 = ssub.s32 %s2280_s13, %s3385_s16  ;;  %p1744_p6 = scmp.ge.s32.totalorder %s2288_s15, 4 }
   0xa   : > { %s3389_s17 = smov (%p26_p4, %s3387_s17), 0 }
   0xb   : > { %s28_s19 = ssub.s32 %s2284_s14, %s3389_s17  ;;  %118 = sbr.rel (%p1744_p6) target bundleno = 55 (0x37), region = 16 }
   0xc   : > { %s30_s20 = sor.u32 %s29_s18, %s28_s19 }
   0xd   : > { %p31_p5 = scmp.eq.s32.totalorder %s30_s20, 0 }
   0xf   : > { %s2357_s22 = scalar_select %p31_p5, %s2268_s10, %s33_s21  }
  0x10   : > { %121 = sbr.rel (!%p42_p3) target bundleno = 55 (0x37), region = 20  ;;  %s123_s23 = sand.u32 (%p42_p3), 1, %s2268_s10  }
  0x11   : > { %s1747_s24 = sshll.u32 (%p42_p3), %s2280_s13, 1  ;;  %s1745_s25 = sshll.u32 (%p42_p3), %s123_s23, 8 }
  0x12   : > { %s1984_s26 = sshll.u32 (%p42_p3), %s2284_s14, 7  ;;  %s2371_s4 = scalar_lea.vmem (%p42_p3), [#allocation3], %s1745_s25 }
  0x13   : > { %s129_s27 = sadd.s32 (%p42_p3), %s1984_s26, %s1747_s24 }
  0x14   : > { %s1749_s28 = sshll.u32 (%p42_p3), %s129_s27, 2 }
  0x15   : > { %s2366_s3 = scalar_lea.vmem %s3258_s0, %s1749_s28 }
  0x16   : > { %v222_v0 = vld [vmem:[%s2366_s3] sm:$0xff]  ;;  %v224_v1 = vld [vmem:[%s2366_s3 + $0x10] sm:$0xff] }
  0x17   : > { %v226_v2 = vld [vmem:[%s2366_s3 + $0x20] sm:$0xff]  ;;  %223 = vst [vmem:[%s2371_s4] sm:$0xff] %v222_v0  ;;  %v228_v3 = vld [vmem:[%s2366_s3 + $0x30] sm:$0xff] }
  0x18   : > { %225 = vst [vmem:[%s2371_s4 + $0x8] sm:$0xff] %v224_v1  ;;  %v230_v4 = vld [vmem:[%s2366_s3 + $0x40] sm:$0xff]  ;;  %v232_v5 = vld [vmem:[%s2366_s3 + $0x50] sm:$0xff] }
  0x19   : > { %227 = vst [vmem:[%s2371_s4 + $0x10] sm:$0xff] %v226_v2  ;;  %v234_v6 = vld [vmem:[%s2366_s3 + $0x60] sm:$0xff]  ;;  %v236_v7 = vld [vmem:[%s2366_s3 + $0x70] sm:$0xff] }
  0x1a   : > { %229 = vst [vmem:[%s2371_s4 + $0x18] sm:$0xff] %v228_v3  ;;  %v238_v8 = vld [vmem:[%s2366_s3 + $0x80] sm:$0xff]  ;;  %v240_v9 = vld [vmem:[%s2366_s3 + $0x90] sm:$0xff] }
  0x1b   : > { %231 = vst [vmem:[%s2371_s4 + $0x20] sm:$0xff] %v230_v4  ;;  %v242_v10 = vld [vmem:[%s2366_s3 + $0xa0] sm:$0xff]  ;;  %v244_v11 = vld [vmem:[%s2366_s3 + $0xb0] sm:$0xff] }
  0x1c   : > { %233 = vst [vmem:[%s2371_s4 + $0x28] sm:$0xff] %v232_v5  ;;  %v246_v12 = vld [vmem:[%s2366_s3 + $0xc0] sm:$0xff]  ;;  %v248_v13 = vld [vmem:[%s2366_s3 + $0xd0] sm:$0xff] }
  0x1d   : > { %235 = vst [vmem:[%s2371_s4 + $0x30] sm:$0xff] %v234_v6  ;;  %v250_v14 = vld [vmem:[%s2366_s3 + $0xe0] sm:$0xff]  ;;  %v252_v15 = vld [vmem:[%s2366_s3 + $0xf0] sm:$0xff] }
  0x1e   : > { %237 = vst [vmem:[%s2371_s4 + $0x38] sm:$0xff] %v236_v7  ;;  %v254_v16 = vld [vmem:[%s2366_s3 + $0x100] sm:$0xff]  ;;  %v256_v17 = vld [vmem:[%s2366_s3 + $0x110] sm:$0xff] }
  0x1f   : > { %239 = vst [vmem:[%s2371_s4 + $0x40] sm:$0xff] %v238_v8  ;;  %v258_v18 = vld [vmem:[%s2366_s3 + $0x120] sm:$0xff]  ;;  %v260_v19 = vld [vmem:[%s2366_s3 + $0x130] sm:$0xff] }
  0x20   : > { %241 = vst [vmem:[%s2371_s4 + $0x48] sm:$0xff] %v240_v9  ;;  %v262_v20 = vld [vmem:[%s2366_s3 + $0x140] sm:$0xff]  ;;  %v264_v21 = vld [vmem:[%s2366_s3 + $0x150] sm:$0xff] }
  0x21   : > { %243 = vst [vmem:[%s2371_s4 + $0x50] sm:$0xff] %v242_v10  ;;  %v266_v22 = vld [vmem:[%s2366_s3 + $0x160] sm:$0xff]  ;;  %v268_v23 = vld [vmem:[%s2366_s3 + $0x170] sm:$0xff] }
  0x22   : > { %245 = vst [vmem:[%s2371_s4 + $0x58] sm:$0xff] %v244_v11  ;;  %v270_v24 = vld [vmem:[%s2366_s3 + $0x180] sm:$0xff]  ;;  %v272_v25 = vld [vmem:[%s2366_s3 + $0x190] sm:$0xff] }
  0x23   : > { %247 = vst [vmem:[%s2371_s4 + $0x60] sm:$0xff] %v246_v12  ;;  %v274_v26 = vld [vmem:[%s2366_s3 + $0x1a0] sm:$0xff]  ;;  %v276_v27 = vld [vmem:[%s2366_s3 + $0x1b0] sm:$0xff] }
  0x24   : > { %249 = vst [vmem:[%s2371_s4 + $0x68] sm:$0xff] %v248_v13  ;;  %v278_v28 = vld [vmem:[%s2366_s3 + $0x1c0] sm:$0xff]  ;;  %v280_v29 = vld [vmem:[%s2366_s3 + $0x1d0] sm:$0xff] }
  0x25   : > { %251 = vst [vmem:[%s2371_s4 + $0x70] sm:$0xff] %v250_v14  ;;  %v282_v30 = vld [vmem:[%s2366_s3 + $0x1e0] sm:$0xff]  ;;  %v284_v31 = vld [vmem:[%s2366_s3 + $0x1f0] sm:$0xff] }
  0x26   : > { %253 = vst [vmem:[%s2371_s4 + $0x78] sm:$0xff] %v252_v15 }
  0x27   : > { %255 = vst [vmem:[%s2371_s4 + $0x80] sm:$0xff] %v254_v16 }
  0x28   : > { %257 = vst [vmem:[%s2371_s4 + $0x88] sm:$0xff] %v256_v17 }
  0x29   : > { %259 = vst [vmem:[%s2371_s4 + $0x90] sm:$0xff] %v258_v18 }
  0x2a   : > { %261 = vst [vmem:[%s2371_s4 + $0x98] sm:$0xff] %v260_v19 }
  0x2b   : > { %263 = vst [vmem:[%s2371_s4 + $0xa0] sm:$0xff] %v262_v20 }
  0x2c   : > { %265 = vst [vmem:[%s2371_s4 + $0xa8] sm:$0xff] %v264_v21 }
  0x2d   : > { %267 = vst [vmem:[%s2371_s4 + $0xb0] sm:$0xff] %v266_v22 }
  0x2e   : > { %269 = vst [vmem:[%s2371_s4 + $0xb8] sm:$0xff] %v268_v23 }
  0x2f   : > { %271 = vst [vmem:[%s2371_s4 + $0xc0] sm:$0xff] %v270_v24 }
  0x30   : > { %273 = vst [vmem:[%s2371_s4 + $0xc8] sm:$0xff] %v272_v25 }
  0x31   : > { %275 = vst [vmem:[%s2371_s4 + $0xd0] sm:$0xff] %v274_v26 }
  0x32   : > { %277 = vst [vmem:[%s2371_s4 + $0xd8] sm:$0xff] %v276_v27 }
  0x33   : > { %279 = vst [vmem:[%s2371_s4 + $0xe0] sm:$0xff] %v278_v28 }
  0x34   : > { %281 = vst [vmem:[%s2371_s4 + $0xe8] sm:$0xff] %v280_v29 }
  0x35   : > { %283 = vst [vmem:[%s2371_s4 + $0xf0] sm:$0xff] %v282_v30 }
  0x36   : > { %285 = vst [vmem:[%s2371_s4 + $0xf8] sm:$0xff] %v284_v31 }
  0x37 PF: > { %p1750_p7 = scmp.ge.s32.totalorder %s2288_s15, 1  ;;  %p299_p8 = scmp.lt.s32.totalorder %s2288_s15, 5 }
  0x39   : > { %p300_p9 = pnand %p1750_p7, %p299_p8 }
  0x3a   : > { %s306_s5 = sand.u32 (!%p300_p9), 1, %s2264_s9   ;;  %s1752_s6 = sshll.u32 (!%p300_p9), %s2272_s11, 5 }
  0x3b   : > { %303 = sbr.rel (%p300_p9) target bundleno = 537 (0x219), region = 62  ;;  %s1751_s7 = sshll.u32 (!%p300_p9), %s306_s5, 8 }
  0x3c   : > { %p335_p10 = scmp.lt.s32.totalorder (!%p300_p9), %s1752_s6, 63  ;;  %s1754_s8 = sshll.u32 (!%p300_p9), %s2276_s12, 5 }
  0x3d   : > { %p341_p11 = scmp.lt.s32.totalorder (!%p300_p9), %s1754_s8, 63  ;;  %s2449_s9 = scalar_lea.vmem (!%p300_p9), [#allocation3], %s1751_s7 }
  0x3e   : > { %p1756_p12 = scmp.ne.s32.totalorder (!%p300_p9), %s2272_s11, 0 }
  0x40   : > { %s3391_s6 = smov (!%p335_p10, %s1752_s6), 63  ;;  %s3393_s8 = smov (!%p341_p11, %s1754_s8), 63 }
  0x41   : > { %s1753_s18 = sshll.u32 %s3391_s6, 2  ;;  %s1755_s23 = sshll.u32 %s3393_s8, 3 }
  0x42   : > { %s2442_s21 = scalar_lea.vmem %s3259_s1, %s1753_s18  ;;  %s2447_s26 = scalar_lea.vmem %s3260_s2, %s1755_s23 }
  0x43   : > { %349 = sbr.rel (%p1756_p12) target bundleno = 105 (0x69), region = 70 }
  0x48   : > { %v2290_v32 = vmov 0.0  }
  0x49   : > { %350 = vst [vmem:[#allocation2 + $0xb0] sm:$0xff] %v2290_v32 }
  0x4a   : > { %351 = vst [vmem:[#allocation2] sm:$0xff] %v2290_v32 }
  0x4b   : > { %352 = vst [vmem:[#allocation2 + $0xd8] sm:$0xff] %v2290_v32 }
  0x4c   : > { %353 = vst [vmem:[#allocation2 + $0x18] sm:$0xff] %v2290_v32 }
  0x4d   : > { %354 = vst [vmem:[#allocation2 + $0x50] sm:$0xff] %v2290_v32 }
  0x4e   : > { %355 = vst [vmem:[#allocation2 + $0x68] sm:$0xff] %v2290_v32 }
  0x4f   : > { %356 = vst [vmem:[#allocation2 + $0x30] sm:$0xff] %v2290_v32 }
  0x50   : > { %357 = vst [vmem:[#allocation2 + $0x48] sm:$0xff] %v2290_v32 }
  0x51   : > { %358 = vst [vmem:[#allocation2 + $0x80] sm:$0xff] %v2290_v32 }
  0x52   : > { %359 = vst [vmem:[#allocation2 + $0x88] sm:$0xff] %v2290_v32 }
  0x53   : > { %360 = vst [vmem:[#allocation2 + $0xe8] sm:$0xff] %v2290_v32 }
  0x54   : > { %361 = vst [vmem:[#allocation2 + $0xb8] sm:$0xff] %v2290_v32 }
  0x55   : > { %362 = vst [vmem:[#allocation2 + $0x60] sm:$0xff] %v2290_v32 }
  0x56   : > { %363 = vst [vmem:[#allocation2 + $0xf0] sm:$0xff] %v2290_v32 }
  0x57   : > { %364 = vst [vmem:[#allocation2 + $0x8] sm:$0xff] %v2290_v32 }
  0x58   : > { %365 = vst [vmem:[#allocation2 + $0x78] sm:$0xff] %v2290_v32 }
  0x59   : > { %366 = vst [vmem:[#allocation2 + $0x38] sm:$0xff] %v2290_v32 }
  0x5a   : > { %367 = vst [vmem:[#allocation2 + $0x58] sm:$0xff] %v2290_v32 }
  0x5b   : > { %368 = vst [vmem:[#allocation2 + $0x40] sm:$0xff] %v2290_v32 }
  0x5c   : > { %369 = vst [vmem:[#allocation2 + $0xc8] sm:$0xff] %v2290_v32 }
  0x5d   : > { %370 = vst [vmem:[#allocation2 + $0xe0] sm:$0xff] %v2290_v32 }
  0x5e   : > { %371 = vst [vmem:[#allocation2 + $0x90] sm:$0xff] %v2290_v32 }
  0x5f   : > { %372 = vst [vmem:[#allocation2 + $0x70] sm:$0xff] %v2290_v32 }
  0x60   : > { %373 = vst [vmem:[#allocation2 + $0xc0] sm:$0xff] %v2290_v32 }
  0x61   : > { %374 = vst [vmem:[#allocation2 + $0xa8] sm:$0xff] %v2290_v32 }
  0x62   : > { %375 = vst [vmem:[#allocation2 + $0xd0] sm:$0xff] %v2290_v32 }
  0x63   : > { %376 = vst [vmem:[#allocation2 + $0x10] sm:$0xff] %v2290_v32 }
  0x64   : > { %377 = vst [vmem:[#allocation2 + $0x28] sm:$0xff] %v2290_v32 }
  0x65   : > { %378 = vst [vmem:[#allocation2 + $0xa0] sm:$0xff] %v2290_v32 }
  0x66   : > { %379 = vst [vmem:[#allocation2 + $0xf8] sm:$0xff] %v2290_v32 }
  0x67   : > { %380 = vst [vmem:[#allocation2 + $0x20] sm:$0xff] %v2290_v32 }
  0x68   : > { %381 = vst [vmem:[#allocation2 + $0x98] sm:$0xff] %v2290_v32 }
  0x69 PF: > { %v2024_v33 = vld [vmem:[%s2442_s21 + $0x38] sm:$0xff]  ;;  %v2023_v35 = vld [vmem:[%s2442_s21 + $0x30] sm:$0xff]  ;;  %v2022_v37 = vld [vmem:[%s2442_s21 + $0x28] sm:$0xff]  ;;  %p1949_p13 = scmp.ne.s32.totalorder %s2272_s11, 1 }
  0x6a   : > { %v2032_v34 = vld [vmem:[%s2442_s21 + $0x78] sm:$0xff]  ;;  %734 = vmatpush.bf16.msra.mxu0 %v2024_v33  ;;  %2033 = vmatpush.bf16.msra.mxu2 %v2024_v33  ;;  %v2031_v36 = vld [vmem:[%s2442_s21 + $0x70] sm:$0xff]  ;;  %v2030_v38 = vld [vmem:[%s2442_s21 + $0x68] sm:$0xff] }
  0x6b   : > { %823 = vmatpush.bf16.msra.mxu1 %v2032_v34  ;;  %2041 = vmatpush.bf16.msra.mxu3 %v2032_v34  ;;  %v2021_v39 = vld [vmem:[%s2442_s21 + $0x20] sm:$0xff]  ;;  %v2020_v41 = vld [vmem:[%s2442_s21 + $0x18] sm:$0xff]  ;;  %v2019_v43 = vld [vmem:[%s2442_s21 + $0x10] sm:$0xff] }
  0x6c   : > { %v2029_v40 = vld [vmem:[%s2442_s21 + $0x60] sm:$0xff]  ;;  %v2028_v42 = vld [vmem:[%s2442_s21 + $0x58] sm:$0xff]  ;;  %v2027_v44 = vld [vmem:[%s2442_s21 + $0x50] sm:$0xff] }
  0x6d   : > { %v2018_v45 = vld [vmem:[%s2442_s21 + $0x8] sm:$0xff]  ;;  %v2017_v47 = vld [vmem:[%s2442_s21] sm:$0xff]  ;;  %v1767_v61 = vld [vmem:[%s2449_s9 + $0x10] sm:$0xf] }
  0x6e   : > { %735 = vmatpush.bf16.msra.mxu0 %v2023_v35  ;;  %2034 = vmatpush.bf16.msra.mxu2 %v2023_v35  ;;  %v2026_v46 = vld [vmem:[%s2442_s21 + $0x48] sm:$0xff]  ;;  %v2025_v48 = vld [vmem:[%s2442_s21 + $0x40] sm:$0xff]  ;;  %v1988_v62 = vld [vmem:[%s2449_s9 + $0x14] sm:$0xf0] }
  0x6f   : > { %824 = vmatpush.bf16.msra.mxu1 %v2031_v36  ;;  %2042 = vmatpush.bf16.msra.mxu3 %v2031_v36  ;;  %v1759_v49 = vld [vmem:[%s2449_s9] sm:$0xf]  ;;  %v1986_v50 = vld [vmem:[%s2449_s9 + $0x4] sm:$0xf0]  ;;  %v1985_v53 = vld [vmem:[%s2449_s9 + $0x4] sm:$0xf]  ;;  %v1768_v5 = vor.u32 %v1988_v62, %v1767_v61 }
  0x70   : > { %v1823_v51 = vld [vmem:[%s2449_s9 + $0x80] sm:$0xf]  ;;  %v2002_v52 = vld [vmem:[%s2449_s9 + $0x84] sm:$0xf0]  ;;  %v1761_v54 = vld [vmem:[%s2449_s9 + $0x8] sm:$0xf0]  ;;  %v1760_v57 = vor.u32 %v1986_v50, %v1759_v49 }
  0x71   : > { %v2001_v55 = vld [vmem:[%s2449_s9 + $0x84] sm:$0xf]  ;;  %v1825_v56 = vld [vmem:[%s2449_s9 + $0x88] sm:$0xf0]  ;;  %v1824_v58 = vor.u32 %v2002_v52, %v1823_v51  ;;  %v1764_v59 = vor.u32 %v1985_v53, %v1761_v54  ;;  %v1831_v63 = vld [vmem:[%s2449_s9 + $0x90] sm:$0xf] }
  0x72   : > { %736 = vmatpush.bf16.msra.mxu0 %v2022_v37  ;;  %2035 = vmatpush.bf16.msra.mxu2 %v2022_v37  ;;  %v1828_v60 = vor.u32 %v2001_v55, %v1825_v56  ;;  %v2004_v0 = vld [vmem:[%s2449_s9 + $0x94] sm:$0xf0]  ;;  %v1987_v1 = vld [vmem:[%s2449_s9 + $0x14] sm:$0xf]  ;;  %v1769_v2 = vld [vmem:[%s2449_s9 + $0x18] sm:$0xf0] }
  0x73   : > { %825 = vmatpush.bf16.msra.mxu1 %v2030_v38  ;;  %2043 = vmatpush.bf16.msra.mxu3 %v2030_v38  ;;  %v2003_v3 = vld [vmem:[%s2449_s9 + $0x94] sm:$0xf]  ;;  %v1833_v4 = vld [vmem:[%s2449_s9 + $0x98] sm:$0xf0]  ;;  %v1832_v6 = vor.u32 %v2004_v0, %v1831_v63  ;;  %v1772_v7 = vor.u32 %v1987_v1, %v1769_v2  ;;  %v1775_v9 = vld [vmem:[%s2449_s9 + $0x20] sm:$0xf] }
  0x74   : > { %v1836_v8 = vor.u32 %v2003_v3, %v1833_v4  ;;  %v1990_v10 = vld [vmem:[%s2449_s9 + $0x24] sm:$0xf0]  ;;  %v1839_v11 = vld [vmem:[%s2449_s9 + $0xa0] sm:$0xf]  ;;  %v1989_v13 = vld [vmem:[%s2449_s9 + $0x24] sm:$0xf] }
  0x75   : > { %v2006_v12 = vld [vmem:[%s2449_s9 + $0xa4] sm:$0xf0]  ;;  %v1777_v14 = vld [vmem:[%s2449_s9 + $0x28] sm:$0xf0]  ;;  %v2005_v15 = vld [vmem:[%s2449_s9 + $0xa4] sm:$0xf]  ;;  %v1776_v17 = vor.u32 %v1990_v10, %v1775_v9 }
  0x76   : > { %737 = vmatpush.bf16.msra.mxu0 %v2021_v39  ;;  %2036 = vmatpush.bf16.msra.mxu2 %v2021_v39  ;;  %v1841_v16 = vld [vmem:[%s2449_s9 + $0xa8] sm:$0xf0]  ;;  %v1840_v18 = vor.u32 %v2006_v12, %v1839_v11  ;;  %v1780_v19 = vor.u32 %v1989_v13, %v1777_v14  ;;  %v1783_v21 = vld [vmem:[%s2449_s9 + $0x30] sm:$0xf]  ;;  %v1992_v22 = vld [vmem:[%s2449_s9 + $0x34] sm:$0xf0] }
  0x77   : > { %826 = vmatpush.bf16.msra.mxu1 %v2029_v40  ;;  %2044 = vmatpush.bf16.msra.mxu3 %v2029_v40  ;;  %v1844_v20 = vor.u32 %v2005_v15, %v1841_v16  ;;  %v1847_v23 = vld [vmem:[%s2449_s9 + $0xb0] sm:$0xf]  ;;  %v2008_v24 = vld [vmem:[%s2449_s9 + $0xb4] sm:$0xf0]  ;;  %v1991_v25 = vld [vmem:[%s2449_s9 + $0x34] sm:$0xf]  ;;  %v1784_v29 = vor.u32 %v1992_v22, %v1783_v21 }
  0x78   : > { %v1785_v26 = vld [vmem:[%s2449_s9 + $0x38] sm:$0xf0]  ;;  %v2007_v27 = vld [vmem:[%s2449_s9 + $0xb4] sm:$0xf]  ;;  %v1848_v30 = vor.u32 %v2008_v24, %v1847_v23  ;;  %v1791_v33 = vld [vmem:[%s2449_s9 + $0x40] sm:$0xf] }
  0x79   : > { %v1849_v28 = vld [vmem:[%s2449_s9 + $0xb8] sm:$0xf0]  ;;  %v1788_v31 = vor.u32 %v1991_v25, %v1785_v26  ;;  %v1994_v34 = vld [vmem:[%s2449_s9 + $0x44] sm:$0xf0]  ;;  %v1855_v35 = vld [vmem:[%s2449_s9 + $0xc0] sm:$0xf] }
  0x7a   : > { %738 = vmatpush.bf16.msra.mxu0 %v2020_v41  ;;  %2037 = vmatpush.bf16.msra.mxu2 %v2020_v41  ;;  %v1852_v32 = vor.u32 %v2007_v27, %v1849_v28  ;;  %v2010_v36 = vld [vmem:[%s2449_s9 + $0xc4] sm:$0xf0]  ;;  %v1993_v37 = vld [vmem:[%s2449_s9 + $0x44] sm:$0xf]  ;;  %v1793_v38 = vld [vmem:[%s2449_s9 + $0x48] sm:$0xf0]  ;;  %v1792_v41 = vor.u32 %v1994_v34, %v1791_v33 }
  0x7b   : > { %827 = vmatpush.bf16.msra.mxu1 %v2028_v42  ;;  %2045 = vmatpush.bf16.msra.mxu3 %v2028_v42  ;;  %v2009_v39 = vld [vmem:[%s2449_s9 + $0xc4] sm:$0xf]  ;;  %v1857_v40 = vld [vmem:[%s2449_s9 + $0xc8] sm:$0xf0]  ;;  %v1856_v42 = vor.u32 %v2010_v36, %v1855_v35  ;;  %v1995_v49 = vld [vmem:[%s2449_s9 + $0x54] sm:$0xf] }
  0x7c   : > { %v1801_v50 = vld [vmem:[%s2449_s9 + $0x58] sm:$0xf0]  ;;  %v2011_v51 = vld [vmem:[%s2449_s9 + $0xd4] sm:$0xf]  ;;  %v1997_v61 = vld [vmem:[%s2449_s9 + $0x64] sm:$0xf] }
  0x7d   : > { %v1865_v52 = vld [vmem:[%s2449_s9 + $0xd8] sm:$0xf0]  ;;  %v1804_v55 = vor.u32 %v1995_v49, %v1801_v50  ;;  %v1809_v62 = vld [vmem:[%s2449_s9 + $0x68] sm:$0xf0]  ;;  %v2013_v63 = vld [vmem:[%s2449_s9 + $0xe4] sm:$0xf] }
  0x7e   : > { %739 = vmatpush.bf16.msra.mxu0 %v2019_v43  ;;  %2038 = vmatpush.bf16.msra.mxu2 %v2019_v43  ;;  %v1796_v43 = vor.u32 %v1993_v37, %v1793_v38  ;;  %v1868_v56 = vor.u32 %v2011_v51, %v1865_v52  ;;  %v1873_v0 = vld [vmem:[%s2449_s9 + $0xe8] sm:$0xf0]  ;;  %v1812_v3 = vor.u32 %v1997_v61, %v1809_v62  ;;  %v1999_v9 = vld [vmem:[%s2449_s9 + $0x74] sm:$0xf]  ;;  %v1817_v10 = vld [vmem:[%s2449_s9 + $0x78] sm:$0xf0] }
  0x7f   : > { %828 = vmatpush.bf16.msra.mxu1 %v2027_v44  ;;  %2046 = vmatpush.bf16.msra.mxu3 %v2027_v44  ;;  %v1860_v44 = vor.u32 %v2009_v39, %v1857_v40  ;;  %v1876_v4 = vor.u32 %v2013_v63, %v1873_v0  ;;  %v2015_v11 = vld [vmem:[%s2449_s9 + $0xf4] sm:$0xf]  ;;  %v1881_v12 = vld [vmem:[%s2449_s9 + $0xf8] sm:$0xf0]  ;;  %v1820_v15 = vor.u32 %v1999_v9, %v1817_v10  ;;  %v383_v27 = vld [vmem:[#allocation2] sm:$0xff] }
  0x80   : > { %v1884_v16 = vor.u32 %v2015_v11, %v1881_v12  ;;  %v398_v23 = vld [vmem:[#allocation2 + $0x38] sm:$0xff]  ;;  %v402_v63 = vld [vmem:[#allocation2 + $0xe0] sm:$0xff]  ;;  %v403_v9 = vld [vmem:[#allocation2 + $0x90] sm:$0xff] }
  0x81   : > { %v399_v33 = vld [vmem:[#allocation2 + $0x58] sm:$0xff] }
  0x82   : > { %740 = vmatpush.bf16.msra.mxu0 %v2018_v45  ;;  %2039 = vmatpush.bf16.msra.mxu2 %v2018_v45  ;;  %v1799_v45 = vld [vmem:[%s2449_s9 + $0x50] sm:$0xf]  ;;  %v384_v37 = vld [vmem:[#allocation2 + $0xd8] sm:$0xff] }
  0x83   : > { %829 = vmatpush.bf16.msra.mxu1 %v2026_v46  ;;  %2047 = vmatpush.bf16.msra.mxu3 %v2026_v46  ;;  %v1996_v46 = vld [vmem:[%s2449_s9 + $0x54] sm:$0xf0] }
  0x84   : > { %v1800_v53 = vor.u32 %v1996_v46, %v1799_v45 }
  0x86   : > { %741 = vmatpush.bf16.msra.mxu0 %v2017_v47  ;;  %2040 = vmatpush.bf16.msra.mxu2 %v2017_v47  ;;  %v1863_v47 = vld [vmem:[%s2449_s9 + $0xd0] sm:$0xf] }
  0x87   : > { %830 = vmatpush.bf16.msra.mxu1 %v2025_v48  ;;  %2048 = vmatpush.bf16.msra.mxu3 %v2025_v48  ;;  %v2012_v48 = vld [vmem:[%s2449_s9 + $0xd4] sm:$0xf0] }
  0x88   : > { %v1864_v54 = vor.u32 %v2012_v48, %v1863_v47  ;;  %v385_v47 = vld [vmem:[#allocation2 + $0x18] sm:$0xff] }
  0x89   : > { %742 = vmatmul.bf16.vlgmr.msra.gmra.mxu0 %v1760_v57  ;;  %782 = vmatmul.bf16.vlgmr.msra.gmra.mxu2 %v1824_v58  ;;  %v1807_v57 = vld [vmem:[%s2449_s9 + $0x60] sm:$0xf]  ;;  %v1998_v58 = vld [vmem:[%s2449_s9 + $0x64] sm:$0xf0] }
  0x8a   : > { %831 = vmatmul.bf16.vlgmr.msra.gmra.mxu1 %v1764_v59  ;;  %871 = vmatmul.bf16.vlgmr.msra.gmra.mxu3 %v1828_v60  ;;  %v1871_v59 = vld [vmem:[%s2449_s9 + $0xe0] sm:$0xf]  ;;  %v2014_v60 = vld [vmem:[%s2449_s9 + $0xe4] sm:$0xf0]  ;;  %v1808_v1 = vor.u32 %v1998_v58, %v1807_v57  ;;  %v386_v57 = vld [vmem:[#allocation2 + $0x50] sm:$0xff] }
  0x8b   : > { %v1872_v2 = vor.u32 %v2014_v60, %v1871_v59 }
  0x99   : > { %747 = vmatmul.bf16.gmra.mxu0 %v1768_v5  ;;  %787 = vmatmul.bf16.gmra.mxu2 %v1832_v6  ;;  %v1815_v5 = vld [vmem:[%s2449_s9 + $0x70] sm:$0xf]  ;;  %v2000_v6 = vld [vmem:[%s2449_s9 + $0x74] sm:$0xf0] }
  0x9a   : > { %836 = vmatmul.bf16.gmra.mxu1 %v1772_v7  ;;  %876 = vmatmul.bf16.gmra.mxu3 %v1836_v8  ;;  %v1879_v7 = vld [vmem:[%s2449_s9 + $0xf0] sm:$0xf]  ;;  %v2016_v8 = vld [vmem:[%s2449_s9 + $0xf4] sm:$0xf0]  ;;  %v1816_v13 = vor.u32 %v2000_v6, %v1815_v5 }
  0x9b   : > { %v1880_v14 = vor.u32 %v2016_v8, %v1879_v7 }
  0xa9   : > { %752 = vmatmul.bf16.gmra.mxu0 %v1776_v17  ;;  %792 = vmatmul.bf16.gmra.mxu2 %v1840_v18  ;;  %v382_v18 = vld [vmem:[#allocation2 + $0xb0] sm:$0xff] }
  0xaa   : > { %841 = vmatmul.bf16.gmra.mxu1 %v1780_v19  ;;  %881 = vmatmul.bf16.gmra.mxu3 %v1844_v20 }
  0xb9   : > { %757 = vmatmul.bf16.gmra.mxu0 %v1784_v29  ;;  %797 = vmatmul.bf16.gmra.mxu2 %v1848_v30 }
  0xba   : > { %846 = vmatmul.bf16.gmra.mxu1 %v1788_v31  ;;  %886 = vmatmul.bf16.gmra.mxu3 %v1852_v32 }
  0xc9   : > { %762 = vmatmul.bf16.gmra.mxu0 %v1792_v41  ;;  %802 = vmatmul.bf16.gmra.mxu2 %v1856_v42 }
  0xca   : > { %851 = vmatmul.bf16.gmra.mxu1 %v1796_v43  ;;  %891 = vmatmul.bf16.gmra.mxu3 %v1860_v44  ;;  %v400_v43 = vld [vmem:[#allocation2 + $0x40] sm:$0xff] }
  0xd9   : > { %767 = vmatmul.bf16.gmra.mxu0 %v1800_v53  ;;  %807 = vmatmul.bf16.gmra.mxu2 %v1864_v54  ;;  %v401_v53 = vld [vmem:[#allocation2 + $0xc8] sm:$0xff] }
  0xda   : > { %856 = vmatmul.bf16.gmra.mxu1 %v1804_v55  ;;  %896 = vmatmul.bf16.gmra.mxu3 %v1868_v56 }
  0xe9   : > { %772 = vmatmul.bf16.gmra.mxu0 %v1808_v1  ;;  %812 = vmatmul.bf16.gmra.mxu2 %v1872_v2 }
  0xea   : > { %861 = vmatmul.bf16.gmra.mxu1 %v1812_v3  ;;  %901 = vmatmul.bf16.gmra.mxu3 %v1876_v4  ;;  %v387_v3 = vld [vmem:[#allocation2 + $0x68] sm:$0xff] }
  0xf9   : > { %777 = vmatmul.bf16.gmra.mxu0 %v1816_v13  ;;  %817 = vmatmul.bf16.gmra.mxu2 %v1880_v14  ;;  %v388_v13 = vld [vmem:[#allocation2 + $0x30] sm:$0xff] }
  0xfa   : > { %866 = vmatmul.bf16.gmra.mxu1 %v1820_v15  ;;  %906 = vmatmul.bf16.gmra.mxu3 %v1884_v16 }
 0x106   : > { %v743_v17 = vpop.f32.mrf.mxu0 }
 0x107   : > { %v832_v19 = vpop.f32.mrf.mxu1 }
 0x108   : > { %v833_v20 = vadd.f32 %v832_v19, %v743_v17  ;;  %v404_v19 = vld [vmem:[#allocation2 + $0x70] sm:$0xff] }
 0x10a   : > { %v912_v21 = vadd.f32 %v833_v20, %v382_v18 }
 0x10c   : > { %944 = vst [vmem:[#allocation2 + $0xb0] sm:$0xff] %v912_v21  ;;  %v783_v22 = vpop.f32.mrf.mxu2 }
 0x10d   : > { %v872_v24 = vpop.f32.mrf.mxu3 }
 0x10e   : > { %v873_v25 = vadd.f32 %v872_v24, %v783_v22  ;;  %v745_v26 = vpop.f32.mrf.mxu0 }
 0x10f   : > { %v834_v28 = vpop.f32.mrf.mxu1 }
 0x110   : > { %v928_v29 = vadd.f32 %v873_v25, %v398_v23  ;;  %v835_v30 = vadd.f32 %v834_v28, %v745_v26  ;;  %v389_v23 = vld [vmem:[#allocation2 + $0x48] sm:$0xff] }
 0x112   : > { %960 = vst [vmem:[#allocation2 + $0x38] sm:$0xff] %v928_v29  ;;  %v913_v31 = vadd.f32 %v835_v30, %v383_v27  ;;  %v405_v29 = vld [vmem:[#allocation2 + $0xc0] sm:$0xff] }
 0x114   : > { %945 = vst [vmem:[#allocation2] sm:$0xff] %v913_v31  ;;  %v785_v32 = vpop.f32.mrf.mxu2 }
 0x115   : > { %v874_v34 = vpop.f32.mrf.mxu3 }
 0x116   : > { %v875_v35 = vadd.f32 %v874_v34, %v785_v32  ;;  %v748_v36 = vpop.f32.mrf.mxu0 }
 0x117   : > { %v837_v38 = vpop.f32.mrf.mxu1 }
 0x118   : > { %v929_v39 = vadd.f32 %v875_v35, %v399_v33  ;;  %v838_v40 = vadd.f32 %v837_v38, %v748_v36  ;;  %v390_v33 = vld [vmem:[#allocation2 + $0x80] sm:$0xff] }
 0x11a   : > { %961 = vst [vmem:[#allocation2 + $0x58] sm:$0xff] %v929_v39  ;;  %v914_v41 = vadd.f32 %v838_v40, %v384_v37  ;;  %v406_v39 = vld [vmem:[#allocation2 + $0xa8] sm:$0xff] }
 0x11c   : > { %946 = vst [vmem:[#allocation2 + $0xd8] sm:$0xff] %v914_v41  ;;  %v788_v42 = vpop.f32.mrf.mxu2 }
 0x11d   : > { %v877_v44 = vpop.f32.mrf.mxu3 }
 0x11e   : > { %v878_v45 = vadd.f32 %v877_v44, %v788_v42  ;;  %v750_v46 = vpop.f32.mrf.mxu0 }
 0x11f   : > { %v839_v48 = vpop.f32.mrf.mxu1 }
 0x120   : > { %v930_v49 = vadd.f32 %v878_v45, %v400_v43  ;;  %v840_v50 = vadd.f32 %v839_v48, %v750_v46  ;;  %v391_v43 = vld [vmem:[#allocation2 + $0x88] sm:$0xff] }
 0x122   : > { %962 = vst [vmem:[#allocation2 + $0x40] sm:$0xff] %v930_v49  ;;  %v915_v51 = vadd.f32 %v840_v50, %v385_v47  ;;  %v407_v49 = vld [vmem:[#allocation2 + $0xd0] sm:$0xff] }
 0x124   : > { %947 = vst [vmem:[#allocation2 + $0x18] sm:$0xff] %v915_v51  ;;  %v790_v52 = vpop.f32.mrf.mxu2 }
 0x125   : > { %v879_v54 = vpop.f32.mrf.mxu3 }
 0x126   : > { %v880_v55 = vadd.f32 %v879_v54, %v790_v52  ;;  %v753_v56 = vpop.f32.mrf.mxu0 }
 0x127   : > { %v842_v58 = vpop.f32.mrf.mxu1 }
 0x128   : > { %v931_v59 = vadd.f32 %v880_v55, %v401_v53  ;;  %v843_v60 = vadd.f32 %v842_v58, %v753_v56  ;;  %v392_v53 = vld [vmem:[#allocation2 + $0xe8] sm:$0xff] }
 0x12a   : > { %963 = vst [vmem:[#allocation2 + $0xc8] sm:$0xff] %v931_v59  ;;  %v916_v61 = vadd.f32 %v843_v60, %v386_v57  ;;  %v408_v59 = vld [vmem:[#allocation2 + $0x10] sm:$0xff] }
 0x12c   : > { %948 = vst [vmem:[#allocation2 + $0x50] sm:$0xff] %v916_v61  ;;  %v793_v62 = vpop.f32.mrf.mxu2 }
 0x12d   : > { %v882_v0 = vpop.f32.mrf.mxu3 }
 0x12e   : > { %v883_v1 = vadd.f32 %v882_v0, %v793_v62  ;;  %v755_v2 = vpop.f32.mrf.mxu0 }
 0x12f   : > { %v844_v4 = vpop.f32.mrf.mxu1 }
 0x130   : > { %v932_v5 = vadd.f32 %v883_v1, %v402_v63  ;;  %v845_v6 = vadd.f32 %v844_v4, %v755_v2  ;;  %v393_v63 = vld [vmem:[#allocation2 + $0xb8] sm:$0xff] }
 0x132   : > { %964 = vst [vmem:[#allocation2 + $0xe0] sm:$0xff] %v932_v5  ;;  %v917_v7 = vadd.f32 %v845_v6, %v387_v3  ;;  %v409_v5 = vld [vmem:[#allocation2 + $0x28] sm:$0xff] }
 0x134   : > { %949 = vst [vmem:[#allocation2 + $0x68] sm:$0xff] %v917_v7  ;;  %v795_v8 = vpop.f32.mrf.mxu2 }
 0x135   : > { %v884_v10 = vpop.f32.mrf.mxu3 }
 0x136   : > { %v885_v11 = vadd.f32 %v884_v10, %v795_v8  ;;  %v758_v12 = vpop.f32.mrf.mxu0 }
 0x137   : > { %v847_v14 = vpop.f32.mrf.mxu1 }
 0x138   : > { %v933_v15 = vadd.f32 %v885_v11, %v403_v9  ;;  %v848_v16 = vadd.f32 %v847_v14, %v758_v12  ;;  %v394_v9 = vld [vmem:[#allocation2 + $0x60] sm:$0xff] }
 0x13a   : > { %965 = vst [vmem:[#allocation2 + $0x90] sm:$0xff] %v933_v15  ;;  %v918_v17 = vadd.f32 %v848_v16, %v388_v13  ;;  %v410_v15 = vld [vmem:[#allocation2 + $0xa0] sm:$0xff] }
 0x13c   : > { %950 = vst [vmem:[#allocation2 + $0x30] sm:$0xff] %v918_v17  ;;  %v798_v18 = vpop.f32.mrf.mxu2 }
 0x13d   : > { %v887_v20 = vpop.f32.mrf.mxu3 }
 0x13e   : > { %v888_v21 = vadd.f32 %v887_v20, %v798_v18  ;;  %v760_v22 = vpop.f32.mrf.mxu0 }
 0x13f   : > { %v849_v24 = vpop.f32.mrf.mxu1 }
 0x140   : > { %v934_v25 = vadd.f32 %v888_v21, %v404_v19  ;;  %v850_v26 = vadd.f32 %v849_v24, %v760_v22  ;;  %v395_v19 = vld [vmem:[#allocation2 + $0xf0] sm:$0xff] }
 0x142   : > { %966 = vst [vmem:[#allocation2 + $0x70] sm:$0xff] %v934_v25  ;;  %v919_v27 = vadd.f32 %v850_v26, %v389_v23  ;;  %v411_v25 = vld [vmem:[#allocation2 + $0xf8] sm:$0xff] }
 0x144   : > { %951 = vst [vmem:[#allocation2 + $0x48] sm:$0xff] %v919_v27  ;;  %v800_v28 = vpop.f32.mrf.mxu2 }
 0x145   : > { %v889_v30 = vpop.f32.mrf.mxu3 }
 0x146   : > { %v890_v31 = vadd.f32 %v889_v30, %v800_v28  ;;  %v763_v32 = vpop.f32.mrf.mxu0 }
 0x147   : > { %v852_v34 = vpop.f32.mrf.mxu1 }
 0x148   : > { %v935_v35 = vadd.f32 %v890_v31, %v405_v29  ;;  %v853_v36 = vadd.f32 %v852_v34, %v763_v32  ;;  %v396_v29 = vld [vmem:[#allocation2 + $0x8] sm:$0xff] }
 0x14a   : > { %967 = vst [vmem:[#allocation2 + $0xc0] sm:$0xff] %v935_v35  ;;  %v920_v37 = vadd.f32 %v853_v36, %v390_v33  ;;  %v412_v35 = vld [vmem:[#allocation2 + $0x20] sm:$0xff] }
 0x14c   : > { %952 = vst [vmem:[#allocation2 + $0x80] sm:$0xff] %v920_v37  ;;  %v803_v38 = vpop.f32.mrf.mxu2 }
 0x14d   : > { %v892_v40 = vpop.f32.mrf.mxu3 }
 0x14e   : > { %v893_v41 = vadd.f32 %v892_v40, %v803_v38  ;;  %v765_v42 = vpop.f32.mrf.mxu0 }
 0x14f   : > { %v854_v44 = vpop.f32.mrf.mxu1 }
 0x150   : > { %v936_v45 = vadd.f32 %v893_v41, %v406_v39  ;;  %v855_v46 = vadd.f32 %v854_v44, %v765_v42  ;;  %v397_v39 = vld [vmem:[#allocation2 + $0x78] sm:$0xff] }
 0x152   : > { %968 = vst [vmem:[#allocation2 + $0xa8] sm:$0xff] %v936_v45  ;;  %v921_v47 = vadd.f32 %v855_v46, %v391_v43  ;;  %v413_v45 = vld [vmem:[#allocation2 + $0x98] sm:$0xff] }
 0x154   : > { %953 = vst [vmem:[#allocation2 + $0x88] sm:$0xff] %v921_v47  ;;  %v805_v48 = vpop.f32.mrf.mxu2 }
 0x155   : > { %v894_v50 = vpop.f32.mrf.mxu3 }
 0x156   : > { %v895_v51 = vadd.f32 %v894_v50, %v805_v48  ;;  %v768_v52 = vpop.f32.mrf.mxu0 }
 0x157   : > { %v857_v54 = vpop.f32.mrf.mxu1 }
 0x158   : > { %v937_v55 = vadd.f32 %v895_v51, %v407_v49  ;;  %v858_v56 = vadd.f32 %v857_v54, %v768_v52 }
 0x15a   : > { %969 = vst [vmem:[#allocation2 + $0xd0] sm:$0xff] %v937_v55  ;;  %v922_v57 = vadd.f32 %v858_v56, %v392_v53 }
 0x15c   : > { %954 = vst [vmem:[#allocation2 + $0xe8] sm:$0xff] %v922_v57  ;;  %v808_v58 = vpop.f32.mrf.mxu2 }
 0x15d   : > { %v897_v60 = vpop.f32.mrf.mxu3 }
 0x15e   : > { %v898_v61 = vadd.f32 %v897_v60, %v808_v58  ;;  %v770_v62 = vpop.f32.mrf.mxu0 }
 0x15f   : > { %v859_v0 = vpop.f32.mrf.mxu1 }
 0x160   : > { %v938_v1 = vadd.f32 %v898_v61, %v408_v59  ;;  %v860_v2 = vadd.f32 %v859_v0, %v770_v62 }
 0x162   : > { %970 = vst [vmem:[#allocation2 + $0x10] sm:$0xff] %v938_v1  ;;  %v923_v3 = vadd.f32 %v860_v2, %v393_v63 }
 0x164   : > { %955 = vst [vmem:[#allocation2 + $0xb8] sm:$0xff] %v923_v3  ;;  %v810_v4 = vpop.f32.mrf.mxu2 }
 0x165   : > { %v899_v6 = vpop.f32.mrf.mxu3 }
 0x166   : > { %v900_v7 = vadd.f32 %v899_v6, %v810_v4  ;;  %v773_v8 = vpop.f32.mrf.mxu0 }
 0x167   : > { %v862_v10 = vpop.f32.mrf.mxu1 }
 0x168   : > { %v939_v11 = vadd.f32 %v900_v7, %v409_v5  ;;  %v863_v12 = vadd.f32 %v862_v10, %v773_v8 }
 0x16a   : > { %971 = vst [vmem:[#allocation2 + $0x28] sm:$0xff] %v939_v11  ;;  %v924_v13 = vadd.f32 %v863_v12, %v394_v9 }
 0x16c   : > { %956 = vst [vmem:[#allocation2 + $0x60] sm:$0xff] %v924_v13  ;;  %v813_v14 = vpop.f32.mrf.mxu2 }
 0x16d   : > { %v902_v16 = vpop.f32.mrf.mxu3 }
 0x16e   : > { %v903_v17 = vadd.f32 %v902_v16, %v813_v14  ;;  %v775_v18 = vpop.f32.mrf.mxu0 }
 0x16f   : > { %v864_v20 = vpop.f32.mrf.mxu1 }
 0x170   : > { %v940_v21 = vadd.f32 %v903_v17, %v410_v15  ;;  %v865_v22 = vadd.f32 %v864_v20, %v775_v18 }
 0x172   : > { %972 = vst [vmem:[#allocation2 + $0xa0] sm:$0xff] %v940_v21  ;;  %v925_v23 = vadd.f32 %v865_v22, %v395_v19 }
 0x174   : > { %957 = vst [vmem:[#allocation2 + $0xf0] sm:$0xff] %v925_v23  ;;  %v815_v24 = vpop.f32.mrf.mxu2 }
 0x175   : > { %v904_v26 = vpop.f32.mrf.mxu3 }
 0x176   : > { %v905_v27 = vadd.f32 %v904_v26, %v815_v24  ;;  %v778_v28 = vpop.f32.mrf.mxu0 }
 0x177   : > { %v867_v30 = vpop.f32.mrf.mxu1 }
 0x178   : > { %v941_v31 = vadd.f32 %v905_v27, %v411_v25  ;;  %v868_v32 = vadd.f32 %v867_v30, %v778_v28 }
 0x17a   : > { %973 = vst [vmem:[#allocation2 + $0xf8] sm:$0xff] %v941_v31  ;;  %v926_v33 = vadd.f32 %v868_v32, %v396_v29 }
 0x17c   : > { %958 = vst [vmem:[#allocation2 + $0x8] sm:$0xff] %v926_v33  ;;  %v818_v34 = vpop.f32.mrf.mxu2 }
 0x17d   : > { %v907_v36 = vpop.f32.mrf.mxu3 }
 0x17e   : > { %v908_v37 = vadd.f32 %v907_v36, %v818_v34  ;;  %v780_v38 = vpop.f32.mrf.mxu0 }
 0x17f   : > { %v869_v40 = vpop.f32.mrf.mxu1 }
 0x180   : > { %v942_v41 = vadd.f32 %v908_v37, %v412_v35  ;;  %v870_v42 = vadd.f32 %v869_v40, %v780_v38 }
 0x182   : > { %974 = vst [vmem:[#allocation2 + $0x20] sm:$0xff] %v942_v41  ;;  %v927_v43 = vadd.f32 %v870_v42, %v397_v39 }
 0x184   : > { %959 = vst [vmem:[#allocation2 + $0x78] sm:$0xff] %v927_v43  ;;  %v820_v44 = vpop.f32.mrf.mxu2 }
 0x185   : > { %v909_v46 = vpop.f32.mrf.mxu3 }
 0x186   : > { %v910_v47 = vadd.f32 %v909_v46, %v820_v44  ;;  %979 = sbr.rel (%p1949_p13) target bundleno = 537 (0x219), region = 74 }
 0x188   : > { %v943_v48 = vadd.f32 %v910_v47, %v413_v45 }
 0x18a   : > { %975 = vst [vmem:[#allocation2 + $0x98] sm:$0xff] %v943_v48 }
 0x18b   : > { %v980_v49 = vld [vmem:[#allocation2 + $0xb0] sm:$0xff]  ;;  %v981_v50 = vld [vmem:[#allocation2] sm:$0xff]  ;;  %v982_v51 = vld [vmem:[#allocation2 + $0xd8] sm:$0xff] }
 0x18c   : > { %v1950_v52 = vmul.f32 -1.442695, %v980_v49  ;;  %v1951_v53 = vmul.f32 -1.442695, %v981_v50  ;;  %v1952_v54 = vmul.f32 -1.442695, %v982_v51 }
 0x18d   : > { %v983_v55 = vld [vmem:[#allocation2 + $0x18] sm:$0xff]  ;;  %v984_v56 = vld [vmem:[#allocation2 + $0x50] sm:$0xff]  ;;  %v985_v57 = vld [vmem:[#allocation2 + $0x68] sm:$0xff] }
 0x18e   : > { %2106 = vpow2.f32 %v1950_v52  ;;  %v1953_v58 = vmul.f32 -1.442695, %v983_v55  ;;  %v1954_v59 = vmul.f32 -1.442695, %v984_v56  ;;  %v1955_v60 = vmul.f32 -1.442695, %v985_v57 }
 0x18f   : > { %2108 = vpow2.f32 %v1951_v53  ;;  %v986_v61 = vld [vmem:[#allocation2 + $0x30] sm:$0xff]  ;;  %v987_v62 = vld [vmem:[#allocation2 + $0x48] sm:$0xff]  ;;  %v988_v1 = vld [vmem:[#allocation2 + $0x80] sm:$0xff] }
 0x190   : > { %2110 = vpow2.f32 %v1952_v54  ;;  %v1956_v63 = vmul.f32 -1.442695, %v986_v61  ;;  %v1957_v0 = vmul.f32 -1.442695, %v987_v62  ;;  %v989_v5 = vld [vmem:[#allocation2 + $0x88] sm:$0xff]  ;;  %v991_v12 = vld [vmem:[#allocation2 + $0xb8] sm:$0xff] }
 0x191   : > { %2112 = vpow2.f32 %v1953_v58  ;;  %v990_v6 = vld [vmem:[#allocation2 + $0xe8] sm:$0xff]  ;;  %v1958_v9 = vmul.f32 -1.442695, %v988_v1  ;;  %v2541_v15 = vmul.f32 -1.442695, %v989_v5  ;;  %v996_v56 = vld [vmem:[#allocation2 + $0x38] sm:$0xff] }
 0x192   : > { %2114 = vpow2.f32 %v1954_v59  ;;  %v2543_v16 = vmul.f32 -1.442695, %v990_v6  ;;  %v2554_v23 = vmul.f32 -1.442695, %v991_v12 }
 0x193   : > { %2116 = vpow2.f32 %v1955_v60 }
 0x194   : > { %v2107_v2 = vpop.eup %2106  ;;  %2118 = vpow2.f32 %v1956_v63 }
 0x195   : > { %v2109_v3 = vpop.eup %2108  ;;  %v2533_v4 = vadd.f32 1.0, %v2107_v2  ;;  %2120 = vpow2.f32 %v1957_v0 }
 0x196   : > { %v2111_v7 = vpop.eup %2110  ;;  %v2535_v8 = vadd.f32 1.0, %v2109_v3 }
 0x197   : > { %v2113_v10 = vpop.eup %2112  ;;  %2122 = vrcp.f32 %v2533_v4  ;;  %v1151_v11 = vand.u32 2147483648, %v2533_v4  ;;  %v1149_v14 = vand.u32 2147483647, %v2533_v4  ;;  %v2547_v20 = vadd.f32 1.0, %v2111_v7 }
 0x198   : > { %v2115_v13 = vpop.eup %2114  ;;  %2124 = vrcp.f32 %v2535_v8  ;;  %v1164_v18 = vand.u32 2147483647, %v2535_v8  ;;  %v1166_v19 = vand.u32 2147483648, %v2535_v8  ;;  %v2549_v21 = vadd.f32 1.0, %v2113_v10  ;;  %v999_v10 = vld [vmem:[#allocation2 + $0xc8] sm:$0xff] }
 0x199   : > { %v2117_v17 = vpop.eup %2116  ;;  %vm1145_vm0 = vweird.f32 %v2533_v4  ;;  %v2552_v22 = vadd.f32 1.0, %v2115_v13  ;;  %2126 = vpow2.f32 %v1958_v9  ;;  %v1152_v25 = vor.u32 1.1754944e-38, %v1151_v11 }
 0x19a   : > { %v2119_v24 = vpop.eup %2118  ;;  %vm1160_vm1 = vweird.f32 %v2535_v8  ;;  %2128 = vrcp.f32 %v2547_v20  ;;  %v1181_v26 = vand.u32 2147483648, %v2547_v20  ;;  %vm2559_vm2 = vcmp.eq.f32.partialorder %v1149_v14, 8.507059e+37 }
 0x19b   : > { %v2121_v27 = vpop.eup %2120  ;;  %v1179_v29 = vand.u32 2147483647, %v2547_v20  ;;  %2130 = vrcp.f32 %v2549_v21  ;;  %v1196_v30 = vand.u32 2147483648, %v2549_v21  ;;  %v2566_v31 = vadd.f32 1.0, %v2117_v17 }
 0x19c   : > { %vm2568_vm3 = vcmp.eq.f32.partialorder %v1164_v18, 8.507059e+37  ;;  %v1167_v34 = vor.u32 1.1754944e-38, %v1166_v19  ;;  %v1194_v35 = vand.u32 2147483647, %v2549_v21  ;;  %2132 = vrcp.f32 %v2552_v22 }
 0x19d   : > { %v2123_v32 = vpop.eup %2122  ;;  %vm1175_vm4 = vweird.f32 %v2547_v20  ;;  %v2576_v38 = vor.u32 1.1754944e-38, %v1181_v26  ;;  %vm1190_vm5 = vweird.f32 %v2549_v21  ;;  %vm1205_vm6 = vweird.f32 %v2552_v22 }
 0x19e   : > { %v2125_v36 = vpop.eup %2124  ;;  %v1141_v37 = vmul.f32 %v2123_v32, %v2533_v4  ;;  %v1209_v40 = vand.u32 2147483647, %v2552_v22  ;;  %v1211_v41 = vand.u32 2147483648, %v2552_v22  ;;  %vm1146_vm7 = vweird.f32 %v2123_v32 }
 0x19f   : > { %v1156_v39 = vmul.f32 %v2125_v36, %v2535_v8  ;;  %v2127_v42 = vpop.eup %2126  ;;  %vm2583_vm8 = vcmp.eq.f32.partialorder %v1179_v29, 8.507059e+37  ;;  %v1197_v45 = vor.u32 1.1754944e-38, %v1196_v30  ;;  %2134 = vrcp.f32 %v2566_v31  ;;  %vm2602_vm13 = vmor %vm1145_vm0, %vm1146_vm7  ;;  %v993_v30 = vld [vmem:[#allocation2 + $0xf0] sm:$0xff] }
 0x1a0   : > { %v1142_v43 = vsub.f32 1.0, %v1141_v37  ;;  %v2129_v46 = vpop.eup %2128  ;;  %vm1161_vm9 = vweird.f32 %v2125_v36  ;;  %vm2588_vm10 = vcmp.eq.f32.partialorder %v1194_v35, 8.507059e+37  ;;  %v1224_v49 = vand.u32 2147483647, %v2566_v31 }
 0x1a1   : > { %v1157_v47 = vsub.f32 1.0, %v1156_v39  ;;  %v2131_v50 = vpop.eup %2130  ;;  %v1171_v52 = vmul.f32 %v2129_v46, %v2547_v20  ;;  %vm2595_vm12 = vcmp.eq.f32.partialorder %v1209_v40, 8.507059e+37  ;;  %v1212_v54 = vor.u32 1.1754944e-38, %v1211_v41  ;;  %vm2611_vm15 = vmor %vm1160_vm1, %vm1161_vm9 }
 0x1a2   : > { %v1143_v51 = vmul.f32 %v2123_v32, %v1142_v43  ;;  %v2133_v55 = vpop.eup %2132  ;;  %vm1176_vm14 = vweird.f32 %v2129_v46  ;;  %v1186_v58 = vmul.f32 %v2131_v50, %v2549_v21  ;;  %v1226_v59 = vand.u32 2147483648, %v2566_v31  ;;  %v992_v21 = vld [vmem:[#allocation2 + $0x60] sm:$0xff] }
 0x1a3   : > { %v1158_v57 = vmul.f32 %v2125_v36, %v1157_v47  ;;  %v1172_v62 = vsub.f32 1.0, %v1171_v52  ;;  %vm1191_vm11 = vweird.f32 %v2131_v50  ;;  %v1201_v63 = vmul.f32 %v2133_v55, %v2552_v22  ;;  %vm2629_vm1 = vmor %vm1175_vm4, %vm1176_vm14  ;;  %v994_v47 = vld [vmem:[#allocation2 + $0x8] sm:$0xff] }
 0x1a4   : > { %v1144_v60 = vadd.f32 %v2123_v32, %v1143_v51  ;;  %v1187_v1 = vsub.f32 1.0, %v1186_v58  ;;  %vm1206_vm0 = vweird.f32 %v2133_v55  ;;  %v2616_v2 = vadd.f32 1.0, %v2119_v24  ;;  %v995_v51 = vld [vmem:[#allocation2 + $0x78] sm:$0xff] }
 0x1a5   : > { %v1159_v0 = vadd.f32 %v2125_v36, %v1158_v57  ;;  %v2135_v3 = vpop.eup %2134  ;;  %v1173_v5 = vmul.f32 %v2129_v46, %v1172_v62  ;;  %v1202_v6 = vsub.f32 1.0, %v1201_v63  ;;  %v2620_v7 = vadd.f32 1.0, %v2121_v27  ;;  %vm2650_vm4 = vmor %vm1205_vm6, %vm1206_vm0  ;;  %v997_v63 = vld [vmem:[#allocation2 + $0x58] sm:$0xff] }
 0x1a6   : > { %v1148_v4 = vsel %vm2602_vm13, %v2123_v32, %v1144_v60  ;;  %v1188_v11 = vmul.f32 %v2131_v50, %v1187_v1  ;;  %v1216_v12 = vmul.f32 %v2135_v3, %v2566_v31  ;;  %v2644_v19 = vadd.f32 1.0, %v2127_v42 }
 0x1a7   : > { %v1153_v8 = vsel %vm2559_vm2, %v1152_v25, %v1148_v4  ;;  %v1163_v9 = vsel %vm2611_vm15, %v2125_v36, %v1159_v0  ;;  %v1174_v14 = vadd.f32 %v2129_v46, %v1173_v5  ;;  %vm2640_vm2 = vmor %vm1190_vm5, %vm1191_vm11  ;;  %v1203_v18 = vmul.f32 %v2133_v55, %v1202_v6  ;;  %v998_v5 = vld [vmem:[#allocation2 + $0x40] sm:$0xff] }
 0x1a8   : > { %1620 = vst [vmem:[%s2447_s26] sm:$0xff] %v1153_v8  ;;  %v1168_v13 = vsel %vm2568_vm3, %v1167_v34, %v1163_v9  ;;  %v1189_v20 = vadd.f32 %v2131_v50, %v1188_v11  ;;  %v1217_v25 = vsub.f32 1.0, %v1216_v12  ;;  %vm1221_vm3 = vweird.f32 %v2135_v3 }
 0x1a9   : > { %1621 = vst [vmem:[%s2447_s26 + $0x8] sm:$0xff] %v1168_v13  ;;  %2136 = vrcp.f32 %v2616_v2  ;;  %v1178_v26 = vsel %vm2629_vm1, %v2129_v46, %v1174_v14  ;;  %v1204_v27 = vadd.f32 %v2133_v55, %v1203_v18  ;;  %v1239_v28 = vand.u32 2147483647, %v2616_v2 }
 0x1aa   : > { %v1241_v29 = vand.u32 2147483648, %v2616_v2  ;;  %v1183_v22 = vsel %vm2583_vm8, %v2576_v38, %v1178_v26  ;;  %v1193_v32 = vsel %vm2640_vm2, %v2131_v50, %v1189_v20  ;;  %v1218_v33 = vmul.f32 %v2135_v3, %v1217_v25  ;;  %v1000_v26 = vld [vmem:[#allocation2 + $0xe0] sm:$0xff] }
 0x1ab   : > { %2138 = vrcp.f32 %v2620_v7  ;;  %1622 = vst [vmem:[%s2447_s26 + $0x10] sm:$0xff] %v1183_v22  ;;  %v1198_v34 = vsel %vm2588_vm10, %v1197_v45, %v1193_v32  ;;  %v1208_v35 = vsel %vm2650_vm4, %v2133_v55, %v1204_v27  ;;  %vm3281_vm5 = vweird.f32 %v2566_v31  ;;  %v1001_v27 = vld [vmem:[#allocation2 + $0x90] sm:$0xff] }
 0x1ac   : > { %vm2673_vm6 = vmor %vm3281_vm5, %vm1221_vm3  ;;  %v1227_v37 = vor.u32 1.1754944e-38, %v1226_v59  ;;  %v1962_v38 = vmul.f32 -1.442695, %v992_v21  ;;  %1623 = vst [vmem:[%s2447_s26 + $0x18] sm:$0xff] %v1198_v34  ;;  %v1213_v39 = vsel %vm2595_vm12, %v1212_v54, %v1208_v35  ;;  %v1219_v40 = vadd.f32 %v2135_v3, %v1218_v33 }
 0x1ad   : > { %vm1225_vm7 = vcmp.eq.f32.partialorder %v1224_v49, 8.507059e+37  ;;  %v1963_v41 = vmul.f32 -1.442695, %v993_v30  ;;  %1624 = vst [vmem:[%s2447_s26 + $0x20] sm:$0xff] %v1213_v39  ;;  %vm1235_vm8 = vweird.f32 %v2616_v2  ;;  %vm2682_vm9 = vcmp.eq.f32.partialorder %v1239_v28, 8.507059e+37 }
 0x1ae   : > { %v1242_v31 = vor.u32 1.1754944e-38, %v1241_v29  ;;  %2140 = vrcp.f32 %v2644_v19  ;;  %v1223_v44 = vsel %vm2673_vm6, %v2135_v3, %v1219_v40  ;;  %v1254_v45 = vand.u32 2147483647, %v2620_v7 }
 0x1af   : > { %v2137_v43 = vpop.eup %2136  ;;  %v1256_v46 = vand.u32 2147483648, %v2620_v7  ;;  %2142 = vpow2.f32 %v2541_v15  ;;  %v1228_v48 = vsel %vm1225_vm7, %v1227_v37, %v1223_v44  ;;  %vm1250_vm10 = vweird.f32 %v2620_v7 }
 0x1b0   : > { %v1231_v49 = vmul.f32 %v2137_v43, %v2616_v2  ;;  %v1269_v50 = vand.u32 2147483647, %v2644_v19  ;;  %1625 = vst [vmem:[%s2447_s26 + $0x28] sm:$0xff] %v1228_v48  ;;  %vm1236_vm11 = vweird.f32 %v2137_v43  ;;  %vm1265_vm12 = vweird.f32 %v2644_v19 }
 0x1b1   : > { %v2139_v52 = vpop.eup %2138  ;;  %v1271_v53 = vand.u32 2147483648, %v2644_v19  ;;  %2144 = vpow2.f32 %v2543_v16  ;;  %v1964_v55 = vmul.f32 -1.442695, %v994_v47  ;;  %vm2701_vm13 = vcmp.eq.f32.partialorder %v1254_v45, 8.507059e+37  ;;  %vm2712_vm0 = vmor %vm1235_vm8, %vm1236_vm11 }
 0x1b2   : > { %v1232_v54 = vsub.f32 1.0, %v1231_v49  ;;  %v1246_v15 = vmul.f32 %v2139_v52, %v2620_v7  ;;  %2146 = vpow2.f32 %v2554_v23  ;;  %v1257_v58 = vor.u32 1.1754944e-38, %v1256_v46 }
 0x1b3   : > { %2148 = vpow2.f32 %v1962_v38  ;;  %v1965_v59 = vmul.f32 -1.442695, %v995_v51  ;;  %vm1251_vm14 = vweird.f32 %v2139_v52  ;;  %vm2705_vm15 = vcmp.eq.f32.partialorder %v1269_v50, 8.507059e+37 }
 0x1b4   : > { %v2141_v60 = vpop.eup %2140  ;;  %v1233_v61 = vmul.f32 %v2137_v43, %v1232_v54  ;;  %v1247_v62 = vsub.f32 1.0, %v1246_v15  ;;  %v1272_v3 = vor.u32 1.1754944e-38, %v1271_v53  ;;  %2150 = vpow2.f32 %v1963_v41  ;;  %vm2722_vm1 = vmor %vm1250_vm10, %vm1251_vm14 }
 0x1b5   : > { %v2143_v0 = vpop.eup %2142  ;;  %v1261_v1 = vmul.f32 %v2141_v60, %v2644_v19  ;;  %v1966_v4 = vmul.f32 -1.442695, %v996_v56  ;;  %2152 = vpow2.f32 %v1964_v55  ;;  %vm1266_vm2 = vweird.f32 %v2141_v60 }
 0x1b6   : > { %v1234_v6 = vadd.f32 %v2137_v43, %v1233_v61  ;;  %v1248_v8 = vmul.f32 %v2139_v52, %v1247_v62  ;;  %v2717_v9 = vadd.f32 1.0, %v2143_v0  ;;  %2154 = vpow2.f32 %v1965_v59  ;;  %vm2743_vm4 = vmor %vm1265_vm12, %vm1266_vm2 }
 0x1b7   : > { %v2145_v11 = vpop.eup %2144  ;;  %v1262_v12 = vsub.f32 1.0, %v1261_v1  ;;  %v2726_v13 = vmul.f32 -1.442695, %v997_v63  ;;  %v2731_v20 = vmul.f32 -1.442695, %v998_v5 }
 0x1b8   : > { %v2147_v14 = vpop.eup %2146  ;;  %v1238_v17 = vsel %vm2712_vm0, %v2137_v43, %v1234_v6  ;;  %v1249_v18 = vadd.f32 %v2139_v52, %v1248_v8  ;;  %2156 = vrcp.f32 %v2717_v9  ;;  %v2735_v21 = vmul.f32 -1.442695, %v999_v10 }
 0x1b9   : > { %v2149_v7 = vpop.eup %2148  ;;  %v1243_v24 = vsel %vm2682_vm9, %v1242_v31, %v1238_v17  ;;  %v1263_v25 = vmul.f32 %v2141_v60, %v1262_v12  ;;  %2158 = vpow2.f32 %v1966_v4  ;;  %v1284_v30 = vand.u32 2147483647, %v2717_v9 }
 0x1ba   : > { %1626 = vst [vmem:[%s2447_s26 + $0x30] sm:$0xff] %v1243_v24  ;;  %v1253_v28 = vsel %vm2722_vm1, %v2139_v52, %v1249_v18  ;;  %v2748_v22 = vadd.f32 1.0, %v2145_v11  ;;  %v2750_v32 = vadd.f32 1.0, %v2147_v14  ;;  %v2151_v33 = vpop.eup %2150  ;;  %v1286_v36 = vand.u32 2147483648, %v2717_v9 }
 0x1bb   : > { %v1258_v34 = vsel %vm2701_vm13, %v1257_v58, %v1253_v28  ;;  %v1264_v35 = vadd.f32 %v2141_v60, %v1263_v25  ;;  %v2755_v37 = vadd.f32 1.0, %v2149_v7  ;;  %v2153_v19 = vpop.eup %2152  ;;  %v2759_v38 = vmul.f32 -1.442695, %v1000_v26 }
 0x1bc   : > { %1627 = vst [vmem:[%s2447_s26 + $0x38] sm:$0xff] %v1258_v34  ;;  %2160 = vrcp.f32 %v2748_v22  ;;  %v2761_v39 = vmul.f32 -1.442695, %v1001_v27  ;;  %v2155_v40 = vpop.eup %2154  ;;  %vm1280_vm3 = vweird.f32 %v2717_v9  ;;  %v1299_v42 = vand.u32 2147483647, %v2748_v22 }
 0x1bd   : > { %v1268_v41 = vsel %vm2743_vm4, %v2141_v60, %v1264_v35  ;;  %2162 = vrcp.f32 %v2750_v32  ;;  %v1301_v44 = vand.u32 2147483648, %v2748_v22  ;;  %v1314_v45 = vand.u32 2147483647, %v2750_v32 }
 0x1be   : > { %v2157_v31 = vpop.eup %2156  ;;  %v1273_v43 = vsel %vm2705_vm15, %v1272_v3, %v1268_v41  ;;  %v1316_v46 = vand.u32 2147483648, %v2750_v32  ;;  %vm2775_vm5 = vcmp.eq.f32.partialorder %v1284_v30, 8.507059e+37  ;;  %v1287_v50 = vor.u32 1.1754944e-38, %v1286_v36 }
 0x1bf   : > { %v2159_v47 = vpop.eup %2158  ;;  %1628 = vst [vmem:[%s2447_s26 + $0x40] sm:$0xff] %v1273_v43  ;;  %v1276_v48 = vmul.f32 %v2157_v31, %v2717_v9  ;;  %2164 = vrcp.f32 %v2755_v37  ;;  %vm1295_vm6 = vweird.f32 %v2748_v22  ;;  %vm1310_vm7 = vweird.f32 %v2750_v32 }
 0x1c0   : > { %v1329_v51 = vand.u32 2147483647, %v2755_v37  ;;  %v1331_v52 = vand.u32 2147483648, %v2755_v37  ;;  %vm1281_vm8 = vweird.f32 %v2157_v31  ;;  %v2784_v54 = vadd.f32 1.0, %v2151_v33 }
 0x1c1   : > { %v1277_v53 = vsub.f32 1.0, %v1276_v48  ;;  %v2786_v15 = vadd.f32 1.0, %v2153_v19  ;;  %vm2788_vm9 = vcmp.eq.f32.partialorder %v1299_v42, 8.507059e+37  ;;  %v1302_v57 = vor.u32 1.1754944e-38, %v1301_v44  ;;  %vm2801_vm12 = vmor %vm1280_vm3, %vm1281_vm8 }
 0x1c2   : > { %v2161_v55 = vpop.eup %2160  ;;  %vm2792_vm10 = vcmp.eq.f32.partialorder %v1314_v45, 8.507059e+37  ;;  %v1317_v59 = vor.u32 1.1754944e-38, %v1316_v46  ;;  %vm1325_vm11 = vweird.f32 %v2755_v37  ;;  %2166 = vrcp.f32 %v2784_v54 }
 0x1c3   : > { %v2163_v60 = vpop.eup %2162  ;;  %v1278_v61 = vmul.f32 %v2157_v31, %v1277_v53  ;;  %v1291_v62 = vmul.f32 %v2161_v55, %v2748_v22  ;;  %vm2806_vm13 = vcmp.eq.f32.partialorder %v1329_v51, 8.507059e+37  ;;  %v1332_v23 = vor.u32 1.1754944e-38, %v1331_v52 }
 0x1c4   : > { %v1306_v63 = vmul.f32 %v2163_v60, %v2750_v32  ;;  %v2810_v1 = vadd.f32 1.0, %v2155_v40  ;;  %vm1296_vm14 = vweird.f32 %v2161_v55  ;;  %2168 = vrcp.f32 %v2786_v15 }
 0x1c5   : > { %v2165_v3 = vpop.eup %2164  ;;  %v1279_v4 = vadd.f32 %v2157_v31, %v1278_v61  ;;  %v1292_v5 = vsub.f32 1.0, %v1291_v62  ;;  %vm1311_vm15 = vweird.f32 %v2163_v60  ;;  %v1344_v9 = vand.u32 2147483647, %v2784_v54  ;;  %vm2823_vm0 = vmor %vm1295_vm6, %vm1296_vm14  ;;  %v1002_v61 = vld [vmem:[#allocation2 + $0x70] sm:$0xff] }
 0x1c6   : > { %v1307_v6 = vsub.f32 1.0, %v1306_v63  ;;  %v1321_v8 = vmul.f32 %v2165_v3, %v2755_v37  ;;  %v1346_v2 = vand.u32 2147483648, %v2784_v54  ;;  %2170 = vpow2.f32 %v2726_v13  ;;  %vm2831_vm2 = vmor %vm1310_vm7, %vm1311_vm15 }
 0x1c7   : > { %v1283_v10 = vsel %vm2801_vm12, %v2157_v31, %v1279_v4  ;;  %v1293_v11 = vmul.f32 %v2161_v55, %v1292_v5  ;;  %vm1326_vm1 = vweird.f32 %v2165_v3  ;;  %vm1340_vm4 = vweird.f32 %v2784_v54 }
 0x1c8   : > { %v1288_v12 = vsel %vm2775_vm5, %v1287_v50, %v1283_v10  ;;  %v1308_v17 = vmul.f32 %v2163_v60, %v1307_v6  ;;  %v1322_v18 = vsub.f32 1.0, %v1321_v8  ;;  %v2167_v7 = vpop.eup %2166  ;;  %2172 = vrcp.f32 %v2810_v1  ;;  %vm2848_vm5 = vmor %vm1325_vm11, %vm1326_vm1  ;;  %v1003_v8 = vld [vmem:[#allocation2 + $0xc0] sm:$0xff] }
 0x1c9   : > { %1629 = vst [vmem:[%s2447_s26 + $0x48] sm:$0xff] %v1288_v12  ;;  %v1294_v24 = vadd.f32 %v2161_v55, %v1293_v11  ;;  %v2837_v25 = vadd.f32 1.0, %v2159_v47  ;;  %v1336_v28 = vmul.f32 %v2167_v7, %v2784_v54  ;;  %vm2840_vm3 = vcmp.eq.f32.partialorder %v1344_v9, 8.507059e+37  ;;  %v1004_v9 = vld [vmem:[#allocation2 + $0xa8] sm:$0xff] }
 0x1ca   : > { %v1309_v26 = vadd.f32 %v2163_v60, %v1308_v17  ;;  %v1323_v27 = vmul.f32 %v2165_v3, %v1322_v18  ;;  %v2169_v30 = vpop.eup %2168  ;;  %vm1341_vm6 = vweird.f32 %v2167_v7  ;;  %v1347_v33 = vor.u32 1.1754944e-38, %v1346_v2 }
 0x1cb   : > { %v1298_v22 = vsel %vm2823_vm0, %v2161_v55, %v1294_v24  ;;  %vm1355_vm7 = vweird.f32 %v2786_v15  ;;  %v1337_v19 = vsub.f32 1.0, %v1336_v28  ;;  %v1351_v41 = vmul.f32 %v2169_v30, %v2786_v15  ;;  %v1005_v24 = vld [vmem:[#allocation2 + $0xd0] sm:$0xff] }
 0x1cc   : > { %v1303_v34 = vsel %vm2788_vm9, %v1302_v57, %v1298_v22  ;;  %v1313_v35 = vsel %vm2831_vm2, %v2163_v60, %v1309_v26  ;;  %v1324_v36 = vadd.f32 %v2165_v3, %v1323_v27  ;;  %v2171_v40 = vpop.eup %2170  ;;  %v1359_v42 = vand.u32 2147483647, %v2786_v15  ;;  %vm2873_vm9 = vmor %vm1340_vm4, %vm1341_vm6 }
 0x1cd   : > { %1630 = vst [vmem:[%s2447_s26 + $0x50] sm:$0xff] %v1303_v34  ;;  %v1318_v37 = vsel %vm2792_vm10, %v1317_v59, %v1313_v35  ;;  %v1361_v31 = vand.u32 2147483648, %v2786_v15  ;;  %v1338_v44 = vmul.f32 %v2167_v7, %v1337_v19  ;;  %vm1370_vm8 = vweird.f32 %v2810_v1  ;;  %v1007_v19 = vld [vmem:[#allocation2 + $0x28] sm:$0xff] }
 0x1ce   : > { %1631 = vst [vmem:[%s2447_s26 + $0x58] sm:$0xff] %v1318_v37  ;;  %v1328_v43 = vsel %vm2848_vm5, %v2165_v3, %v1324_v36  ;;  %2174 = vrcp.f32 %v2837_v25  ;;  %v2173_v45 = vpop.eup %2172  ;;  %v1352_v48 = vsub.f32 1.0, %v1351_v41  ;;  %vm1356_vm10 = vweird.f32 %v2169_v30 }
 0x1cf   : > { %v1333_v46 = vsel %vm2806_vm13, %v1332_v23, %v1328_v43  ;;  %v1374_v49 = vand.u32 2147483647, %v2810_v1  ;;  %v1339_v50 = vadd.f32 %v2167_v7, %v1338_v44  ;;  %v1366_v51 = vmul.f32 %v2173_v45, %v2810_v1  ;;  %vm2892_vm12 = vmor %vm1355_vm7, %vm1356_vm10 }
 0x1d0   : > { %1632 = vst [vmem:[%s2447_s26 + $0x60] sm:$0xff] %v1333_v46  ;;  %v1376_v52 = vand.u32 2147483648, %v2810_v1  ;;  %v1389_v53 = vand.u32 2147483647, %v2837_v25  ;;  %v1353_v55 = vmul.f32 %v2169_v30, %v1352_v48  ;;  %vm2882_vm11 = vcmp.eq.f32.partialorder %v1359_v42, 8.507059e+37 }
 0x1d1   : > { %v1362_v56 = vor.u32 1.1754944e-38, %v1361_v31  ;;  %v2886_v57 = vadd.f32 1.0, %v2171_v40  ;;  %v1343_v58 = vsel %vm2873_vm9, %v2167_v7, %v1339_v50  ;;  %v1367_v60 = vsub.f32 1.0, %v1366_v51  ;;  %v1008_v31 = vld [vmem:[#allocation2 + $0xa0] sm:$0xff] }
 0x1d2   : > { %vm1371_vm13 = vweird.f32 %v2173_v45  ;;  %2176 = vpow2.f32 %v2731_v20  ;;  %v1348_v62 = vsel %vm2840_vm3, %v1347_v33, %v1343_v58  ;;  %v1354_v16 = vadd.f32 %v2169_v30, %v1353_v55 }
 0x1d3   : > { %vm2899_vm14 = vcmp.eq.f32.partialorder %v1374_v49, 8.507059e+37  ;;  %2178 = vrcp.f32 %v2886_v57  ;;  %1633 = vst [vmem:[%s2447_s26 + $0x68] sm:$0xff] %v1348_v62  ;;  %v1368_v0 = vmul.f32 %v2173_v45, %v1367_v60  ;;  %v1377_v23 = vor.u32 1.1754944e-38, %v1376_v52  ;;  %vm2914_vm1 = vmor %vm1370_vm8, %vm1371_vm13 }
 0x1d4   : > { %v2175_v15 = vpop.eup %2174  ;;  %vm1385_vm15 = vweird.f32 %v2837_v25  ;;  %vm2906_vm0 = vcmp.eq.f32.partialorder %v1389_v53, 8.507059e+37  ;;  %v1358_v3 = vsel %vm2892_vm12, %v2169_v30, %v1354_v16  ;;  %2180 = vpow2.f32 %v2735_v21 }
 0x1d5   : > { %v1381_v5 = vmul.f32 %v2175_v15, %v2837_v25  ;;  %v1972_v6 = vmul.f32 -1.442695, %v1002_v61  ;;  %v1363_v10 = vsel %vm2882_vm11, %v1362_v56, %v1358_v3  ;;  %v1369_v11 = vadd.f32 %v2173_v45, %v1368_v0 }
 0x1d6   : > { %v1391_v2 = vand.u32 2147483648, %v2837_v25  ;;  %v1404_v12 = vand.u32 2147483647, %v2886_v57  ;;  %1634 = vst [vmem:[%s2447_s26 + $0x70] sm:$0xff] %v1363_v10  ;;  %vm1386_vm2 = vweird.f32 %v2175_v15  ;;  %v1406_v14 = vand.u32 2147483648, %v2886_v57  ;;  %v1006_v25 = vld [vmem:[#allocation2 + $0x10] sm:$0xff] }
 0x1d7   : > { %v1382_v1 = vsub.f32 1.0, %v1381_v5  ;;  %2182 = vpow2.f32 %v2759_v38  ;;  %v1373_v17 = vsel %vm2914_vm1, %v2173_v45, %v1369_v11  ;;  %v1973_v18 = vmul.f32 -1.442695, %v1003_v8  ;;  %vm2938_vm4 = vmor %vm1385_vm15, %vm1386_vm2 }
 0x1d8   : > { %v2177_v21 = vpop.eup %2176  ;;  %2184 = vpow2.f32 %v2761_v39  ;;  %v1974_v7 = vmul.f32 -1.442695, %v1004_v9  ;;  %v1378_v26 = vsel %vm2899_vm14, %v1377_v23, %v1373_v17  ;;  %v1392_v39 = vor.u32 1.1754944e-38, %v1391_v2 }
 0x1d9   : > { %v2179_v13 = vpop.eup %2178  ;;  %v1383_v27 = vmul.f32 %v2175_v15, %v1382_v1  ;;  %v2932_v28 = vadd.f32 1.0, %v2177_v21  ;;  %2186 = vpow2.f32 %v1972_v6  ;;  %1635 = vst [vmem:[%s2447_s26 + $0x78] sm:$0xff] %v1378_v26  ;;  %vm1400_vm3 = vweird.f32 %v2886_v57 }
 0x1da   : > { %v1396_v29 = vmul.f32 %v2179_v13, %v2886_v57  ;;  %vm2944_vm5 = vcmp.eq.f32.partialorder %v1404_v12, 8.507059e+37  ;;  %v2181_v22 = vpop.eup %2180  ;;  %vm1401_vm6 = vweird.f32 %v2179_v13  ;;  %v1975_v33 = vmul.f32 -1.442695, %v1005_v24 }
 0x1db   : > { %v1384_v32 = vadd.f32 %v2175_v15, %v1383_v27  ;;  %2188 = vrcp.f32 %v2932_v28  ;;  %v1419_v35 = vand.u32 2147483647, %v2932_v28  ;;  %v2950_v36 = vadd.f32 1.0, %v2181_v22  ;;  %vm2962_vm7 = vmor %vm1400_vm3, %vm1401_vm6 }
 0x1dc   : > { %v1397_v34 = vsub.f32 1.0, %v1396_v29  ;;  %2190 = vpow2.f32 %v1973_v18  ;;  %v1407_v41 = vor.u32 1.1754944e-38, %v1406_v14  ;;  %v1421_v42 = vand.u32 2147483648, %v2932_v28 }
 0x1dd   : > { %v2183_v40 = vpop.eup %2182  ;;  %v1388_v37 = vsel %vm2938_vm4, %v2175_v15, %v1384_v32  ;;  %2192 = vpow2.f32 %v1974_v7  ;;  %v1976_v46 = vmul.f32 -1.442695, %v1006_v25  ;;  %vm1415_vm8 = vweird.f32 %v2932_v28 }
 0x1de   : > { %v2185_v43 = vpop.eup %2184  ;;  %v1393_v44 = vsel %vm2906_vm0, %v1392_v39, %v1388_v37  ;;  %v1398_v45 = vmul.f32 %v2179_v13, %v1397_v34  ;;  %2194 = vrcp.f32 %v2950_v36  ;;  %v2967_v49 = vadd.f32 1.0, %v2183_v40 }
 0x1df   : > { %v2187_v47 = vpop.eup %2186  ;;  %1636 = vst [vmem:[%s2447_s26 + $0x80] sm:$0xff] %v1393_v44  ;;  %2196 = vpow2.f32 %v1975_v33  ;;  %v2969_v50 = vmul.f32 -1.442695, %v1007_v19  ;;  %vm2971_vm9 = vcmp.eq.f32.partialorder %v1419_v35, 8.507059e+37  ;;  %v1434_v53 = vand.u32 2147483647, %v2950_v36 }
 0x1e0   : > { %v1399_v51 = vadd.f32 %v2179_v13, %v1398_v45  ;;  %v2976_v55 = vadd.f32 1.0, %v2185_v43  ;;  %v2978_v54 = vmul.f32 -1.442695, %v1008_v31  ;;  %v1422_v57 = vor.u32 1.1754944e-38, %v1421_v42 }
 0x1e1   : > { %v2189_v56 = vpop.eup %2188  ;;  %v1436_v58 = vand.u32 2147483648, %v2950_v36  ;;  %2198 = vrcp.f32 %v2967_v49  ;;  %v2982_v59 = vadd.f32 1.0, %v2187_v47  ;;  %v1449_v16 = vand.u32 2147483647, %v2967_v49 }
 0x1e2   : > { %v2191_v60 = vpop.eup %2190  ;;  %v1403_v61 = vsel %vm2962_vm7, %v2179_v13, %v1399_v51  ;;  %v1411_v62 = vmul.f32 %v2189_v56, %v2932_v28  ;;  %2200 = vpow2.f32 %v1976_v46  ;;  %vm1430_vm10 = vweird.f32 %v2950_v36 }
 0x1e3   : > { %v2193_v63 = vpop.eup %2192  ;;  %v1408_v15 = vsel %vm2944_vm5, %v1407_v41, %v1403_v61  ;;  %v1451_v0 = vand.u32 2147483648, %v2967_v49  ;;  %2202 = vrcp.f32 %v2976_v55  ;;  %vm1416_vm11 = vweird.f32 %v2189_v56 }
 0x1e4   : > { %v2195_v23 = vpop.eup %2194  ;;  %1637 = vst [vmem:[%s2447_s26 + $0x88] sm:$0xff] %v1408_v15  ;;  %v1412_v20 = vsub.f32 1.0, %v1411_v62  ;;  %vm2994_vm12 = vcmp.eq.f32.partialorder %v1434_v53, 8.507059e+37  ;;  %v1464_v4 = vand.u32 2147483647, %v2976_v55  ;;  %v1437_v8 = vor.u32 1.1754944e-38, %v1436_v58  ;;  %vm3012_vm0 = vmor %vm1415_vm8, %vm1416_vm11 }
 0x1e5   : > { %v2999_v5 = vpop.eup %2196  ;;  %v1426_v6 = vmul.f32 %v2195_v23, %v2950_v36  ;;  %vm1445_vm13 = vweird.f32 %v2967_v49  ;;  %2204 = vrcp.f32 %v2982_v59  ;;  %vm3004_vm14 = vcmp.eq.f32.partialorder %v1449_v16, 8.507059e+37 }
 0x1e6   : > { %v1413_v9 = vmul.f32 %v2189_v56, %v1412_v20  ;;  %vm1460_vm15 = vweird.f32 %v2976_v55  ;;  %v1466_v11 = vand.u32 2147483648, %v2976_v55  ;;  %vm1431_vm1 = vweird.f32 %v2195_v23 }
 0x1e7   : > { %v2199_v2 = vpop.eup %2198  ;;  %v1427_v1 = vsub.f32 1.0, %v1426_v6  ;;  %v1452_v14 = vor.u32 1.1754944e-38, %v1451_v0  ;;  %v3016_v21 = vadd.f32 1.0, %v2191_v60  ;;  %vm3019_vm2 = vcmp.eq.f32.partialorder %v1464_v4, 8.507059e+37  ;;  %vm3032_vm3 = vmor %vm1430_vm10, %vm1431_vm1 }
 0x1e8   : > { %v2201_v17 = vpop.eup %2200  ;;  %v1414_v18 = vadd.f32 %v2189_v56, %v1413_v9  ;;  %v1441_v7 = vmul.f32 %v2199_v2, %v2967_v49  ;;  %vm1475_vm4 = vweird.f32 %v2982_v59  ;;  %v1479_v27 = vand.u32 2147483647, %v2982_v59 }
 0x1e9   : > { %v2203_v13 = vpop.eup %2202  ;;  %v1428_v26 = vmul.f32 %v2195_v23, %v1427_v1  ;;  %2206 = vrcp.f32 %v3016_v21  ;;  %v3026_v28 = vadd.f32 1.0, %v2193_v63  ;;  %vm1446_vm5 = vweird.f32 %v2199_v2 }
 0x1ea   : > { %v1418_v38 = vsel %vm3012_vm0, %v2189_v56, %v1414_v18  ;;  %v1442_v29 = vsub.f32 1.0, %v1441_v7  ;;  %v1456_v30 = vmul.f32 %v2203_v13, %v2976_v55  ;;  %vm1461_vm6 = vweird.f32 %v2203_v13  ;;  %vm3047_vm7 = vmor %vm1445_vm13, %vm1446_vm5 }
 0x1eb   : > { %v2205_v22 = vpop.eup %2204  ;;  %v1423_v32 = vsel %vm2971_vm9, %v1422_v57, %v1418_v38  ;;  %v1429_v33 = vadd.f32 %v2195_v23, %v1428_v26  ;;  %v1481_v25 = vand.u32 2147483648, %v2982_v59  ;;  %v1494_v19 = vand.u32 2147483647, %v3016_v21  ;;  %vm3059_vm9 = vmor %vm1460_vm15, %vm1461_vm6 }
 0x1ec   : > { %1638 = vst [vmem:[%s2447_s26 + $0x90] sm:$0xff] %v1423_v32  ;;  %v1443_v34 = vmul.f32 %v2199_v2, %v1442_v29  ;;  %v1457_v35 = vsub.f32 1.0, %v1456_v30  ;;  %v1471_v36 = vmul.f32 %v2205_v22, %v2982_v59  ;;  %vm1476_vm8 = vweird.f32 %v2205_v22  ;;  %v1009_v59 = vld [vmem:[#allocation2 + $0xf8] sm:$0xff] }
 0x1ed   : > { %v1433_v40 = vsel %vm3032_vm3, %v2195_v23, %v1429_v33  ;;  %v1496_v41 = vand.u32 2147483648, %v3016_v21  ;;  %2208 = vrcp.f32 %v3026_v28  ;;  %v1467_v47 = vor.u32 1.1754944e-38, %v1466_v11 }
 0x1ee   : > { %v1438_v42 = vsel %vm2994_vm12, %v1437_v8, %v1433_v40  ;;  %v1444_v31 = vadd.f32 %v2199_v2, %v1443_v34  ;;  %v1458_v43 = vmul.f32 %v2203_v13, %v1457_v35  ;;  %v1472_v44 = vsub.f32 1.0, %v1471_v36  ;;  %vm3076_vm12 = vmor %vm1475_vm4, %vm1476_vm8 }
 0x1ef   : > { %v2207_v45 = vpop.eup %2206  ;;  %1639 = vst [vmem:[%s2447_s26 + $0x98] sm:$0xff] %v1438_v42  ;;  %vm3063_vm10 = vcmp.eq.f32.partialorder %v1479_v27, 8.507059e+37  ;;  %v1482_v49 = vor.u32 1.1754944e-38, %v1481_v25  ;;  %vm1490_vm11 = vweird.f32 %v3016_v21  ;;  %vm3080_vm15 = vcmp.eq.f32.partialorder %v1494_v19, 8.507059e+37 }
 0x1f0   : > { %v1448_v51 = vsel %vm3047_vm7, %v2199_v2, %v1444_v31  ;;  %v1459_v52 = vadd.f32 %v2203_v13, %v1458_v43  ;;  %v1473_v53 = vmul.f32 %v2205_v22, %v1472_v44  ;;  %v1486_v56 = vmul.f32 %v2207_v45, %v3016_v21  ;;  %v1010_v2 = vld [vmem:[#allocation2 + $0x20] sm:$0xff] }
 0x1f1   : > { %v1453_v55 = vsel %vm3004_vm14, %v1452_v14, %v1448_v51  ;;  %vm1491_vm13 = vweird.f32 %v2207_v45  ;;  %v1497_v60 = vor.u32 1.1754944e-38, %v1496_v41  ;;  %v3088_v63 = vadd.f32 1.0, %v2999_v5  ;;  %v1011_v14 = vld [vmem:[#allocation2 + $0x98] sm:$0xff] }
 0x1f2   : > { %1640 = vst [vmem:[%s2447_s26 + $0xa0] sm:$0xff] %v1453_v55  ;;  %v1463_v61 = vsel %vm3059_vm9, %v2203_v13, %v1459_v52  ;;  %v1474_v62 = vadd.f32 %v2205_v22, %v1473_v53  ;;  %v1487_v16 = vsub.f32 1.0, %v1486_v56  ;;  %vm1505_vm14 = vweird.f32 %v3026_v28  ;;  %vm3106_vm0 = vmor %vm1490_vm11, %vm1491_vm13 }
 0x1f3   : > { %v2209_v15 = vpop.eup %2208  ;;  %v1468_v0 = vsel %vm3019_vm2, %v1467_v47, %v1463_v61  ;;  %v3093_v23 = vadd.f32 1.0, %v2201_v17  ;;  %2210 = vpow2.f32 %v2969_v50  ;;  %v1509_v5 = vand.u32 2147483647, %v3026_v28 }
 0x1f4   : > { %1641 = vst [vmem:[%s2447_s26 + $0xa8] sm:$0xff] %v1468_v0  ;;  %v1478_v20 = vsel %vm3076_vm12, %v2205_v22, %v1474_v62  ;;  %v1488_v3 = vmul.f32 %v2207_v45, %v1487_v16  ;;  %v1501_v4 = vmul.f32 %v2209_v15, %v3026_v28  ;;  %v1511_v50 = vand.u32 2147483648, %v3026_v28 }
 0x1f5   : > { %v1483_v6 = vsel %vm3063_vm10, %v1482_v49, %v1478_v20  ;;  %2212 = vrcp.f32 %v3088_v63  ;;  %v1979_v9 = vmul.f32 -1.442695, %v1009_v59  ;;  %vm1506_vm1 = vweird.f32 %v2209_v15 }
 0x1f6   : > { %1642 = vst [vmem:[%s2447_s26 + $0xb0] sm:$0xff] %v1483_v6  ;;  %v1489_v10 = vadd.f32 %v2207_v45, %v1488_v3  ;;  %v1502_v11 = vsub.f32 1.0, %v1501_v4  ;;  %2214 = vrcp.f32 %v3093_v23  ;;  %vm3121_vm2 = vmor %vm1505_vm14, %vm1506_vm1  ;;  %v1512_v7 = vor.u32 1.1754944e-38, %v1511_v50 }
 0x1f7   : > { %2216 = vpow2.f32 %v2978_v54  ;;  %vm1510_vm4 = vcmp.eq.f32.partialorder %v1509_v5, 8.507059e+37  ;;  %v1980_v26 = vmul.f32 -1.442695, %v1010_v2  ;;  %vm1520_vm3 = vweird.f32 %v3088_v63 }
 0x1f8   : > { %v1493_v12 = vsel %vm3106_vm0, %v2207_v45, %v1489_v10  ;;  %v1503_v1 = vmul.f32 %v2209_v15, %v1502_v11  ;;  %2218 = vpow2.f32 %v1979_v9  ;;  %v1524_v27 = vand.u32 2147483647, %v3088_v63 }
 0x1f9   : > { %v2211_v21 = vpop.eup %2210  ;;  %v1498_v17 = vsel %vm3080_vm15, %v1497_v60, %v1493_v12  ;;  %v1981_v38 = vmul.f32 -1.442695, %v1011_v14  ;;  %v1526_v30 = vand.u32 2147483648, %v3088_v63  ;;  %vm1535_vm5 = vweird.f32 %v3093_v23 }
 0x1fa   : > { %1643 = vst [vmem:[%s2447_s26 + $0xb8] sm:$0xff] %v1498_v17  ;;  %v1504_v24 = vadd.f32 %v2209_v15, %v1503_v1  ;;  %v1135_v13 = vadd.f32 1.0, %v2211_v21  ;;  %v1539_v33 = vand.u32 2147483647, %v3093_v23  ;;  %v1541_v35 = vand.u32 2147483648, %v3093_v23 }
 0x1fb   : > { %v2213_v54 = vpop.eup %2212  ;;  %vm3145_vm9 = vcmp.eq.f32.partialorder %v1524_v27, 8.507059e+37  ;;  %v1527_v43 = vor.u32 1.1754944e-38, %v1526_v30 }
 0x1fc   : > { %v2215_v39 = vpop.eup %2214  ;;  %v1508_v28 = vsel %vm3121_vm2, %v2209_v15, %v1504_v24  ;;  %v1516_v29 = vmul.f32 %v2213_v54, %v3088_v63  ;;  %2220 = vrcp.f32 %v1135_v13  ;;  %vm1521_vm6 = vweird.f32 %v2213_v54 }
 0x1fd   : > { %v1513_v22 = vsel %vm1510_vm4, %v1512_v7, %v1508_v28  ;;  %v1531_v32 = vmul.f32 %v2215_v39, %v3093_v23  ;;  %v2217_v25 = vpop.eup %2216  ;;  %2222 = vpow2.f32 %v1980_v26  ;;  %vm1536_vm7 = vweird.f32 %v2215_v39  ;;  %vm3141_vm8 = vmor %vm1520_vm3, %vm1521_vm6 }
 0x1fe   : > { %1644 = vst [vmem:[%s2447_s26 + $0xc0] sm:$0xff] %v1513_v22  ;;  %v1517_v34 = vsub.f32 1.0, %v1516_v29  ;;  %v2219_v36 = vpop.eup %2218  ;;  %v1136_v40 = vadd.f32 1.0, %v2217_v25  ;;  %2224 = vpow2.f32 %v1981_v38  ;;  %vm3151_vm10 = vmor %vm1535_vm5, %vm1536_vm7  ;;  %vm3155_vm11 = vcmp.eq.f32.partialorder %v1539_v33, 8.507059e+37 }
 0x1ff   : > { %v1532_v19 = vsub.f32 1.0, %v1531_v32  ;;  %v3137_v41 = vadd.f32 1.0, %v2219_v36  ;;  %v1542_v49 = vor.u32 1.1754944e-38, %v1541_v35  ;;  %v1554_v53 = vand.u32 2147483647, %v1135_v13 }
 0x200   : > { %v1518_v37 = vmul.f32 %v2213_v54, %v1517_v34  ;;  %2226 = vrcp.f32 %v1136_v40  ;;  %v1556_v56 = vand.u32 2147483648, %v1135_v13  ;;  %vm1550_vm12 = vweird.f32 %v1135_v13 }
 0x201   : > { %v1533_v44 = vmul.f32 %v2215_v39, %v1532_v19  ;;  %2228 = vrcp.f32 %v3137_v41  ;;  %vm3174_vm15 = vcmp.eq.f32.partialorder %v1554_v53, 8.507059e+37  ;;  %v1569_v6 = vand.u32 2147483647, %v1136_v40 }
 0x202   : > { %v2221_v45 = vpop.eup %2220  ;;  %v1519_v46 = vadd.f32 %v2213_v54, %v1518_v37  ;;  %v1557_v20 = vor.u32 1.1754944e-38, %v1556_v56  ;;  %v1571_v8 = vand.u32 2147483648, %v1136_v40  ;;  %v1584_v10 = vand.u32 2147483647, %v3137_v41 }
 0x203   : > { %v1534_v51 = vadd.f32 %v2215_v39, %v1533_v44  ;;  %v1546_v52 = vmul.f32 %v2221_v45, %v1135_v13  ;;  %v2223_v55 = vpop.eup %2222  ;;  %vm1551_vm13 = vweird.f32 %v2221_v45  ;;  %v1586_v11 = vand.u32 2147483648, %v3137_v41 }
 0x204   : > { %v1523_v57 = vsel %vm3141_vm8, %v2213_v54, %v1519_v46  ;;  %v2225_v58 = vpop.eup %2224  ;;  %v3166_v16 = vadd.f32 1.0, %v2223_v55  ;;  %vm3181_vm14 = vmor %vm1550_vm12, %vm1551_vm13  ;;  %vm1565_vm0 = vweird.f32 %v1136_v40  ;;  %vm1580_vm2 = vweird.f32 %v3137_v41 }
 0x205   : > { %v1528_v60 = vsel %vm3145_vm9, %v1527_v43, %v1523_v57  ;;  %v1538_v61 = vsel %vm3151_vm10, %v2215_v39, %v1534_v51  ;;  %v1547_v62 = vsub.f32 1.0, %v1546_v52  ;;  %v3171_v59 = vadd.f32 1.0, %v2225_v58 }
 0x206   : > { %1645 = vst [vmem:[%s2447_s26 + $0xc8] sm:$0xff] %v1528_v60  ;;  %v1543_v63 = vsel %vm3155_vm11, %v1542_v49, %v1538_v61  ;;  %v2227_v15 = vpop.eup %2226  ;;  %2230 = vrcp.f32 %v3166_v16  ;;  %vm3194_vm3 = vcmp.eq.f32.partialorder %v1569_v6, 8.507059e+37  ;;  %v1572_v18 = vor.u32 1.1754944e-38, %v1571_v8 }
 0x207   : > { %1646 = vst [vmem:[%s2447_s26 + $0xd0] sm:$0xff] %v1543_v63  ;;  %v1548_v0 = vmul.f32 %v2221_v45, %v1547_v62  ;;  %v2229_v3 = vpop.eup %2228  ;;  %v1561_v5 = vmul.f32 %v2227_v15, %v1136_v40  ;;  %2232 = vrcp.f32 %v3171_v59  ;;  %vm1566_vm1 = vweird.f32 %v2227_v15 }
 0x208   : > { %v1576_v9 = vmul.f32 %v2229_v3, %v3137_v41  ;;  %vm1581_vm4 = vweird.f32 %v2229_v3  ;;  %vm3199_vm5 = vmor %vm1565_vm0, %vm1566_vm1  ;;  %vm3203_vm6 = vcmp.eq.f32.partialorder %v1584_v10, 8.507059e+37  ;;  %v1587_v54 = vor.u32 1.1754944e-38, %v1586_v11 }
 0x209   : > { %v1549_v50 = vadd.f32 %v2221_v45, %v1548_v0  ;;  %v1562_v2 = vsub.f32 1.0, %v1561_v5  ;;  %vm1595_vm7 = vweird.f32 %v3166_v16  ;;  %vm3210_vm8 = vmor %vm1580_vm2, %vm1581_vm4  ;;  %v1599_v29 = vand.u32 2147483647, %v3166_v16 }
 0x20a   : > { %v1577_v1 = vsub.f32 1.0, %v1576_v9  ;;  %v1601_v30 = vand.u32 2147483648, %v3166_v16  ;;  %vm1610_vm9 = vweird.f32 %v3171_v59  ;;  %v1614_v33 = vand.u32 2147483647, %v3171_v59 }
 0x20b   : > { %v1553_v12 = vsel %vm3181_vm14, %v2221_v45, %v1549_v50  ;;  %v1563_v21 = vmul.f32 %v2227_v15, %v1562_v2  ;;  %v1616_v35 = vand.u32 2147483648, %v3171_v59  ;;  %vm1600_vm13 = vcmp.eq.f32.partialorder %v1599_v29, 8.507059e+37 }
 0x20c   : > { %v1558_v14 = vsel %vm3174_vm15, %v1557_v20, %v1553_v12  ;;  %v2231_v7 = vpop.eup %2230  ;;  %v1578_v13 = vmul.f32 %v2229_v3, %v1577_v1  ;;  %v1602_v42 = vor.u32 1.1754944e-38, %v1601_v30  ;;  %vm1615_vm14 = vcmp.eq.f32.partialorder %v1614_v33, 8.507059e+37 }
 0x20d   : > { %1647 = vst [vmem:[%s2447_s26 + $0xd8] sm:$0xff] %v1558_v14  ;;  %v2233_v27 = vpop.eup %2232  ;;  %v1564_v38 = vadd.f32 %v2227_v15, %v1563_v21  ;;  %v1591_v28 = vmul.f32 %v2231_v7, %v3166_v16  ;;  %vm1596_vm10 = vweird.f32 %v2231_v7  ;;  %v1617_v44 = vor.u32 1.1754944e-38, %v1616_v35 }
 0x20e   : > { %v1579_v22 = vadd.f32 %v2229_v3, %v1578_v13  ;;  %v1606_v32 = vmul.f32 %v2233_v27, %v3171_v59  ;;  %vm1611_vm11 = vweird.f32 %v2233_v27  ;;  %vm1597_vm12 = vmor %vm1595_vm7, %vm1596_vm10 }
 0x20f   : > { %v1568_v25 = vsel %vm3199_vm5, %v2227_v15, %v1564_v38  ;;  %v1592_v34 = vsub.f32 1.0, %v1591_v28  ;;  %vm1612_vm15 = vmor %vm1610_vm9, %vm1611_vm11 }
 0x210   : > { %v1573_v36 = vsel %vm3194_vm3, %v1572_v18, %v1568_v25  ;;  %v1583_v19 = vsel %vm3210_vm8, %v2229_v3, %v1579_v22  ;;  %v1607_v40 = vsub.f32 1.0, %v1606_v32 }
 0x211   : > { %1648 = vst [vmem:[%s2447_s26 + $0xe0] sm:$0xff] %v1573_v36  ;;  %v1588_v37 = vsel %vm3203_vm6, %v1587_v54, %v1583_v19  ;;  %v1593_v41 = vmul.f32 %v2231_v7, %v1592_v34 }
 0x212   : > { %1649 = vst [vmem:[%s2447_s26 + $0xe8] sm:$0xff] %v1588_v37  ;;  %v1608_v31 = vmul.f32 %v2233_v27, %v1607_v40 }
 0x213   : > { %v1594_v43 = vadd.f32 %v2231_v7, %v1593_v41 }
 0x214   : > { %v1609_v45 = vadd.f32 %v2233_v27, %v1608_v31 }
 0x215   : > { %v1598_v46 = vsel %vm1597_vm12, %v2231_v7, %v1594_v43 }
 0x216   : > { %v1603_v47 = vsel %vm1600_vm13, %v1602_v42, %v1598_v46  ;;  %v1613_v48 = vsel %vm1612_vm15, %v2233_v27, %v1609_v45 }
 0x217   : > { %1650 = vst [vmem:[%s2447_s26 + $0xf0] sm:$0xff] %v1603_v47  ;;  %v1618_v49 = vsel %vm1615_vm14, %v1617_v44, %v1613_v48 }
 0x218   : > { %1651 = vst [vmem:[%s2447_s26 + $0xf8] sm:$0xff] %v1618_v49 }
 0x219 PF: > { %s12_s15 = sadd.s32 1, %s2288_s15   ;;  %s3378_s9 = smov %s2268_s10 }
 0x21a   : > { %p9_p0 = scmp.ge.s32.totalorder %s12_s15, 6   ;;  %s3379_s10 = smov %s2357_s22 }
 0x21b   : > { %s3380_s11 = smov %s2280_s13  ;;  %s3381_s12 = smov %s2284_s14 }
 0x21c   : > { %s3382_s13 = smov %s3385_s16  ;;  %s3383_s14 = smov %s3389_s17 }
 0x21d   :  { %11 = sbr.rel (!%p9_p0) target bundleno = 4 (0x4), region = 112 }

// kernel: gcn_forward.2
= control target key start
LH: loop header
LB: loop body
LE: loop exit
PB: predicated region body
PF: predicated region fallthrough
CT: control target
= control target key end

     0   :  { %s2780_s21 = smov 0   ;;  %s2782_s22 = smov 0   ;;  %s3419_s0 = inlined_call_operand.vmem [shape: bf16[512,512], index: 0, kind: input, shape index: {}]   ;;  %s3420_s1 = inlined_call_operand.vmem [shape: bf16[512,32], index: 1, kind: input, shape index: {}]   ;;  %s3421_s2 = inlined_call_operand.vmem [shape: bf16[32,64], index: 2, kind: input, shape index: {}]   ;;  %s3422_s3 = inlined_call_operand.vmem [shape: f32[1,64], index: 3, kind: input, shape index: {}]   ;;  %s3423_s4 = inlined_call_operand.vmem [shape: bf16[64,128], index: 4, kind: input, shape index: {}]   ;;  %s3424_s5 = inlined_call_operand.vmem [shape: f32[1,128], index: 5, kind: input, shape index: {}]   ;;  %s3425_s6 = inlined_call_operand.vmem [shape: bf16[512,128], index: 6, kind: output, shape index: {}]  }
   0x1   :  { %s2784_s23 = smov 0   ;;  %s2786_s24 = smov 0  }
   0x2   :  { %s2788_s25 = smov 0   ;;  %s2790_s26 = smov 0  }
   0x3   :  { %s2792_s27 = smov 0  }
   0x4 LB: > { %s25_s28 = sadd.s32 1, %s2733_s25  ;;  %s28_s29 = sadd.s32 1, %s2737_s26  ;;  %s2741_s27 = sphi %s2792_s27, %s16_s27   ;;  %s2737_s26 = sphi %s2790_s26, %s3431_s26   ;;  %s2733_s25 = sphi %s2788_s25, %s3430_s25   ;;  %s2729_s24 = sphi %s2786_s24, %s3429_s24   ;;  %s2725_s23 = sphi %s2784_s23, %s3428_s23   ;;  %s2721_s22 = sphi %s2782_s22, %s3427_s22   ;;  %s2717_s21 = sphi %s2780_s21, %s3426_s21  }
   0x5   : > { %p26_p0 = scmp.ge.s32.totalorder %s25_s28, 2  ;;  %p44_p1 = scmp.ne.s32.totalorder %s2721_s22, %s2717_s21 }
   0x6   : > { %p45_p2 = scmp.eq.s32.totalorder %s2741_s27, 0  ;;  %s37_s9 = sadd.s32 1, %s2721_s22 }
   0x7   : > { %s3433_s28 = smov (%p26_p0, %s25_s28), 0  ;;  %s3435_s29 = smov (!%p26_p0, %s28_s29), %s2737_s26 }
   0x8   : > { %p46_p3 = por %p45_p2, %p44_p1  ;;  %p30_p4 = scmp.ge.s32.totalorder %s3435_s29, 2 }
   0x9   : > { %s33_s30 = ssub.s32 %s2733_s25, %s3433_s28  ;;  %p2188_p6 = scmp.ge.s32.totalorder %s2741_s27, 4 }
   0xa   : > { %s3437_s29 = smov (%p30_p4, %s3435_s29), 0 }
   0xb   : > { %s32_s7 = ssub.s32 %s2737_s26, %s3437_s29  ;;  %218 = sbr.rel (%p2188_p6) target bundleno = 55 (0x37), region = 32 }
   0xc   : > { %s34_s8 = sor.u32 %s33_s30, %s32_s7 }
   0xd   : > { %p35_p5 = scmp.eq.s32.totalorder %s34_s8, 0 }
   0xf   : > { %s2831_s10 = scalar_select %p35_p5, %s2721_s22, %s37_s9  }
  0x10   : > { %221 = sbr.rel (!%p46_p3) target bundleno = 55 (0x37), region = 36  ;;  %s223_s11 = sand.u32 (%p46_p3), 1, %s2721_s22  }
  0x11   : > { %s2191_s12 = sshll.u32 (%p46_p3), %s2733_s25, 1  ;;  %s2189_s13 = sshll.u32 (%p46_p3), %s223_s11, 8 }
  0x12   : > { %s2452_s14 = sshll.u32 (%p46_p3), %s2737_s26, 7  ;;  %s2845_s20 = scalar_lea.vmem (%p46_p3), [#allocation4], %s2189_s13 }
  0x13   : > { %s229_s15 = sadd.s32 (%p46_p3), %s2452_s14, %s2191_s12 }
  0x14   : > { %s2193_s16 = sshll.u32 (%p46_p3), %s229_s15, 2 }
  0x15   : > { %s2840_s19 = scalar_lea.vmem %s3419_s0, %s2193_s16 }
  0x16   : > { %v322_v0 = vld [vmem:[%s2840_s19] sm:$0xff]  ;;  %v324_v1 = vld [vmem:[%s2840_s19 + $0x10] sm:$0xff] }
  0x17   : > { %v326_v2 = vld [vmem:[%s2840_s19 + $0x20] sm:$0xff]  ;;  %323 = vst [vmem:[%s2845_s20] sm:$0xff] %v322_v0  ;;  %v328_v3 = vld [vmem:[%s2840_s19 + $0x30] sm:$0xff] }
  0x18   : > { %325 = vst [vmem:[%s2845_s20 + $0x8] sm:$0xff] %v324_v1  ;;  %v330_v4 = vld [vmem:[%s2840_s19 + $0x40] sm:$0xff]  ;;  %v332_v5 = vld [vmem:[%s2840_s19 + $0x50] sm:$0xff] }
  0x19   : > { %327 = vst [vmem:[%s2845_s20 + $0x10] sm:$0xff] %v326_v2  ;;  %v334_v6 = vld [vmem:[%s2840_s19 + $0x60] sm:$0xff]  ;;  %v336_v7 = vld [vmem:[%s2840_s19 + $0x70] sm:$0xff] }
  0x1a   : > { %329 = vst [vmem:[%s2845_s20 + $0x18] sm:$0xff] %v328_v3  ;;  %v338_v8 = vld [vmem:[%s2840_s19 + $0x80] sm:$0xff]  ;;  %v340_v9 = vld [vmem:[%s2840_s19 + $0x90] sm:$0xff] }
  0x1b   : > { %331 = vst [vmem:[%s2845_s20 + $0x20] sm:$0xff] %v330_v4  ;;  %v342_v10 = vld [vmem:[%s2840_s19 + $0xa0] sm:$0xff]  ;;  %v344_v11 = vld [vmem:[%s2840_s19 + $0xb0] sm:$0xff] }
  0x1c   : > { %333 = vst [vmem:[%s2845_s20 + $0x28] sm:$0xff] %v332_v5  ;;  %v346_v12 = vld [vmem:[%s2840_s19 + $0xc0] sm:$0xff]  ;;  %v348_v13 = vld [vmem:[%s2840_s19 + $0xd0] sm:$0xff] }
  0x1d   : > { %335 = vst [vmem:[%s2845_s20 + $0x30] sm:$0xff] %v334_v6  ;;  %v350_v14 = vld [vmem:[%s2840_s19 + $0xe0] sm:$0xff]  ;;  %v352_v15 = vld [vmem:[%s2840_s19 + $0xf0] sm:$0xff] }
  0x1e   : > { %337 = vst [vmem:[%s2845_s20 + $0x38] sm:$0xff] %v336_v7  ;;  %v354_v16 = vld [vmem:[%s2840_s19 + $0x100] sm:$0xff]  ;;  %v356_v17 = vld [vmem:[%s2840_s19 + $0x110] sm:$0xff] }
  0x1f   : > { %339 = vst [vmem:[%s2845_s20 + $0x40] sm:$0xff] %v338_v8  ;;  %v358_v18 = vld [vmem:[%s2840_s19 + $0x120] sm:$0xff]  ;;  %v360_v19 = vld [vmem:[%s2840_s19 + $0x130] sm:$0xff] }
  0x20   : > { %341 = vst [vmem:[%s2845_s20 + $0x48] sm:$0xff] %v340_v9  ;;  %v362_v20 = vld [vmem:[%s2840_s19 + $0x140] sm:$0xff]  ;;  %v364_v21 = vld [vmem:[%s2840_s19 + $0x150] sm:$0xff] }
  0x21   : > { %343 = vst [vmem:[%s2845_s20 + $0x50] sm:$0xff] %v342_v10  ;;  %v366_v22 = vld [vmem:[%s2840_s19 + $0x160] sm:$0xff]  ;;  %v368_v23 = vld [vmem:[%s2840_s19 + $0x170] sm:$0xff] }
  0x22   : > { %345 = vst [vmem:[%s2845_s20 + $0x58] sm:$0xff] %v344_v11  ;;  %v370_v24 = vld [vmem:[%s2840_s19 + $0x180] sm:$0xff]  ;;  %v372_v25 = vld [vmem:[%s2840_s19 + $0x190] sm:$0xff] }
  0x23   : > { %347 = vst [vmem:[%s2845_s20 + $0x60] sm:$0xff] %v346_v12  ;;  %v374_v26 = vld [vmem:[%s2840_s19 + $0x1a0] sm:$0xff]  ;;  %v376_v27 = vld [vmem:[%s2840_s19 + $0x1b0] sm:$0xff] }
  0x24   : > { %349 = vst [vmem:[%s2845_s20 + $0x68] sm:$0xff] %v348_v13  ;;  %v378_v28 = vld [vmem:[%s2840_s19 + $0x1c0] sm:$0xff]  ;;  %v380_v29 = vld [vmem:[%s2840_s19 + $0x1d0] sm:$0xff] }
  0x25   : > { %351 = vst [vmem:[%s2845_s20 + $0x70] sm:$0xff] %v350_v14  ;;  %v382_v30 = vld [vmem:[%s2840_s19 + $0x1e0] sm:$0xff]  ;;  %v384_v31 = vld [vmem:[%s2840_s19 + $0x1f0] sm:$0xff] }
  0x26   : > { %353 = vst [vmem:[%s2845_s20 + $0x78] sm:$0xff] %v352_v15 }
  0x27   : > { %355 = vst [vmem:[%s2845_s20 + $0x80] sm:$0xff] %v354_v16 }
  0x28   : > { %357 = vst [vmem:[%s2845_s20 + $0x88] sm:$0xff] %v356_v17 }
  0x29   : > { %359 = vst [vmem:[%s2845_s20 + $0x90] sm:$0xff] %v358_v18 }
  0x2a   : > { %361 = vst [vmem:[%s2845_s20 + $0x98] sm:$0xff] %v360_v19 }
  0x2b   : > { %363 = vst [vmem:[%s2845_s20 + $0xa0] sm:$0xff] %v362_v20 }
  0x2c   : > { %365 = vst [vmem:[%s2845_s20 + $0xa8] sm:$0xff] %v364_v21 }
  0x2d   : > { %367 = vst [vmem:[%s2845_s20 + $0xb0] sm:$0xff] %v366_v22 }
  0x2e   : > { %369 = vst [vmem:[%s2845_s20 + $0xb8] sm:$0xff] %v368_v23 }
  0x2f   : > { %371 = vst [vmem:[%s2845_s20 + $0xc0] sm:$0xff] %v370_v24 }
  0x30   : > { %373 = vst [vmem:[%s2845_s20 + $0xc8] sm:$0xff] %v372_v25 }
  0x31   : > { %375 = vst [vmem:[%s2845_s20 + $0xd0] sm:$0xff] %v374_v26 }
  0x32   : > { %377 = vst [vmem:[%s2845_s20 + $0xd8] sm:$0xff] %v376_v27 }
  0x33   : > { %379 = vst [vmem:[%s2845_s20 + $0xe0] sm:$0xff] %v378_v28 }
  0x34   : > { %381 = vst [vmem:[%s2845_s20 + $0xe8] sm:$0xff] %v380_v29 }
  0x35   : > { %383 = vst [vmem:[%s2845_s20 + $0xf0] sm:$0xff] %v382_v30 }
  0x36   : > { %385 = vst [vmem:[%s2845_s20 + $0xf8] sm:$0xff] %v384_v31 }
  0x37 PF: > { %p2194_p7 = scmp.ge.s32.totalorder %s2741_s27, 1  ;;  %p399_p8 = scmp.lt.s32.totalorder %s2741_s27, 5 }
  0x39   : > { %p400_p9 = pnand %p2194_p7, %p399_p8 }
  0x3a   : > { %s406_s30 = sand.u32 (!%p400_p9), 1, %s2717_s21   ;;  %s2196_s7 = sshll.u32 (!%p400_p9), %s2725_s23, 5 }
  0x3b   : > { %403 = sbr.rel (%p400_p9) target bundleno = 961 (0x3c1), region = 78  ;;  %s2195_s8 = sshll.u32 (!%p400_p9), %s406_s30, 8 }
  0x3c   : > { %p443_p10 = scmp.lt.s32.totalorder (!%p400_p9), %s2196_s7, 63  ;;  %s2198_s9 = sshll.u32 (!%p400_p9), %s2729_s24, 5 }
  0x3d   : > { %p449_p11 = scmp.lt.s32.totalorder (!%p400_p9), %s2198_s9, 63  ;;  %s2923_s21 = scalar_lea.vmem (!%p400_p9), [#allocation4], %s2195_s8 }
  0x3e   : > { %p2200_p12 = scmp.ne.s32.totalorder (!%p400_p9), %s2725_s23, 0 }
  0x40   : > { %s3439_s7 = smov (!%p443_p10, %s2196_s7), 63  ;;  %s3441_s9 = smov (!%p449_p11, %s2198_s9), 63 }
  0x41   : > { %s2197_s11 = sshll.u32 %s3439_s7, 2  ;;  %s2199_s15 = sshll.u32 %s3441_s9, 2 }
  0x42   : > { %s2916_s14 = scalar_lea.vmem %s3420_s1, %s2197_s11  ;;  %s2921_s18 = scalar_lea.vmem %s3425_s6, %s2199_s15 }
  0x43   : > { %458 = sbr.rel (%p2200_p12) target bundleno = 137 (0x89), region = 86 }
  0x48   : > { %vm459_vm0 = vcmask 261120   ;;  %v2743_v32 = vmov 0.0   ;;  %vm492_vm1 = vcmask 7168  }
  0x49   : > { %460 = vst.msk [vmem:[#allocation2] sm:$0xff] %vm459_vm0, %v2743_v32 }
  0x4a   : > { %461 = vst.msk [vmem:[#allocation2 + $0x8] sm:$0xff] %vm459_vm0, %v2743_v32 }
  0x4b   : > { %462 = vst.msk [vmem:[#allocation2 + $0x10] sm:$0xff] %vm459_vm0, %v2743_v32 }
  0x4c   : > { %463 = vst.msk [vmem:[#allocation2 + $0x18] sm:$0xff] %vm459_vm0, %v2743_v32 }
  0x4d   : > { %464 = vst.msk [vmem:[#allocation2 + $0x20] sm:$0xff] %vm459_vm0, %v2743_v32 }
  0x4e   : > { %465 = vst.msk [vmem:[#allocation2 + $0x28] sm:$0xff] %vm459_vm0, %v2743_v32 }
  0x4f   : > { %466 = vst.msk [vmem:[#allocation2 + $0x30] sm:$0xff] %vm459_vm0, %v2743_v32 }
  0x50   : > { %467 = vst.msk [vmem:[#allocation2 + $0x38] sm:$0xff] %vm459_vm0, %v2743_v32 }
  0x51   : > { %468 = vst.msk [vmem:[#allocation2 + $0x40] sm:$0xff] %vm459_vm0, %v2743_v32 }
  0x52   : > { %469 = vst.msk [vmem:[#allocation2 + $0x48] sm:$0xff] %vm459_vm0, %v2743_v32 }
  0x53   : > { %470 = vst.msk [vmem:[#allocation2 + $0x50] sm:$0xff] %vm459_vm0, %v2743_v32 }
  0x54   : > { %471 = vst.msk [vmem:[#allocation2 + $0x58] sm:$0xff] %vm459_vm0, %v2743_v32 }
  0x55   : > { %472 = vst.msk [vmem:[#allocation2 + $0x60] sm:$0xff] %vm459_vm0, %v2743_v32 }
  0x56   : > { %473 = vst.msk [vmem:[#allocation2 + $0x68] sm:$0xff] %vm459_vm0, %v2743_v32 }
  0x57   : > { %474 = vst.msk [vmem:[#allocation2 + $0x70] sm:$0xff] %vm459_vm0, %v2743_v32 }
  0x58   : > { %475 = vst.msk [vmem:[#allocation2 + $0x78] sm:$0xff] %vm459_vm0, %v2743_v32 }
  0x59   : > { %476 = vst.msk [vmem:[#allocation2 + $0x80] sm:$0xff] %vm459_vm0, %v2743_v32 }
  0x5a   : > { %477 = vst.msk [vmem:[#allocation2 + $0x88] sm:$0xff] %vm459_vm0, %v2743_v32 }
  0x5b   : > { %478 = vst.msk [vmem:[#allocation2 + $0x90] sm:$0xff] %vm459_vm0, %v2743_v32 }
  0x5c   : > { %479 = vst.msk [vmem:[#allocation2 + $0x98] sm:$0xff] %vm459_vm0, %v2743_v32 }
  0x5d   : > { %480 = vst.msk [vmem:[#allocation2 + $0xa0] sm:$0xff] %vm459_vm0, %v2743_v32 }
  0x5e   : > { %481 = vst.msk [vmem:[#allocation2 + $0xa8] sm:$0xff] %vm459_vm0, %v2743_v32 }
  0x5f   : > { %482 = vst.msk [vmem:[#allocation2 + $0xb0] sm:$0xff] %vm459_vm0, %v2743_v32 }
  0x60   : > { %483 = vst.msk [vmem:[#allocation2 + $0xb8] sm:$0xff] %vm459_vm0, %v2743_v32 }
  0x61   : > { %484 = vst.msk [vmem:[#allocation2 + $0xc0] sm:$0xff] %vm459_vm0, %v2743_v32 }
  0x62   : > { %485 = vst.msk [vmem:[#allocation2 + $0xc8] sm:$0xff] %vm459_vm0, %v2743_v32 }
  0x63   : > { %486 = vst.msk [vmem:[#allocation2 + $0xd0] sm:$0xff] %vm459_vm0, %v2743_v32 }
  0x64   : > { %487 = vst.msk [vmem:[#allocation2 + $0xd8] sm:$0xff] %vm459_vm0, %v2743_v32 }
  0x65   : > { %488 = vst.msk [vmem:[#allocation2 + $0xe0] sm:$0xff] %vm459_vm0, %v2743_v32 }
  0x66   : > { %489 = vst.msk [vmem:[#allocation2 + $0xe8] sm:$0xff] %vm459_vm0, %v2743_v32 }
  0x67   : > { %490 = vst.msk [vmem:[#allocation2 + $0xf0] sm:$0xff] %vm459_vm0, %v2743_v32 }
  0x68   : > { %491 = vst.msk [vmem:[#allocation2 + $0xf8] sm:$0xff] %vm459_vm0, %v2743_v32 }
  0x69   : > { %493 = vst.msk [vmem:[#allocation3] sm:$0xff] %vm492_vm1, %v2743_v32 }
  0x6a   : > { %494 = vst.msk [vmem:[#allocation3 + $0x8] sm:$0xff] %vm492_vm1, %v2743_v32 }
  0x6b   : > { %495 = vst.msk [vmem:[#allocation3 + $0x10] sm:$0xff] %vm492_vm1, %v2743_v32 }
  0x6c   : > { %496 = vst.msk [vmem:[#allocation3 + $0x18] sm:$0xff] %vm492_vm1, %v2743_v32 }
  0x6d   : > { %497 = vst.msk [vmem:[#allocation3 + $0x20] sm:$0xff] %vm492_vm1, %v2743_v32 }
  0x6e   : > { %498 = vst.msk [vmem:[#allocation3 + $0x28] sm:$0xff] %vm492_vm1, %v2743_v32 }
  0x6f   : > { %499 = vst.msk [vmem:[#allocation3 + $0x30] sm:$0xff] %vm492_vm1, %v2743_v32 }
  0x70   : > { %500 = vst.msk [vmem:[#allocation3 + $0x38] sm:$0xff] %vm492_vm1, %v2743_v32 }
  0x71   : > { %501 = vst.msk [vmem:[#allocation3 + $0x40] sm:$0xff] %vm492_vm1, %v2743_v32 }
  0x72   : > { %502 = vst.msk [vmem:[#allocation3 + $0x48] sm:$0xff] %vm492_vm1, %v2743_v32 }
  0x73   : > { %503 = vst.msk [vmem:[#allocation3 + $0x50] sm:$0xff] %vm492_vm1, %v2743_v32 }
  0x74   : > { %504 = vst.msk [vmem:[#allocation3 + $0x58] sm:$0xff] %vm492_vm1, %v2743_v32 }
  0x75   : > { %505 = vst.msk [vmem:[#allocation3 + $0x60] sm:$0xff] %vm492_vm1, %v2743_v32 }
  0x76   : > { %506 = vst.msk [vmem:[#allocation3 + $0x68] sm:$0xff] %vm492_vm1, %v2743_v32 }
  0x77   : > { %507 = vst.msk [vmem:[#allocation3 + $0x70] sm:$0xff] %vm492_vm1, %v2743_v32 }
  0x78   : > { %508 = vst.msk [vmem:[#allocation3 + $0x78] sm:$0xff] %vm492_vm1, %v2743_v32 }
  0x79   : > { %509 = vst.msk [vmem:[#allocation3 + $0x80] sm:$0xff] %vm492_vm1, %v2743_v32 }
  0x7a   : > { %510 = vst.msk [vmem:[#allocation3 + $0x88] sm:$0xff] %vm492_vm1, %v2743_v32 }
  0x7b   : > { %511 = vst.msk [vmem:[#allocation3 + $0x90] sm:$0xff] %vm492_vm1, %v2743_v32 }
  0x7c   : > { %512 = vst.msk [vmem:[#allocation3 + $0x98] sm:$0xff] %vm492_vm1, %v2743_v32 }
  0x7d   : > { %513 = vst.msk [vmem:[#allocation3 + $0xa0] sm:$0xff] %vm492_vm1, %v2743_v32 }
  0x7e   : > { %514 = vst.msk [vmem:[#allocation3 + $0xa8] sm:$0xff] %vm492_vm1, %v2743_v32 }
  0x7f   : > { %515 = vst.msk [vmem:[#allocation3 + $0xb0] sm:$0xff] %vm492_vm1, %v2743_v32 }
  0x80   : > { %516 = vst.msk [vmem:[#allocation3 + $0xb8] sm:$0xff] %vm492_vm1, %v2743_v32 }
  0x81   : > { %517 = vst.msk [vmem:[#allocation3 + $0xc0] sm:$0xff] %vm492_vm1, %v2743_v32 }
  0x82   : > { %518 = vst.msk [vmem:[#allocation3 + $0xc8] sm:$0xff] %vm492_vm1, %v2743_v32 }
  0x83   : > { %519 = vst.msk [vmem:[#allocation3 + $0xd0] sm:$0xff] %vm492_vm1, %v2743_v32 }
  0x84   : > { %520 = vst.msk [vmem:[#allocation3 + $0xd8] sm:$0xff] %vm492_vm1, %v2743_v32 }
  0x85   : > { %521 = vst.msk [vmem:[#allocation3 + $0xe0] sm:$0xff] %vm492_vm1, %v2743_v32 }
  0x86   : > { %522 = vst.msk [vmem:[#allocation3 + $0xe8] sm:$0xff] %vm492_vm1, %v2743_v32 }
  0x87   : > { %523 = vst.msk [vmem:[#allocation3 + $0xf0] sm:$0xff] %vm492_vm1, %v2743_v32 }
  0x88   : > { %524 = vst.msk [vmem:[#allocation3 + $0xf8] sm:$0xff] %vm492_vm1, %v2743_v32 }
  0x89 PF: > { %v2492_v33 = vld [vmem:[%s2916_s14 + $0x38] sm:$0xff]  ;;  %v2491_v35 = vld [vmem:[%s2916_s14 + $0x30] sm:$0xff]  ;;  %v2490_v37 = vld [vmem:[%s2916_s14 + $0x28] sm:$0xff]  ;;  %vm1087_vm2 = vcmask 261120   ;;  %vm1344_vm3 = vcmask 7168   ;;  %p2393_p13 = scmp.ne.s32.totalorder %s2725_s23, 1 }
  0x8a   : > { %v2500_v34 = vld [vmem:[%s2916_s14 + $0x78] sm:$0xff]  ;;  %877 = vmatpush.bf16.msra.mxu0 %v2492_v33  ;;  %2602 = vmatpush.bf16.msra.mxu2 %v2492_v33  ;;  %v2499_v36 = vld [vmem:[%s2916_s14 + $0x70] sm:$0xff]  ;;  %v2498_v38 = vld [vmem:[%s2916_s14 + $0x68] sm:$0xff] }
  0x8b   : > { %966 = vmatpush.bf16.msra.mxu1 %v2500_v34  ;;  %2610 = vmatpush.bf16.msra.mxu3 %v2500_v34  ;;  %v2489_v39 = vld [vmem:[%s2916_s14 + $0x20] sm:$0xff]  ;;  %v2488_v41 = vld [vmem:[%s2916_s14 + $0x18] sm:$0xff]  ;;  %v2487_v43 = vld [vmem:[%s2916_s14 + $0x10] sm:$0xff] }
  0x8c   : > { %v2497_v40 = vld [vmem:[%s2916_s14 + $0x60] sm:$0xff]  ;;  %v2496_v42 = vld [vmem:[%s2916_s14 + $0x58] sm:$0xff]  ;;  %v2495_v44 = vld [vmem:[%s2916_s14 + $0x50] sm:$0xff] }
  0x8d   : > { %v2486_v45 = vld [vmem:[%s2916_s14 + $0x8] sm:$0xff]  ;;  %v2485_v47 = vld [vmem:[%s2916_s14] sm:$0xff]  ;;  %v2211_v61 = vld [vmem:[%s2923_s21 + $0x10] sm:$0xf] }
  0x8e   : > { %878 = vmatpush.bf16.msra.mxu0 %v2491_v35  ;;  %2603 = vmatpush.bf16.msra.mxu2 %v2491_v35  ;;  %v2494_v46 = vld [vmem:[%s2916_s14 + $0x48] sm:$0xff]  ;;  %v2493_v48 = vld [vmem:[%s2916_s14 + $0x40] sm:$0xff]  ;;  %v2456_v62 = vld [vmem:[%s2923_s21 + $0x14] sm:$0xf0] }
  0x8f   : > { %967 = vmatpush.bf16.msra.mxu1 %v2499_v36  ;;  %2611 = vmatpush.bf16.msra.mxu3 %v2499_v36  ;;  %v2203_v49 = vld [vmem:[%s2923_s21] sm:$0xf]  ;;  %v2454_v50 = vld [vmem:[%s2923_s21 + $0x4] sm:$0xf0]  ;;  %v2453_v53 = vld [vmem:[%s2923_s21 + $0x4] sm:$0xf]  ;;  %v2212_v5 = vor.u32 %v2456_v62, %v2211_v61 }
  0x90   : > { %v2267_v51 = vld [vmem:[%s2923_s21 + $0x80] sm:$0xf]  ;;  %v2470_v52 = vld [vmem:[%s2923_s21 + $0x84] sm:$0xf0]  ;;  %v2205_v54 = vld [vmem:[%s2923_s21 + $0x8] sm:$0xf0]  ;;  %v2204_v57 = vor.u32 %v2454_v50, %v2203_v49 }
  0x91   : > { %v2469_v55 = vld [vmem:[%s2923_s21 + $0x84] sm:$0xf]  ;;  %v2269_v56 = vld [vmem:[%s2923_s21 + $0x88] sm:$0xf0]  ;;  %v2268_v58 = vor.u32 %v2470_v52, %v2267_v51  ;;  %v2208_v59 = vor.u32 %v2453_v53, %v2205_v54  ;;  %v2275_v63 = vld [vmem:[%s2923_s21 + $0x90] sm:$0xf] }
  0x92   : > { %879 = vmatpush.bf16.msra.mxu0 %v2490_v37  ;;  %2604 = vmatpush.bf16.msra.mxu2 %v2490_v37  ;;  %v2272_v60 = vor.u32 %v2469_v55, %v2269_v56  ;;  %v2472_v0 = vld [vmem:[%s2923_s21 + $0x94] sm:$0xf0]  ;;  %v2455_v1 = vld [vmem:[%s2923_s21 + $0x14] sm:$0xf]  ;;  %v2213_v2 = vld [vmem:[%s2923_s21 + $0x18] sm:$0xf0] }
  0x93   : > { %968 = vmatpush.bf16.msra.mxu1 %v2498_v38  ;;  %2612 = vmatpush.bf16.msra.mxu3 %v2498_v38  ;;  %v2471_v3 = vld [vmem:[%s2923_s21 + $0x94] sm:$0xf]  ;;  %v2277_v4 = vld [vmem:[%s2923_s21 + $0x98] sm:$0xf0]  ;;  %v2276_v6 = vor.u32 %v2472_v0, %v2275_v63  ;;  %v2216_v7 = vor.u32 %v2455_v1, %v2213_v2  ;;  %v525_v10 = vld [vmem:[%s2923_s21] sm:$0xff] }
  0x94   : > { %v2280_v8 = vor.u32 %v2471_v3, %v2277_v4  ;;  %v527_v9 = vld [vmem:[%s2923_s21 + $0x10] sm:$0xff]  ;;  %v1152_v13 = vunpack.c.l.bf16 %v525_v10  ;;  %v1153_v14 = vunpack.c.h.bf16 %v525_v10  ;;  %v2219_v17 = vld [vmem:[%s2923_s21 + $0x20] sm:$0xf]  ;;  %v2458_v18 = vld [vmem:[%s2923_s21 + $0x24] sm:$0xf0] }
  0x95   : > { %v1156_v11 = vunpack.c.l.bf16 %v527_v9  ;;  %v1157_v12 = vunpack.c.h.bf16 %v527_v9  ;;  %v2283_v19 = vld [vmem:[%s2923_s21 + $0xa0] sm:$0xf]  ;;  %v2474_v20 = vld [vmem:[%s2923_s21 + $0xa4] sm:$0xf0]  ;;  %v2457_v21 = vld [vmem:[%s2923_s21 + $0x24] sm:$0xf]  ;;  %v2220_v25 = vor.u32 %v2458_v18, %v2219_v17 }
  0x96   : > { %880 = vmatpush.bf16.msra.mxu0 %v2489_v39  ;;  %2605 = vmatpush.bf16.msra.mxu2 %v2489_v39  ;;  %v1216_v16 = vadd.f32 %v1153_v14, %v1152_v13  ;;  %v2221_v22 = vld [vmem:[%s2923_s21 + $0x28] sm:$0xf0]  ;;  %v2473_v23 = vld [vmem:[%s2923_s21 + $0xa4] sm:$0xf]  ;;  %v2284_v26 = vor.u32 %v2474_v20, %v2283_v19  ;;  %v528_v30 = vld [vmem:[%s2923_s21 + $0x18] sm:$0xff] }
  0x97   : > { %969 = vmatpush.bf16.msra.mxu1 %v2497_v40  ;;  %2613 = vmatpush.bf16.msra.mxu3 %v2497_v40  ;;  %v1222_v15 = vadd.f32 %v1157_v12, %v1156_v11  ;;  %v2285_v24 = vld [vmem:[%s2923_s21 + $0xa8] sm:$0xf0]  ;;  %v2224_v27 = vor.u32 %v2457_v21, %v2221_v22  ;;  %v529_v29 = vld [vmem:[%s2923_s21 + $0x20] sm:$0xff]  ;;  %v1158_v34 = vunpack.c.l.bf16 %v528_v30  ;;  %v1159_v35 = vunpack.c.h.bf16 %v528_v30  ;;  %v532_v39 = vld [vmem:[%s2923_s21 + $0x38] sm:$0xff] }
  0x98   : > { %1217 = vadd.xlane.f32.xlu0 %v1216_v16  ;;  %v2288_v28 = vor.u32 %v2473_v23, %v2285_v24  ;;  %v526_v31 = vld [vmem:[%s2923_s21 + $0x8] sm:$0xff]  ;;  %v1160_v32 = vunpack.c.l.bf16 %v529_v29  ;;  %v1161_v33 = vunpack.c.h.bf16 %v529_v29  ;;  %v2227_v50 = vld [vmem:[%s2923_s21 + $0x30] sm:$0xf]  ;;  %v2460_v51 = vld [vmem:[%s2923_s21 + $0x34] sm:$0xf0] }
  0x99   : > { %1223 = vadd.xlane.f32.xlu1 %v1222_v15  ;;  %v1154_v36 = vunpack.c.l.bf16 %v526_v31  ;;  %v1155_v37 = vunpack.c.h.bf16 %v526_v31  ;;  %v530_v38 = vld [vmem:[%s2923_s21 + $0x28] sm:$0xff]  ;;  %v2291_v52 = vld [vmem:[%s2923_s21 + $0xb0] sm:$0xf]  ;;  %v2476_v53 = vld [vmem:[%s2923_s21 + $0xb4] sm:$0xf0]  ;;  %v2228_v61 = vor.u32 %v2460_v51, %v2227_v50 }
  0x9a   : > { %881 = vmatpush.bf16.msra.mxu0 %v2488_v41  ;;  %2606 = vmatpush.bf16.msra.mxu2 %v2488_v41  ;;  %v1228_v40 = vadd.f32 %v1161_v33, %v1160_v32  ;;  %v1225_v41 = vadd.f32 %v1159_v35, %v1158_v34  ;;  %v2459_v54 = vld [vmem:[%s2923_s21 + $0x34] sm:$0xf]  ;;  %v2292_v62 = vor.u32 %v2476_v53, %v2291_v52  ;;  %v533_v1 = vld [vmem:[%s2923_s21 + $0x40] sm:$0xff]  ;;  %v534_v3 = vld [vmem:[%s2923_s21 + $0x48] sm:$0xff] }
  0x9b   : > { %970 = vmatpush.bf16.msra.mxu1 %v2496_v42  ;;  %2614 = vmatpush.bf16.msra.mxu3 %v2496_v42  ;;  %v531_v42 = vld [vmem:[%s2923_s21 + $0x30] sm:$0xff]  ;;  %v1168_v4 = vunpack.c.l.bf16 %v533_v1  ;;  %v1171_v9 = vunpack.c.h.bf16 %v534_v3  ;;  %v536_v10 = vld [vmem:[%s2923_s21 + $0x58] sm:$0xff]  ;;  %v538_v11 = vld [vmem:[%s2923_s21 + $0x68] sm:$0xff] }
  0x9c   : > { %1229 = vadd.xlane.f32.xlu2 %v1228_v40  ;;  %v1165_v49 = vunpack.c.h.bf16 %v531_v42  ;;  %v535_v2 = vld [vmem:[%s2923_s21 + $0x50] sm:$0xff]  ;;  %v537_v14 = vld [vmem:[%s2923_s21 + $0x60] sm:$0xff]  ;;  %v1174_v16 = vunpack.c.l.bf16 %v536_v10  ;;  %v1175_v17 = vunpack.c.h.bf16 %v536_v10  ;;  %v1178_v18 = vunpack.c.l.bf16 %v538_v11  ;;  %v2462_v23 = vld [vmem:[%s2923_s21 + $0x44] sm:$0xf0] }
  0x9d   : > { %v1179_v19 = vunpack.c.h.bf16 %v538_v11  ;;  %v1176_v20 = vunpack.c.l.bf16 %v537_v14  ;;  %v1177_v21 = vunpack.c.h.bf16 %v537_v14  ;;  %v2235_v22 = vld [vmem:[%s2923_s21 + $0x40] sm:$0xf]  ;;  %v2237_v29 = vld [vmem:[%s2923_s21 + $0x48] sm:$0xf0]  ;;  %v2477_v30 = vld [vmem:[%s2923_s21 + $0xc4] sm:$0xf] }
  0x9e   : > { %882 = vmatpush.bf16.msra.mxu0 %v2487_v43  ;;  %2607 = vmatpush.bf16.msra.mxu2 %v2487_v43  ;;  %v1219_v43 = vadd.f32 %v1155_v37, %v1154_v36  ;;  %v2299_v24 = vld [vmem:[%s2923_s21 + $0xc0] sm:$0xf]  ;;  %v2301_v31 = vld [vmem:[%s2923_s21 + $0xc8] sm:$0xf0]  ;;  %v2236_v33 = vor.u32 %v2462_v23, %v2235_v22  ;;  %v539_v37 = vld [vmem:[%s2923_s21 + $0x70] sm:$0xff] }
  0x9f   : > { %971 = vmatpush.bf16.msra.mxu1 %v2495_v44  ;;  %2615 = vmatpush.bf16.msra.mxu3 %v2495_v44  ;;  %v1162_v44 = vunpack.c.l.bf16 %v530_v38  ;;  %v1252_v32 = vadd.f32 %v1177_v21, %v1176_v20  ;;  %v2304_v36 = vor.u32 %v2477_v30, %v2301_v31  ;;  %v1180_v40 = vunpack.c.l.bf16 %v539_v37  ;;  %v543_v50 = vld [vmem:[%s2923_s21 + $0x90] sm:$0xff]  ;;  %v546_v11 = vld [vmem:[%s2923_s21 + $0xa8] sm:$0xff]  ;;  %v549_v22 = vld [vmem:[%s2923_s21 + $0xc0] sm:$0xff] }
  0xa0   : > { %1220 = vadd.xlane.f32.xlu0 %v1219_v43  ;;  %v547_v10 = vld [vmem:[%s2923_s21 + $0xb0] sm:$0xff]  ;;  %v2251_v30 = vld [vmem:[%s2923_s21 + $0x60] sm:$0xf]  ;;  %v2466_v31 = vld [vmem:[%s2923_s21 + $0x64] sm:$0xf0] }
  0xa1   : > { %1226 = vadd.xlane.f32.xlu1 %v1225_v41  ;;  %v1181_v41 = vunpack.c.h.bf16 %v539_v37  ;;  %v1196_v14 = vunpack.c.l.bf16 %v547_v10  ;;  %v2253_v37 = vld [vmem:[%s2923_s21 + $0x68] sm:$0xf0] }
  0xa2   : > { %883 = vmatpush.bf16.msra.mxu0 %v2486_v45  ;;  %2608 = vmatpush.bf16.msra.mxu2 %v2486_v45  ;;  %v1163_v45 = vunpack.c.h.bf16 %v530_v38  ;;  %v541_v38 = vld [vmem:[%s2923_s21 + $0x80] sm:$0xff] }
  0xa3   : > { %972 = vmatpush.bf16.msra.mxu1 %v2494_v46  ;;  %2616 = vmatpush.bf16.msra.mxu3 %v2494_v46  ;;  %v1166_v46 = vunpack.c.l.bf16 %v532_v39  ;;  %v1185_v43 = vunpack.c.h.bf16 %v541_v38 }
  0xa4   : > { %v1231_v55 = vadd.f32 %v1163_v45, %v1162_v44 }
  0xa6   : > { %884 = vmatpush.bf16.msra.mxu0 %v2485_v47  ;;  %2609 = vmatpush.bf16.msra.mxu2 %v2485_v47  ;;  %v1167_v47 = vunpack.c.h.bf16 %v532_v39  ;;  %v540_v39 = vld [vmem:[%s2923_s21 + $0x78] sm:$0xff] }
  0xa7   : > { %973 = vmatpush.bf16.msra.mxu1 %v2493_v48  ;;  %2617 = vmatpush.bf16.msra.mxu3 %v2493_v48  ;;  %v1164_v48 = vunpack.c.l.bf16 %v531_v42  ;;  %v1184_v42 = vunpack.c.l.bf16 %v541_v38  ;;  %v1182_v44 = vunpack.c.l.bf16 %v540_v39  ;;  %v1183_v45 = vunpack.c.h.bf16 %v540_v39  ;;  %v2481_v38 = vld [vmem:[%s2923_s21 + $0xe4] sm:$0xf]  ;;  %v2317_v39 = vld [vmem:[%s2923_s21 + $0xe8] sm:$0xf0] }
  0xa8   : > { %v1237_v56 = vadd.f32 %v1167_v47, %v1166_v46  ;;  %1232 = vadd.xlane.f32.xlu2 %v1231_v55  ;;  %v542_v46 = vld [vmem:[%s2923_s21 + $0x88] sm:$0xff]  ;;  %v544_v47 = vld [vmem:[%s2923_s21 + $0x98] sm:$0xff] }
  0xa9   : > { %885 = vmatmul.bf16.vlgmr.msra.gmra.mxu0 %v2204_v57  ;;  %925 = vmatmul.bf16.vlgmr.msra.gmra.mxu2 %v2268_v58  ;;  %v2229_v57 = vld [vmem:[%s2923_s21 + $0x38] sm:$0xf0]  ;;  %v2475_v58 = vld [vmem:[%s2923_s21 + $0xb4] sm:$0xf]  ;;  %v1261_v51 = vadd.f32 %v1183_v45, %v1182_v44  ;;  %v1186_v52 = vunpack.c.l.bf16 %v542_v46  ;;  %v1187_v53 = vunpack.c.h.bf16 %v542_v46  ;;  %v1191_v55 = vunpack.c.h.bf16 %v544_v47  ;;  %v553_v46 = vld [vmem:[%s2923_s21 + $0xe0] sm:$0xff] }
  0xaa   : > { %974 = vmatmul.bf16.vlgmr.msra.gmra.mxu1 %v2208_v59  ;;  %1014 = vmatmul.bf16.vlgmr.msra.gmra.mxu3 %v2272_v60  ;;  %v2293_v59 = vld [vmem:[%s2923_s21 + $0xb8] sm:$0xf0]  ;;  %v1234_v60 = vadd.f32 %v1165_v49, %v1164_v48  ;;  %v2232_v63 = vor.u32 %v2459_v54, %v2229_v57  ;;  %v1258_v48 = vadd.f32 %v1181_v41, %v1180_v40  ;;  %v1190_v54 = vunpack.c.l.bf16 %v544_v47  ;;  %v551_v45 = vld [vmem:[%s2923_s21 + $0xd0] sm:$0xff] }
  0xab   : > { %v2296_v0 = vor.u32 %v2475_v58, %v2293_v59  ;;  %1238 = vadd.xlane.f32.xlu1 %v1237_v56  ;;  %v1264_v49 = vadd.f32 %v1185_v43, %v1184_v42  ;;  %v1188_v56 = vunpack.c.l.bf16 %v543_v50  ;;  %v1189_v57 = vunpack.c.h.bf16 %v543_v50  ;;  %v2243_v58 = vld [vmem:[%s2923_s21 + $0x50] sm:$0xf]  ;;  %v2464_v59 = vld [vmem:[%s2923_s21 + $0x54] sm:$0xf0] }
  0xac   : > { %1235 = vadd.xlane.f32.xlu0 %v1234_v60  ;;  %v2307_v60 = vld [vmem:[%s2923_s21 + $0xd0] sm:$0xf]  ;;  %v2252_v41 = vor.u32 %v2466_v31, %v2251_v30  ;;  %v2320_v44 = vor.u32 %v2481_v38, %v2317_v39  ;;  %v552_v47 = vld [vmem:[%s2923_s21 + $0xd8] sm:$0xff]  ;;  %v1208_v50 = vunpack.c.l.bf16 %v553_v46 }
  0xad   : > { %v1122_v39 = vld [vmem:[#allocation3 + $0x10] sm:$0xff] }
  0xb9   : > { %890 = vmatmul.bf16.gmra.mxu0 %v2212_v5  ;;  %930 = vmatmul.bf16.gmra.mxu2 %v2276_v6  ;;  %v1169_v5 = vunpack.c.h.bf16 %v533_v1  ;;  %v1172_v6 = vunpack.c.l.bf16 %v535_v2  ;;  %v2245_v1 = vld [vmem:[%s2923_s21 + $0x58] sm:$0xf0] }
  0xba   : > { %979 = vmatmul.bf16.gmra.mxu1 %v2216_v7  ;;  %1019 = vmatmul.bf16.gmra.mxu3 %v2280_v8  ;;  %v1173_v7 = vunpack.c.h.bf16 %v535_v2  ;;  %v1170_v8 = vunpack.c.l.bf16 %v534_v3  ;;  %v2479_v2 = vld [vmem:[%s2923_s21 + $0xd4] sm:$0xf]  ;;  %v2309_v3 = vld [vmem:[%s2923_s21 + $0xd8] sm:$0xf0] }
  0xbb   : > { %v1240_v12 = vadd.f32 %v1169_v5, %v1168_v4  ;;  %v1270_v4 = vadd.f32 %v1189_v57, %v1188_v56  ;;  %v2244_v5 = vor.u32 %v2464_v59, %v2243_v58  ;;  %v554_v57 = vld [vmem:[%s2923_s21 + $0xe8] sm:$0xff]  ;;  %v556_v58 = vld [vmem:[%s2923_s21 + $0xf8] sm:$0xff]  ;;  %v555_v59 = vld [vmem:[%s2923_s21 + $0xf0] sm:$0xff] }
  0xbc   : > { %v1246_v13 = vadd.f32 %v1173_v7, %v1172_v6  ;;  %v1243_v15 = vadd.f32 %v1171_v9, %v1170_v8  ;;  %v2312_v8 = vor.u32 %v2479_v2, %v2309_v3  ;;  %v545_v9 = vld [vmem:[%s2923_s21 + $0xa0] sm:$0xff]  ;;  %v1212_v2 = vunpack.c.l.bf16 %v555_v59 }
  0xbd   : > { %1241 = vadd.xlane.f32.xlu2 %v1240_v12  ;;  %v1192_v12 = vunpack.c.l.bf16 %v545_v9  ;;  %v1213_v3 = vunpack.c.h.bf16 %v555_v59  ;;  %v1121_v59 = vld [vmem:[#allocation3 + $0x8] sm:$0xff] }
  0xbe   : > { %1247 = vadd.xlane.f32.xlu1 %v1246_v13  ;;  %1244 = vadd.xlane.f32.xlu0 %v1243_v15  ;;  %v1193_v13 = vunpack.c.h.bf16 %v545_v9  ;;  %v1197_v15 = vunpack.c.h.bf16 %v547_v10  ;;  %v2261_v9 = vld [vmem:[%s2923_s21 + $0x78] sm:$0xf0]  ;;  %v2483_v10 = vld [vmem:[%s2923_s21 + $0xf4] sm:$0xf] }
  0xc0   : > { %v1276_v20 = vadd.f32 %v1193_v13, %v1192_v12  ;;  %v1282_v21 = vadd.f32 %v1197_v15, %v1196_v14  ;;  %v1306_v12 = vadd.f32 %v1213_v3, %v1212_v2 }
  0xc6   : > { %1253 = vadd.xlane.f32.xlu0 %v1252_v32  ;;  %v2315_v32 = vld [vmem:[%s2923_s21 + $0xe0] sm:$0xf] }
  0xc9   : > { %895 = vmatmul.bf16.gmra.mxu0 %v2220_v25  ;;  %935 = vmatmul.bf16.gmra.mxu2 %v2284_v26  ;;  %v2478_v25 = vld [vmem:[%s2923_s21 + $0xc4] sm:$0xf0]  ;;  %v2461_v26 = vld [vmem:[%s2923_s21 + $0x44] sm:$0xf] }
  0xca   : > { %984 = vmatmul.bf16.gmra.mxu1 %v2224_v27  ;;  %1024 = vmatmul.bf16.gmra.mxu3 %v2288_v28  ;;  %v1249_v27 = vadd.f32 %v1175_v17, %v1174_v16  ;;  %v1255_v28 = vadd.f32 %v1179_v19, %v1178_v18  ;;  %v2300_v34 = vor.u32 %v2478_v25, %v2299_v24  ;;  %v1194_v16 = vunpack.c.l.bf16 %v546_v11  ;;  %v548_v18 = vld [vmem:[%s2923_s21 + $0xb8] sm:$0xff]  ;;  %v550_v19 = vld [vmem:[%s2923_s21 + $0xc8] sm:$0xff] }
  0xcb   : > { %v2240_v35 = vor.u32 %v2461_v26, %v2237_v29  ;;  %v1195_v17 = vunpack.c.h.bf16 %v546_v11  ;;  %v1198_v24 = vunpack.c.l.bf16 %v548_v18  ;;  %v1199_v25 = vunpack.c.h.bf16 %v548_v18  ;;  %v2325_v11 = vld [vmem:[%s2923_s21 + $0xf8] sm:$0xf0]  ;;  %v557_v18 = vld [vmem:[#allocation2] sm:$0xff] }
  0xcc   : > { %1250 = vadd.xlane.f32.xlu2 %v1249_v27  ;;  %1256 = vadd.xlane.f32.xlu1 %v1255_v28  ;;  %v1202_v26 = vunpack.c.l.bf16 %v550_v19  ;;  %v1203_v27 = vunpack.c.h.bf16 %v550_v19  ;;  %v1200_v28 = vunpack.c.l.bf16 %v549_v22  ;;  %v1201_v29 = vunpack.c.h.bf16 %v549_v22 }
  0xcd   : > { %v1279_v23 = vadd.f32 %v1195_v17, %v1194_v16  ;;  %v2328_v16 = vor.u32 %v2483_v10, %v2325_v11  ;;  %v1125_v10 = vld [vmem:[#allocation3 + $0x28] sm:$0xff]  ;;  %v1127_v11 = vld [vmem:[#allocation3 + $0x38] sm:$0xff] }
  0xce   : > { %1262 = vadd.xlane.f32.xlu0 %v1261_v51  ;;  %v1288_v40 = vadd.f32 %v1201_v29, %v1200_v28  ;;  %v1209_v51 = vunpack.c.h.bf16 %v553_v46 }
  0xd4   : > { %1259 = vadd.xlane.f32.xlu2 %v1258_v48  ;;  %1265 = vadd.xlane.f32.xlu1 %v1264_v49  ;;  %v1204_v48 = vunpack.c.l.bf16 %v551_v45  ;;  %v1205_v49 = vunpack.c.h.bf16 %v551_v45 }
  0xd6   : > { %1271 = vadd.xlane.f32.xlu0 %v1270_v4  ;;  %v2323_v4 = vld [vmem:[%s2923_s21 + $0xf0] sm:$0xf] }
  0xd9   : > { %900 = vmatmul.bf16.gmra.mxu0 %v2228_v61  ;;  %940 = vmatmul.bf16.gmra.mxu2 %v2292_v62  ;;  %v2480_v61 = vld [vmem:[%s2923_s21 + $0xd4] sm:$0xf0]  ;;  %v2463_v62 = vld [vmem:[%s2923_s21 + $0x54] sm:$0xf] }
  0xda   : > { %989 = vmatmul.bf16.gmra.mxu1 %v2232_v63  ;;  %1029 = vmatmul.bf16.gmra.mxu3 %v2296_v0  ;;  %v1267_v63 = vadd.f32 %v1187_v53, %v1186_v52  ;;  %v1273_v0 = vadd.f32 %v1191_v55, %v1190_v54  ;;  %v2308_v6 = vor.u32 %v2480_v61, %v2307_v60  ;;  %v1206_v52 = vunpack.c.l.bf16 %v552_v47 }
  0xdb   : > { %v2248_v7 = vor.u32 %v2463_v62, %v2245_v1  ;;  %v1207_v53 = vunpack.c.h.bf16 %v552_v47  ;;  %v1294_v54 = vadd.f32 %v1205_v49, %v1204_v48  ;;  %v1300_v55 = vadd.f32 %v1209_v51, %v1208_v50  ;;  %v2468_v1 = vld [vmem:[%s2923_s21 + $0x74] sm:$0xf0]  ;;  %v575_v49 = vld [vmem:[#allocation2 + $0x90] sm:$0xff] }
  0xdc   : > { %1268 = vadd.xlane.f32.xlu2 %v1267_v63  ;;  %1274 = vadd.xlane.f32.xlu1 %v1273_v0  ;;  %v1210_v60 = vunpack.c.l.bf16 %v554_v57  ;;  %v1211_v61 = vunpack.c.h.bf16 %v554_v57  ;;  %v1214_v62 = vunpack.c.l.bf16 %v556_v58  ;;  %v1215_v63 = vunpack.c.h.bf16 %v556_v58  ;;  %v2259_v0 = vld [vmem:[%s2923_s21 + $0x70] sm:$0xf] }
  0xdd   : > { %v1297_v56 = vadd.f32 %v1207_v53, %v1206_v52  ;;  %v2260_v13 = vor.u32 %v2468_v1, %v2259_v0  ;;  %v560_v53 = vld [vmem:[#allocation2 + $0x18] sm:$0xff] }
  0xde   : > { %1280 = vadd.xlane.f32.xlu0 %v1279_v23  ;;  %v573_v23 = vld [vmem:[#allocation2 + $0x80] sm:$0xff] }
  0xe4   : > { %1277 = vadd.xlane.f32.xlu2 %v1276_v20  ;;  %1283 = vadd.xlane.f32.xlu1 %v1282_v21 }
  0xe6   : > { %1289 = vadd.xlane.f32.xlu0 %v1288_v40 }
  0xe9   : > { %905 = vmatmul.bf16.gmra.mxu0 %v2236_v33  ;;  %945 = vmatmul.bf16.gmra.mxu2 %v2300_v34  ;;  %v2482_v33 = vld [vmem:[%s2923_s21 + $0xe4] sm:$0xf0]  ;;  %v2465_v34 = vld [vmem:[%s2923_s21 + $0x64] sm:$0xf] }
  0xea   : > { %994 = vmatmul.bf16.gmra.mxu1 %v2240_v35  ;;  %1034 = vmatmul.bf16.gmra.mxu3 %v2304_v36  ;;  %v1285_v35 = vadd.f32 %v1199_v25, %v1198_v24  ;;  %v1291_v36 = vadd.f32 %v1203_v27, %v1202_v26  ;;  %v2316_v42 = vor.u32 %v2482_v33, %v2315_v32  ;;  %v558_v27 = vld [vmem:[#allocation2 + $0x8] sm:$0xff] }
  0xeb   : > { %v2256_v43 = vor.u32 %v2465_v34, %v2253_v37  ;;  %v574_v33 = vld [vmem:[#allocation2 + $0x88] sm:$0xff]  ;;  %v559_v37 = vld [vmem:[#allocation2 + $0x10] sm:$0xff] }
  0xec   : > { %1286 = vadd.xlane.f32.xlu2 %v1285_v35  ;;  %1292 = vadd.xlane.f32.xlu1 %v1291_v36 }
  0xee   : > { %1298 = vadd.xlane.f32.xlu0 %v1297_v56  ;;  %v1123_v56 = vld [vmem:[#allocation3 + $0x18] sm:$0xff] }
  0xf4   : > { %1295 = vadd.xlane.f32.xlu2 %v1294_v54  ;;  %1301 = vadd.xlane.f32.xlu1 %v1300_v55  ;;  %v1124_v55 = vld [vmem:[#allocation3 + $0x20] sm:$0xff] }
  0xf6   : > { %1307 = vadd.xlane.f32.xlu0 %v1306_v12 }
  0xf9   : > { %910 = vmatmul.bf16.gmra.mxu0 %v2244_v5  ;;  %950 = vmatmul.bf16.gmra.mxu2 %v2308_v6  ;;  %v2484_v5 = vld [vmem:[%s2923_s21 + $0xf4] sm:$0xf0]  ;;  %v2467_v6 = vld [vmem:[%s2923_s21 + $0x74] sm:$0xf] }
  0xfa   : > { %999 = vmatmul.bf16.gmra.mxu1 %v2248_v7  ;;  %1039 = vmatmul.bf16.gmra.mxu3 %v2312_v8  ;;  %v1303_v7 = vadd.f32 %v1211_v61, %v1210_v60  ;;  %v1309_v8 = vadd.f32 %v1215_v63, %v1214_v62  ;;  %v2324_v14 = vor.u32 %v2484_v5, %v2323_v4  ;;  %v576_v4 = vld [vmem:[#allocation2 + $0x98] sm:$0xff] }
  0xfb   : > { %v2264_v15 = vor.u32 %v2467_v6, %v2261_v9 }
  0xfc   : > { %1304 = vadd.xlane.f32.xlu2 %v1303_v7  ;;  %1310 = vadd.xlane.f32.xlu1 %v1309_v8  ;;  %v561_v8 = vld [vmem:[#allocation2 + $0x20] sm:$0xff] }
 0x109   : > { %915 = vmatmul.bf16.gmra.mxu0 %v2252_v41  ;;  %955 = vmatmul.bf16.gmra.mxu2 %v2316_v42  ;;  %v1120_v41 = vld [vmem:[#allocation3] sm:$0xff] }
 0x10a   : > { %1004 = vmatmul.bf16.gmra.mxu1 %v2256_v43  ;;  %1044 = vmatmul.bf16.gmra.mxu3 %v2320_v44 }
 0x10b   : > { %v1218_v45 = vpop.xlane.xlu0 %1217 }
 0x10c   : > { %v1224_v40 = vpop.xlane.xlu1 %1223  ;;  %v1312_v46 = vadd.f32 %v1218_v45, %v1120_v41 }
 0x10d   : > { %v1314_v44 = vadd.f32 %v1224_v40, %v1122_v39 }
 0x10e   : > { %1345 = vst.msk [vmem:[#allocation3] sm:$0xff] %vm1344_vm3, %v1312_v46  ;;  %v563_v46 = vld [vmem:[#allocation2 + $0x30] sm:$0xff] }
 0x10f   : > { %1347 = vst.msk [vmem:[#allocation3 + $0x10] sm:$0xff] %vm1344_vm3, %v1314_v44  ;;  %v1230_v60 = vpop.xlane.xlu2 %1229 }
 0x110   : > { %v1316_v63 = vadd.f32 %v1230_v60, %v1124_v55 }
 0x112   : > { %1349 = vst.msk [vmem:[#allocation3 + $0x20] sm:$0xff] %vm1344_vm3, %v1316_v63 }
 0x113   : > { %v1221_v1 = vpop.xlane.xlu0 %1220 }
 0x114   : > { %v1227_v61 = vpop.xlane.xlu1 %1226  ;;  %v1313_v2 = vadd.f32 %v1221_v1, %v1121_v59  ;;  %v564_v1 = vld [vmem:[#allocation2 + $0x38] sm:$0xff] }
 0x115   : > { %v1315_v0 = vadd.f32 %v1227_v61, %v1123_v56  ;;  %v579_v61 = vld [vmem:[#allocation2 + $0xb0] sm:$0xff] }
 0x116   : > { %1346 = vst.msk [vmem:[#allocation3 + $0x8] sm:$0xff] %vm1344_vm3, %v1313_v2 }
 0x117   : > { %1348 = vst.msk [vmem:[#allocation3 + $0x18] sm:$0xff] %vm1344_vm3, %v1315_v0 }
 0x119   : > { %920 = vmatmul.bf16.gmra.mxu0 %v2260_v13  ;;  %960 = vmatmul.bf16.gmra.mxu2 %v2324_v14  ;;  %v1126_v14 = vld [vmem:[#allocation3 + $0x30] sm:$0xff] }
 0x11a   : > { %1009 = vmatmul.bf16.gmra.mxu1 %v2264_v15  ;;  %1049 = vmatmul.bf16.gmra.mxu3 %v2328_v16 }
 0x11b   : > { %v1233_v15 = vpop.xlane.xlu2 %1232 }
 0x11e   : > { %v1239_v16 = vpop.xlane.xlu1 %1238 }
 0x126   : > { %v886_v17 = vpop.f32.mrf.mxu0 }
 0x127   : > { %v975_v19 = vpop.f32.mrf.mxu1 }
 0x128   : > { %v976_v20 = vadd.f32 %v975_v19, %v886_v17  ;;  %v1319_v19 = vadd.f32 %v1239_v16, %v1127_v11  ;;  %v580_v16 = vld [vmem:[#allocation2 + $0xb8] sm:$0xff] }
 0x12a   : > { %v1055_v21 = vadd.f32 %v976_v20, %v557_v18  ;;  %v1317_v18 = vadd.f32 %v1233_v15, %v1125_v10  ;;  %v1236_v20 = vpop.xlane.xlu0 %1235  ;;  %1352 = vst.msk [vmem:[#allocation3 + $0x38] sm:$0xff] %vm1344_vm3, %v1319_v19 }
 0x12c   : > { %1088 = vst.msk [vmem:[#allocation2] sm:$0xff] %vm1087_vm2, %v1055_v21  ;;  %v926_v22 = vpop.f32.mrf.mxu2  ;;  %v1318_v21 = vadd.f32 %v1236_v20, %v1126_v14  ;;  %v565_v20 = vld [vmem:[#allocation2 + $0x40] sm:$0xff] }
 0x12d   : > { %v1015_v24 = vpop.f32.mrf.mxu3  ;;  %1350 = vst.msk [vmem:[#allocation3 + $0x28] sm:$0xff] %vm1344_vm3, %v1317_v18 }
 0x12e   : > { %v1016_v25 = vadd.f32 %v1015_v24, %v926_v22  ;;  %v888_v26 = vpop.f32.mrf.mxu0  ;;  %1351 = vst.msk [vmem:[#allocation3 + $0x30] sm:$0xff] %vm1344_vm3, %v1318_v21 }
 0x12f   : > { %v977_v28 = vpop.f32.mrf.mxu1 }
 0x130   : > { %v1071_v29 = vadd.f32 %v1016_v25, %v573_v23  ;;  %v978_v30 = vadd.f32 %v977_v28, %v888_v26  ;;  %v577_v23 = vld [vmem:[#allocation2 + $0xa0] sm:$0xff] }
 0x132   : > { %1104 = vst.msk [vmem:[#allocation2 + $0x80] sm:$0xff] %vm1087_vm2, %v1071_v29  ;;  %v1056_v31 = vadd.f32 %v978_v30, %v558_v27  ;;  %v562_v27 = vld [vmem:[#allocation2 + $0x28] sm:$0xff]  ;;  %v1128_v29 = vld [vmem:[#allocation3 + $0x40] sm:$0xff]  ;;  %v1130_v30 = vld [vmem:[#allocation3 + $0x50] sm:$0xff]  ;;  %v1245_v39 = vpop.xlane.xlu0 %1244 }
 0x134   : > { %1089 = vst.msk [vmem:[#allocation2 + $0x8] sm:$0xff] %vm1087_vm2, %v1056_v31  ;;  %v928_v32 = vpop.f32.mrf.mxu2 }
 0x135   : > { %v1017_v34 = vpop.f32.mrf.mxu3 }
 0x136   : > { %v1018_v35 = vadd.f32 %v1017_v34, %v928_v32  ;;  %v891_v36 = vpop.f32.mrf.mxu0  ;;  %v1242_v34 = vpop.xlane.xlu2 %1241 }
 0x137   : > { %v980_v38 = vpop.f32.mrf.mxu1 }
 0x138   : > { %v1072_v42 = vadd.f32 %v1018_v35, %v574_v33  ;;  %v981_v43 = vadd.f32 %v980_v38, %v891_v36  ;;  %v1129_v33 = vld [vmem:[#allocation3 + $0x48] sm:$0xff]  ;;  %v1248_v35 = vpop.xlane.xlu1 %1247 }
 0x139   : > { %v1322_v38 = vadd.f32 %v1248_v35, %v1130_v30  ;;  %v1321_v40 = vadd.f32 %v1245_v39, %v1129_v33  ;;  %v581_v35 = vld [vmem:[#allocation2 + $0xc0] sm:$0xff]  ;;  %v566_v39 = vld [vmem:[#allocation2 + $0x48] sm:$0xff] }
 0x13a   : > { %1105 = vst.msk [vmem:[#allocation2 + $0x88] sm:$0xff] %vm1087_vm2, %v1072_v42  ;;  %v1057_v47 = vadd.f32 %v981_v43, %v559_v37  ;;  %v1320_v37 = vadd.f32 %v1242_v34, %v1128_v29  ;;  %v578_v42 = vld [vmem:[#allocation2 + $0xa8] sm:$0xff] }
 0x13b   : > { %1355 = vst.msk [vmem:[#allocation3 + $0x50] sm:$0xff] %vm1344_vm3, %v1322_v38 }
 0x13c   : > { %1090 = vst.msk [vmem:[#allocation2 + $0x10] sm:$0xff] %vm1087_vm2, %v1057_v47  ;;  %v931_v48 = vpop.f32.mrf.mxu2 }
 0x13d   : > { %v1020_v50 = vpop.f32.mrf.mxu3  ;;  %1353 = vst.msk [vmem:[#allocation3 + $0x40] sm:$0xff] %vm1344_vm3, %v1320_v37 }
 0x13e   : > { %v1021_v51 = vadd.f32 %v1020_v50, %v931_v48  ;;  %v893_v52 = vpop.f32.mrf.mxu0  ;;  %1354 = vst.msk [vmem:[#allocation3 + $0x48] sm:$0xff] %vm1344_vm3, %v1321_v40  ;;  %v1131_v48 = vld [vmem:[#allocation3 + $0x58] sm:$0xff] }
 0x13f   : > { %v982_v54 = vpop.f32.mrf.mxu1 }
 0x140   : > { %v1073_v57 = vadd.f32 %v1021_v51, %v575_v49  ;;  %v983_v58 = vadd.f32 %v982_v54, %v893_v52  ;;  %v1133_v49 = vld [vmem:[#allocation3 + $0x68] sm:$0xff]  ;;  %v1132_v52 = vld [vmem:[#allocation3 + $0x60] sm:$0xff]  ;;  %v1257_v54 = vpop.xlane.xlu1 %1256 }
 0x142   : > { %1106 = vst.msk [vmem:[#allocation2 + $0x90] sm:$0xff] %vm1087_vm2, %v1073_v57  ;;  %v1058_v62 = vadd.f32 %v983_v58, %v560_v53  ;;  %v1251_v53 = vpop.xlane.xlu2 %1250  ;;  %v1325_v57 = vadd.f32 %v1257_v54, %v1133_v49  ;;  %v1254_v58 = vpop.xlane.xlu0 %1253  ;;  %v582_v54 = vld [vmem:[#allocation2 + $0xc8] sm:$0xff] }
 0x143   : > { %v1323_v56 = vadd.f32 %v1251_v53, %v1131_v48  ;;  %v1324_v59 = vadd.f32 %v1254_v58, %v1132_v52  ;;  %v567_v58 = vld [vmem:[#allocation2 + $0x50] sm:$0xff] }
 0x144   : > { %1091 = vst.msk [vmem:[#allocation2 + $0x18] sm:$0xff] %vm1087_vm2, %v1058_v62  ;;  %v933_v3 = vpop.f32.mrf.mxu2 }
 0x145   : > { %v1022_v5 = vpop.f32.mrf.mxu3  ;;  %1356 = vst.msk [vmem:[#allocation3 + $0x58] sm:$0xff] %vm1344_vm3, %v1323_v56 }
 0x146   : > { %v1023_v6 = vadd.f32 %v1022_v5, %v933_v3  ;;  %v896_v7 = vpop.f32.mrf.mxu0  ;;  %1358 = vst.msk [vmem:[#allocation3 + $0x68] sm:$0xff] %vm1344_vm3, %v1325_v57  ;;  %v1134_v3 = vld [vmem:[#allocation3 + $0x70] sm:$0xff] }
 0x147   : > { %v985_v9 = vpop.f32.mrf.mxu1  ;;  %1357 = vst.msk [vmem:[#allocation3 + $0x60] sm:$0xff] %vm1344_vm3, %v1324_v59 }
 0x148   : > { %v1074_v12 = vadd.f32 %v1023_v6, %v576_v4  ;;  %v986_v13 = vadd.f32 %v985_v9, %v896_v7  ;;  %v1136_v4 = vld [vmem:[#allocation3 + $0x80] sm:$0xff]  ;;  %v1135_v7 = vld [vmem:[#allocation3 + $0x78] sm:$0xff]  ;;  %v1266_v9 = vpop.xlane.xlu1 %1265 }
 0x14a   : > { %1107 = vst.msk [vmem:[#allocation2 + $0x98] sm:$0xff] %vm1087_vm2, %v1074_v12  ;;  %v1059_v17 = vadd.f32 %v986_v13, %v561_v8  ;;  %v1260_v8 = vpop.xlane.xlu2 %1259  ;;  %v1328_v12 = vadd.f32 %v1266_v9, %v1136_v4  ;;  %v1263_v13 = vpop.xlane.xlu0 %1262  ;;  %v583_v9 = vld [vmem:[#allocation2 + $0xd0] sm:$0xff] }
 0x14b   : > { %v1326_v11 = vadd.f32 %v1260_v8, %v1134_v3  ;;  %v1327_v14 = vadd.f32 %v1263_v13, %v1135_v7  ;;  %v568_v13 = vld [vmem:[#allocation2 + $0x58] sm:$0xff] }
 0x14c   : > { %1092 = vst.msk [vmem:[#allocation2 + $0x20] sm:$0xff] %vm1087_vm2, %v1059_v17  ;;  %v936_v22 = vpop.f32.mrf.mxu2 }
 0x14d   : > { %v1025_v24 = vpop.f32.mrf.mxu3  ;;  %1359 = vst.msk [vmem:[#allocation3 + $0x70] sm:$0xff] %vm1344_vm3, %v1326_v11 }
 0x14e   : > { %v1026_v25 = vadd.f32 %v1025_v24, %v936_v22  ;;  %v898_v26 = vpop.f32.mrf.mxu0  ;;  %1361 = vst.msk [vmem:[#allocation3 + $0x80] sm:$0xff] %vm1344_vm3, %v1328_v12  ;;  %v1137_v22 = vld [vmem:[#allocation3 + $0x88] sm:$0xff] }
 0x14f   : > { %v987_v28 = vpop.f32.mrf.mxu1  ;;  %1360 = vst.msk [vmem:[#allocation3 + $0x78] sm:$0xff] %vm1344_vm3, %v1327_v14 }
 0x150   : > { %v1075_v31 = vadd.f32 %v1026_v25, %v577_v23  ;;  %v988_v32 = vadd.f32 %v987_v28, %v898_v26  ;;  %v1139_v23 = vld [vmem:[#allocation3 + $0x98] sm:$0xff]  ;;  %v1138_v26 = vld [vmem:[#allocation3 + $0x90] sm:$0xff]  ;;  %v1275_v28 = vpop.xlane.xlu1 %1274 }
 0x152   : > { %1108 = vst.msk [vmem:[#allocation2 + $0xa0] sm:$0xff] %vm1087_vm2, %v1075_v31  ;;  %v1060_v36 = vadd.f32 %v988_v32, %v562_v27  ;;  %v1269_v27 = vpop.xlane.xlu2 %1268  ;;  %v1331_v31 = vadd.f32 %v1275_v28, %v1139_v23  ;;  %v1272_v32 = vpop.xlane.xlu0 %1271  ;;  %v584_v28 = vld [vmem:[#allocation2 + $0xd8] sm:$0xff] }
 0x153   : > { %v1329_v30 = vadd.f32 %v1269_v27, %v1137_v22  ;;  %v1330_v33 = vadd.f32 %v1272_v32, %v1138_v26  ;;  %v569_v32 = vld [vmem:[#allocation2 + $0x60] sm:$0xff] }
 0x154   : > { %1093 = vst.msk [vmem:[#allocation2 + $0x28] sm:$0xff] %vm1087_vm2, %v1060_v36  ;;  %v938_v41 = vpop.f32.mrf.mxu2 }
 0x155   : > { %v1027_v43 = vpop.f32.mrf.mxu3  ;;  %1362 = vst.msk [vmem:[#allocation3 + $0x88] sm:$0xff] %vm1344_vm3, %v1329_v30 }
 0x156   : > { %v1028_v44 = vadd.f32 %v1027_v43, %v938_v41  ;;  %v901_v45 = vpop.f32.mrf.mxu0  ;;  %1364 = vst.msk [vmem:[#allocation3 + $0x98] sm:$0xff] %vm1344_vm3, %v1331_v31  ;;  %v1140_v41 = vld [vmem:[#allocation3 + $0xa0] sm:$0xff] }
 0x157   : > { %v990_v47 = vpop.f32.mrf.mxu1  ;;  %1363 = vst.msk [vmem:[#allocation3 + $0x90] sm:$0xff] %vm1344_vm3, %v1330_v33 }
 0x158   : > { %v1076_v50 = vadd.f32 %v1028_v44, %v578_v42  ;;  %v991_v51 = vadd.f32 %v990_v47, %v901_v45  ;;  %v1142_v42 = vld [vmem:[#allocation3 + $0xb0] sm:$0xff]  ;;  %v1141_v45 = vld [vmem:[#allocation3 + $0xa8] sm:$0xff]  ;;  %v1284_v47 = vpop.xlane.xlu1 %1283 }
 0x15a   : > { %1109 = vst.msk [vmem:[#allocation2 + $0xa8] sm:$0xff] %vm1087_vm2, %v1076_v50  ;;  %v1061_v55 = vadd.f32 %v991_v51, %v563_v46  ;;  %v1278_v46 = vpop.xlane.xlu2 %1277  ;;  %v1334_v50 = vadd.f32 %v1284_v47, %v1142_v42  ;;  %v1281_v51 = vpop.xlane.xlu0 %1280  ;;  %v585_v47 = vld [vmem:[#allocation2 + $0xe0] sm:$0xff] }
 0x15b   : > { %v1332_v49 = vadd.f32 %v1278_v46, %v1140_v41  ;;  %v1333_v52 = vadd.f32 %v1281_v51, %v1141_v45  ;;  %v570_v51 = vld [vmem:[#allocation2 + $0x68] sm:$0xff] }
 0x15c   : > { %1094 = vst.msk [vmem:[#allocation2 + $0x30] sm:$0xff] %vm1087_vm2, %v1061_v55  ;;  %v941_v60 = vpop.f32.mrf.mxu2 }
 0x15d   : > { %v1030_v62 = vpop.f32.mrf.mxu3  ;;  %1365 = vst.msk [vmem:[#allocation3 + $0xa0] sm:$0xff] %vm1344_vm3, %v1332_v49 }
 0x15e   : > { %v1031_v63 = vadd.f32 %v1030_v62, %v941_v60  ;;  %v903_v0 = vpop.f32.mrf.mxu0  ;;  %1367 = vst.msk [vmem:[#allocation3 + $0xb0] sm:$0xff] %vm1344_vm3, %v1334_v50  ;;  %v1143_v60 = vld [vmem:[#allocation3 + $0xb8] sm:$0xff] }
 0x15f   : > { %v992_v2 = vpop.f32.mrf.mxu1  ;;  %1366 = vst.msk [vmem:[#allocation3 + $0xa8] sm:$0xff] %vm1344_vm3, %v1333_v52 }
 0x160   : > { %v1077_v5 = vadd.f32 %v1031_v63, %v579_v61  ;;  %v993_v6 = vadd.f32 %v992_v2, %v903_v0  ;;  %v1145_v61 = vld [vmem:[#allocation3 + $0xc8] sm:$0xff]  ;;  %v1144_v0 = vld [vmem:[#allocation3 + $0xc0] sm:$0xff]  ;;  %v1293_v2 = vpop.xlane.xlu1 %1292 }
 0x162   : > { %1110 = vst.msk [vmem:[#allocation2 + $0xb0] sm:$0xff] %vm1087_vm2, %v1077_v5  ;;  %v1062_v10 = vadd.f32 %v993_v6, %v564_v1  ;;  %v1287_v1 = vpop.xlane.xlu2 %1286  ;;  %v1337_v5 = vadd.f32 %v1293_v2, %v1145_v61  ;;  %v1290_v6 = vpop.xlane.xlu0 %1289  ;;  %v571_v61 = vld [vmem:[#allocation2 + $0x70] sm:$0xff] }
 0x163   : > { %v1335_v4 = vadd.f32 %v1287_v1, %v1143_v60  ;;  %v1336_v7 = vadd.f32 %v1290_v6, %v1144_v0 }
 0x164   : > { %1095 = vst.msk [vmem:[#allocation2 + $0x38] sm:$0xff] %vm1087_vm2, %v1062_v10  ;;  %v943_v15 = vpop.f32.mrf.mxu2 }
 0x165   : > { %v1032_v17 = vpop.f32.mrf.mxu3  ;;  %1368 = vst.msk [vmem:[#allocation3 + $0xb8] sm:$0xff] %vm1344_vm3, %v1335_v4 }
 0x166   : > { %v1033_v18 = vadd.f32 %v1032_v17, %v943_v15  ;;  %v906_v19 = vpop.f32.mrf.mxu0  ;;  %1370 = vst.msk [vmem:[#allocation3 + $0xc8] sm:$0xff] %vm1344_vm3, %v1337_v5  ;;  %v1146_v15 = vld [vmem:[#allocation3 + $0xd0] sm:$0xff] }
 0x167   : > { %v995_v21 = vpop.f32.mrf.mxu1  ;;  %1369 = vst.msk [vmem:[#allocation3 + $0xc0] sm:$0xff] %vm1344_vm3, %v1336_v7  ;;  %v572_v7 = vld [vmem:[#allocation2 + $0x78] sm:$0xff] }
 0x168   : > { %v1078_v24 = vadd.f32 %v1033_v18, %v580_v16  ;;  %v996_v25 = vadd.f32 %v995_v21, %v906_v19  ;;  %v1148_v16 = vld [vmem:[#allocation3 + $0xe0] sm:$0xff]  ;;  %v1147_v19 = vld [vmem:[#allocation3 + $0xd8] sm:$0xff]  ;;  %v1302_v21 = vpop.xlane.xlu1 %1301 }
 0x16a   : > { %1111 = vst.msk [vmem:[#allocation2 + $0xb8] sm:$0xff] %vm1087_vm2, %v1078_v24  ;;  %v1063_v29 = vadd.f32 %v996_v25, %v565_v20  ;;  %v1296_v20 = vpop.xlane.xlu2 %1295  ;;  %v1340_v24 = vadd.f32 %v1302_v21, %v1148_v16  ;;  %v1299_v25 = vpop.xlane.xlu0 %1298 }
 0x16b   : > { %v1338_v23 = vadd.f32 %v1296_v20, %v1146_v15  ;;  %v1339_v26 = vadd.f32 %v1299_v25, %v1147_v19 }
 0x16c   : > { %1096 = vst.msk [vmem:[#allocation2 + $0x40] sm:$0xff] %vm1087_vm2, %v1063_v29  ;;  %v946_v34 = vpop.f32.mrf.mxu2 }
 0x16d   : > { %v1035_v36 = vpop.f32.mrf.mxu3  ;;  %1371 = vst.msk [vmem:[#allocation3 + $0xd0] sm:$0xff] %vm1344_vm3, %v1338_v23 }
 0x16e   : > { %v1036_v37 = vadd.f32 %v1035_v36, %v946_v34  ;;  %v908_v38 = vpop.f32.mrf.mxu0  ;;  %1373 = vst.msk [vmem:[#allocation3 + $0xe0] sm:$0xff] %vm1344_vm3, %v1340_v24  ;;  %v1149_v34 = vld [vmem:[#allocation3 + $0xe8] sm:$0xff] }
 0x16f   : > { %v997_v40 = vpop.f32.mrf.mxu1  ;;  %1372 = vst.msk [vmem:[#allocation3 + $0xd8] sm:$0xff] %vm1344_vm3, %v1339_v26 }
 0x170   : > { %v1079_v43 = vadd.f32 %v1036_v37, %v581_v35  ;;  %v998_v44 = vadd.f32 %v997_v40, %v908_v38  ;;  %v1151_v35 = vld [vmem:[#allocation3 + $0xf8] sm:$0xff]  ;;  %v1150_v38 = vld [vmem:[#allocation3 + $0xf0] sm:$0xff]  ;;  %v1311_v40 = vpop.xlane.xlu1 %1310 }
 0x172   : > { %1112 = vst.msk [vmem:[#allocation2 + $0xc0] sm:$0xff] %vm1087_vm2, %v1079_v43  ;;  %v1064_v48 = vadd.f32 %v998_v44, %v566_v39  ;;  %v1305_v39 = vpop.xlane.xlu2 %1304  ;;  %v1343_v43 = vadd.f32 %v1311_v40, %v1151_v35  ;;  %v1308_v44 = vpop.xlane.xlu0 %1307 }
 0x173   : > { %v1341_v42 = vadd.f32 %v1305_v39, %v1149_v34  ;;  %v1342_v45 = vadd.f32 %v1308_v44, %v1150_v38 }
 0x174   : > { %1097 = vst.msk [vmem:[#allocation2 + $0x48] sm:$0xff] %vm1087_vm2, %v1064_v48  ;;  %v948_v53 = vpop.f32.mrf.mxu2 }
 0x175   : > { %v1037_v55 = vpop.f32.mrf.mxu3  ;;  %1374 = vst.msk [vmem:[#allocation3 + $0xe8] sm:$0xff] %vm1344_vm3, %v1341_v42 }
 0x176   : > { %v1038_v56 = vadd.f32 %v1037_v55, %v948_v53  ;;  %v911_v57 = vpop.f32.mrf.mxu0  ;;  %1376 = vst.msk [vmem:[#allocation3 + $0xf8] sm:$0xff] %vm1344_vm3, %v1343_v43 }
 0x177   : > { %v1000_v59 = vpop.f32.mrf.mxu1  ;;  %1375 = vst.msk [vmem:[#allocation3 + $0xf0] sm:$0xff] %vm1344_vm3, %v1342_v45 }
 0x178   : > { %v1080_v62 = vadd.f32 %v1038_v56, %v582_v54  ;;  %v1001_v63 = vadd.f32 %v1000_v59, %v911_v57  ;;  %v586_v57 = vld [vmem:[#allocation2 + $0xe8] sm:$0xff] }
 0x17a   : > { %1113 = vst.msk [vmem:[#allocation2 + $0xc8] sm:$0xff] %vm1087_vm2, %v1080_v62  ;;  %v1065_v3 = vadd.f32 %v1001_v63, %v567_v58 }
 0x17c   : > { %1098 = vst.msk [vmem:[#allocation2 + $0x50] sm:$0xff] %vm1087_vm2, %v1065_v3  ;;  %v951_v8 = vpop.f32.mrf.mxu2  ;;  %v587_v3 = vld [vmem:[#allocation2 + $0xf0] sm:$0xff] }
 0x17d   : > { %v1040_v10 = vpop.f32.mrf.mxu3 }
 0x17e   : > { %v1041_v11 = vadd.f32 %v1040_v10, %v951_v8  ;;  %v913_v12 = vpop.f32.mrf.mxu0 }
 0x17f   : > { %v1002_v14 = vpop.f32.mrf.mxu1 }
 0x180   : > { %v1081_v17 = vadd.f32 %v1041_v11, %v583_v9  ;;  %v1003_v18 = vadd.f32 %v1002_v14, %v913_v12 }
 0x182   : > { %1114 = vst.msk [vmem:[#allocation2 + $0xd0] sm:$0xff] %vm1087_vm2, %v1081_v17  ;;  %v1066_v22 = vadd.f32 %v1003_v18, %v568_v13  ;;  %v588_v13 = vld [vmem:[#allocation2 + $0xf8] sm:$0xff] }
 0x184   : > { %1099 = vst.msk [vmem:[#allocation2 + $0x58] sm:$0xff] %vm1087_vm2, %v1066_v22  ;;  %v953_v27 = vpop.f32.mrf.mxu2 }
 0x185   : > { %v1042_v29 = vpop.f32.mrf.mxu3 }
 0x186   : > { %v1043_v30 = vadd.f32 %v1042_v29, %v953_v27  ;;  %v916_v31 = vpop.f32.mrf.mxu0 }
 0x187   : > { %v1005_v33 = vpop.f32.mrf.mxu1 }
 0x188   : > { %v1082_v36 = vadd.f32 %v1043_v30, %v584_v28  ;;  %v1006_v37 = vadd.f32 %v1005_v33, %v916_v31 }
 0x18a   : > { %1115 = vst.msk [vmem:[#allocation2 + $0xd8] sm:$0xff] %vm1087_vm2, %v1082_v36  ;;  %v1067_v41 = vadd.f32 %v1006_v37, %v569_v32 }
 0x18c   : > { %1100 = vst.msk [vmem:[#allocation2 + $0x60] sm:$0xff] %vm1087_vm2, %v1067_v41  ;;  %v956_v46 = vpop.f32.mrf.mxu2 }
 0x18d   : > { %v1045_v48 = vpop.f32.mrf.mxu3 }
 0x18e   : > { %v1046_v49 = vadd.f32 %v1045_v48, %v956_v46  ;;  %v918_v50 = vpop.f32.mrf.mxu0 }
 0x18f   : > { %v1007_v52 = vpop.f32.mrf.mxu1 }
 0x190   : > { %v1083_v53 = vadd.f32 %v1046_v49, %v585_v47  ;;  %v1008_v54 = vadd.f32 %v1007_v52, %v918_v50 }
 0x192   : > { %1116 = vst.msk [vmem:[#allocation2 + $0xe0] sm:$0xff] %vm1087_vm2, %v1083_v53  ;;  %v1068_v55 = vadd.f32 %v1008_v54, %v570_v51 }
 0x194   : > { %1101 = vst.msk [vmem:[#allocation2 + $0x68] sm:$0xff] %vm1087_vm2, %v1068_v55  ;;  %v958_v56 = vpop.f32.mrf.mxu2 }
 0x195   : > { %v1047_v58 = vpop.f32.mrf.mxu3 }
 0x196   : > { %v1048_v59 = vadd.f32 %v1047_v58, %v958_v56  ;;  %v921_v60 = vpop.f32.mrf.mxu0 }
 0x197   : > { %v1010_v62 = vpop.f32.mrf.mxu1 }
 0x198   : > { %v1084_v63 = vadd.f32 %v1048_v59, %v586_v57  ;;  %v1011_v0 = vadd.f32 %v1010_v62, %v921_v60 }
 0x19a   : > { %1117 = vst.msk [vmem:[#allocation2 + $0xe8] sm:$0xff] %vm1087_vm2, %v1084_v63  ;;  %v1069_v1 = vadd.f32 %v1011_v0, %v571_v61 }
 0x19c   : > { %1102 = vst.msk [vmem:[#allocation2 + $0x70] sm:$0xff] %vm1087_vm2, %v1069_v1  ;;  %v961_v2 = vpop.f32.mrf.mxu2 }
 0x19d   : > { %v1050_v4 = vpop.f32.mrf.mxu3 }
 0x19e   : > { %v1051_v5 = vadd.f32 %v1050_v4, %v961_v2  ;;  %v923_v6 = vpop.f32.mrf.mxu0 }
 0x19f   : > { %v1012_v8 = vpop.f32.mrf.mxu1 }
 0x1a0   : > { %v1085_v9 = vadd.f32 %v1051_v5, %v587_v3  ;;  %v1013_v10 = vadd.f32 %v1012_v8, %v923_v6 }
 0x1a2   : > { %1118 = vst.msk [vmem:[#allocation2 + $0xf0] sm:$0xff] %vm1087_vm2, %v1085_v9  ;;  %v1070_v11 = vadd.f32 %v1013_v10, %v572_v7 }
 0x1a4   : > { %1103 = vst.msk [vmem:[#allocation2 + $0x78] sm:$0xff] %vm1087_vm2, %v1070_v11  ;;  %v963_v12 = vpop.f32.mrf.mxu2 }
 0x1a5   : > { %v1052_v14 = vpop.f32.mrf.mxu3 }
 0x1a6   : > { %v1053_v15 = vadd.f32 %v1052_v14, %v963_v12  ;;  %1380 = sbr.rel (%p2393_p13) target bundleno = 961 (0x3c1), region = 90 }
 0x1a8   : > { %v1086_v16 = vadd.f32 %v1053_v15, %v588_v13 }
 0x1aa   : > { %1119 = vst.msk [vmem:[#allocation2 + $0xf8] sm:$0xff] %vm1087_vm2, %v1086_v16 }
 0x1ab   : > { %v2502_v17 = vld [vmem:[%s3421_s2 + $0x8] sm:$0xff]  ;;  %v2744_v18 = vmov 0   ;;  %v1449_v19 = vld [vmem:[#allocation3 + $0x80] sm:$0xff]  ;;  %v1399_v24 = vld [vmem:[#allocation2 + $0x90] sm:$0xff]  ;;  %vm1894_vm4 = vcmask 523264  }
 0x1ac   : > { %2683 = vset.pattern.permute.xlu1 %v2744_v18  ;;  %2682 = vset.pattern.permute.xlu0 %v2744_v18  ;;  %v1433_v20 = vld [vmem:[#allocation3] sm:$0xff]  ;;  %v1382_v23 = vld [vmem:[#allocation2 + $0x8] sm:$0xff]  ;;  %v1400_v25 = vld [vmem:[#allocation2 + $0x98] sm:$0xff] }
 0x1ad   : > { %1727 = vmatpush.bf16.msra.mxu0 %v2502_v17  ;;  %v2501_v21 = vld [vmem:[%s3421_s2] sm:$0xff]  ;;  %1548 = vperm.xlu0 %2682, %v1449_v19   ;;  %v1422_v27 = vpack.c.bf16 %v1400_v25, %v1399_v24  ;;  %v1450_v28 = vld [vmem:[#allocation3 + $0x88] sm:$0xff]  ;;  %v1435_v30 = vld [vmem:[#allocation3 + $0x10] sm:$0xff] }
 0x1ae   : > { %v1381_v22 = vld [vmem:[#allocation2] sm:$0xff]  ;;  %1468 = vperm.xlu1 %2683, %v1433_v20   ;;  %2618 = vmatpush.bf16.msra.mxu3 %v2502_v17  ;;  %v1434_v29 = vld [vmem:[#allocation3 + $0x8] sm:$0xff]  ;;  %v1436_v31 = vld [vmem:[#allocation3 + $0x18] sm:$0xff] }
 0x1af   : > { %2684 = vset.pattern.permute.xlu2 %v2744_v18  ;;  %v1413_v26 = vpack.c.bf16 %v1382_v23, %v1381_v22  ;;  %v1383_v32 = vld [vmem:[#allocation2 + $0x10] sm:$0xff]  ;;  %v1384_v33 = vld [vmem:[#allocation2 + $0x18] sm:$0xff]  ;;  %v1401_v34 = vld [vmem:[#allocation2 + $0xa0] sm:$0xff] }
 0x1b0   : > { %v1402_v35 = vld [vmem:[#allocation2 + $0xa8] sm:$0xff]  ;;  %v1414_v36 = vpack.c.bf16 %v1384_v33, %v1383_v32  ;;  %v1437_v38 = vld [vmem:[#allocation3 + $0x20] sm:$0xff]  ;;  %v1451_v39 = vld [vmem:[#allocation3 + $0x90] sm:$0xff] }
 0x1b1   : > { %1728 = vmatpush.bf16.msra.mxu0 %v2501_v21  ;;  %v1423_v37 = vpack.c.bf16 %v1402_v35, %v1401_v34  ;;  %v1454_v40 = vld [vmem:[#allocation3 + $0xa8] sm:$0xff]  ;;  %1558 = vperm.xlu2 %2684, %v1451_v39   ;;  %v1452_v41 = vld [vmem:[#allocation3 + $0x98] sm:$0xff]  ;;  %v1455_v42 = vld [vmem:[#allocation3 + $0xb0] sm:$0xff] }
 0x1b2   : > { %2619 = vmatpush.bf16.msra.mxu3 %v2501_v21  ;;  %v1385_v43 = vld [vmem:[#allocation2 + $0x20] sm:$0xff]  ;;  %v1386_v44 = vld [vmem:[#allocation2 + $0x28] sm:$0xff]  ;;  %v1403_v45 = vld [vmem:[#allocation2 + $0xb0] sm:$0xff] }
 0x1b3   : > { %v1404_v46 = vld [vmem:[#allocation2 + $0xb8] sm:$0xff]  ;;  %v1415_v47 = vpack.c.bf16 %v1386_v44, %v1385_v43  ;;  %v1453_v49 = vld [vmem:[#allocation3 + $0xa0] sm:$0xff]  ;;  %v1438_v52 = vld [vmem:[#allocation3 + $0x28] sm:$0xff] }
 0x1b4   : > { %2402 = vmatmul.msk.bf16.vlgmr.msra.gmra.mxu0 %vm1087_vm2, %v1413_v26  ;;  %v1424_v48 = vpack.c.bf16 %v1404_v46, %v1403_v45  ;;  %v1440_v50 = vld [vmem:[#allocation3 + $0x38] sm:$0xff]  ;;  %v1441_v53 = vld [vmem:[#allocation3 + $0x40] sm:$0xff]  ;;  %v1387_v55 = vld [vmem:[#allocation2 + $0x30] sm:$0xff] }
 0x1b5   : > { %1553 = vperm.xlu0 %2682, %v1450_v28   ;;  %2411 = vmatmul.msk.bf16.vlgmr.msra.gmra.mxu3 %vm1087_vm2, %v1422_v27  ;;  %v1456_v51 = vld [vmem:[#allocation3 + $0xb8] sm:$0xff]  ;;  %v1457_v54 = vld [vmem:[#allocation3 + $0xc0] sm:$0xff]  ;;  %v1406_v58 = vld [vmem:[#allocation2 + $0xc8] sm:$0xff] }
 0x1b6   : > { %1473 = vperm.xlu1 %2683, %v1434_v29   ;;  %v1388_v56 = vld [vmem:[#allocation2 + $0x38] sm:$0xff]  ;;  %v1405_v57 = vld [vmem:[#allocation2 + $0xc0] sm:$0xff]  ;;  %v1439_v61 = vld [vmem:[#allocation3 + $0x30] sm:$0xff] }
 0x1b7   : > { %v1416_v59 = vpack.c.bf16 %v1388_v56, %v1387_v55  ;;  %v1425_v60 = vpack.c.bf16 %v1406_v58, %v1405_v57  ;;  %v1442_v62 = vld [vmem:[#allocation3 + $0x48] sm:$0xff]  ;;  %v1443_v63 = vld [vmem:[#allocation3 + $0x50] sm:$0xff]  ;;  %v1389_v0 = vld [vmem:[#allocation2 + $0x40] sm:$0xff] }
 0x1b8   : > { %v1390_v1 = vld [vmem:[#allocation2 + $0x48] sm:$0xff]  ;;  %v1407_v2 = vld [vmem:[#allocation2 + $0xd0] sm:$0xff]  ;;  %v1408_v3 = vld [vmem:[#allocation2 + $0xd8] sm:$0xff] }
 0x1b9   : > { %1563 = vperm.xlu2 %2684, %v1452_v41   ;;  %v1417_v4 = vpack.c.bf16 %v1390_v1, %v1389_v0  ;;  %v1426_v5 = vpack.c.bf16 %v1408_v3, %v1407_v2  ;;  %v1460_v6 = vld [vmem:[#allocation3 + $0xd8] sm:$0xff]  ;;  %v1458_v7 = vld [vmem:[#allocation3 + $0xc8] sm:$0xff]  ;;  %v1461_v8 = vld [vmem:[#allocation3 + $0xe0] sm:$0xff] }
 0x1ba   : > { %v1391_v9 = vld [vmem:[#allocation2 + $0x50] sm:$0xff]  ;;  %v1392_v10 = vld [vmem:[#allocation2 + $0x58] sm:$0xff]  ;;  %v1409_v11 = vld [vmem:[#allocation2 + $0xe0] sm:$0xff] }
 0x1bb   : > { %v1410_v12 = vld [vmem:[#allocation2 + $0xe8] sm:$0xff]  ;;  %v1418_v13 = vpack.c.bf16 %v1392_v10, %v1391_v9  ;;  %v1459_v15 = vld [vmem:[#allocation3 + $0xd0] sm:$0xff]  ;;  %v1444_v18 = vld [vmem:[#allocation3 + $0x58] sm:$0xff] }
 0x1bc   : > { %v1427_v14 = vpack.c.bf16 %v1410_v12, %v1409_v11  ;;  %v1446_v16 = vld [vmem:[#allocation3 + $0x68] sm:$0xff]  ;;  %v1447_v19 = vld [vmem:[#allocation3 + $0x70] sm:$0xff]  ;;  %v1393_v21 = vld [vmem:[#allocation2 + $0x60] sm:$0xff] }
 0x1bd   : > { %1478 = vperm.xlu0 %2682, %v1435_v30   ;;  %v1462_v17 = vld [vmem:[#allocation3 + $0xe8] sm:$0xff]  ;;  %v1463_v20 = vld [vmem:[#allocation3 + $0xf0] sm:$0xff]  ;;  %v1412_v24 = vld [vmem:[#allocation2 + $0xf8] sm:$0xff] }
 0x1be   : > { %1483 = vperm.xlu1 %2683, %v1436_v31   ;;  %v1394_v22 = vld [vmem:[#allocation2 + $0x68] sm:$0xff]  ;;  %v1411_v23 = vld [vmem:[#allocation2 + $0xf0] sm:$0xff]  ;;  %v2506_v25 = vld [vmem:[%s3423_s4 + $0x18] sm:$0xff] }
 0x1bf   : > { %v1419_v26 = vpack.c.bf16 %v1394_v22, %v1393_v21  ;;  %v1428_v27 = vpack.c.bf16 %v1412_v24, %v1411_v23  ;;  %1947 = vmatpush.bf16.msra.mxu1 %v2506_v25  ;;  %2620 = vmatpush.bf16.msra.mxu2 %v2506_v25  ;;  %v2505_v28 = vld [vmem:[%s3423_s4 + $0x10] sm:$0xff]  ;;  %v1445_v29 = vld [vmem:[#allocation3 + $0x60] sm:$0xff]  ;;  %v1448_v30 = vld [vmem:[#allocation3 + $0x78] sm:$0xff] }
 0x1c0   : > { %v2504_v31 = vld [vmem:[%s3423_s4 + $0x8] sm:$0xff]  ;;  %v2503_v32 = vld [vmem:[%s3423_s4] sm:$0xff]  ;;  %v1395_v33 = vld [vmem:[#allocation2 + $0x70] sm:$0xff] }
 0x1c1   : > { %1568 = vperm.xlu2 %2684, %v1453_v49   ;;  %v1396_v34 = vld [vmem:[#allocation2 + $0x78] sm:$0xff]  ;;  %v1398_v39 = vld [vmem:[#allocation2 + $0x88] sm:$0xff] }
 0x1c2   : > { %v1420_v35 = vpack.c.bf16 %v1396_v34, %v1395_v33 }
 0x1c3   : > { %1948 = vmatpush.bf16.msra.mxu1 %v2505_v28  ;;  %2621 = vmatpush.bf16.msra.mxu2 %v2505_v28 }
 0x1c4   : > { %2403 = vmatmul.msk.bf16.gmra.mxu0 %vm1087_vm2, %v1414_v36 }
 0x1c5   : > { %2412 = vmatmul.msk.bf16.gmra.mxu3 %vm1087_vm2, %v1423_v37  ;;  %1573 = vperm.xlu0 %2682, %v1454_v40   ;;  %v3269_v40 = vld [vmem:[%s3422_s3] ss:$0 sm:$0xff] }
 0x1c6   : > { %1488 = vperm.xlu1 %2683, %v1437_v38   ;;  %v1397_v38 = vld [vmem:[#allocation2 + $0x80] sm:$0xff] }
 0x1c7   : > { %1949 = vmatpush.bf16.msra.mxu1 %v2504_v31  ;;  %2622 = vmatpush.bf16.msra.mxu2 %v2504_v31  ;;  %v1421_v41 = vpack.c.bf16 %v1398_v39, %v1397_v38 }
 0x1c9   : > { %1493 = vperm.xlu2 %2684, %v1438_v52  }
 0x1cb   : > { %1950 = vmatpush.bf16.msra.mxu1 %v2503_v32  ;;  %2623 = vmatpush.bf16.msra.mxu2 %v2503_v32 }
 0x1cd   : > { %1578 = vperm.xlu0 %2682, %v1455_v42  }
 0x1ce   : > { %1583 = vperm.xlu1 %2683, %v1456_v51  }
 0x1d1   : > { %1498 = vperm.xlu2 %2684, %v1439_v61  }
 0x1d4   : > { %2404 = vmatmul.msk.bf16.gmra.mxu0 %vm1087_vm2, %v1415_v47 }
 0x1d5   : > { %2413 = vmatmul.msk.bf16.gmra.mxu3 %vm1087_vm2, %v1424_v48  ;;  %1503 = vperm.xlu0 %2682, %v1440_v50  }
 0x1d6   : > { %1588 = vperm.xlu1 %2683, %v1457_v54  }
 0x1d9   : > { %1593 = vperm.xlu2 %2684, %v1458_v7  }
 0x1dd   : > { %1508 = vperm.xlu0 %2682, %v1441_v53   ;;  %v1464_v53 = vld [vmem:[#allocation3 + $0xf8] sm:$0xff] }
 0x1de   : > { %1513 = vperm.xlu1 %2683, %v1442_v62  }
 0x1e1   : > { %1598 = vperm.xlu2 %2684, %v1459_v15  }
 0x1e4   : > { %2405 = vmatmul.msk.bf16.gmra.mxu0 %vm1087_vm2, %v1416_v59 }
 0x1e5   : > { %2414 = vmatmul.msk.bf16.gmra.mxu3 %vm1087_vm2, %v1425_v60  ;;  %1603 = vperm.xlu0 %2682, %v1460_v6  }
 0x1e6   : > { %1518 = vperm.xlu1 %2683, %v1443_v63  }
 0x1e9   : > { %1523 = vperm.xlu2 %2684, %v1444_v18  }
 0x1ed   : > { %1608 = vperm.xlu0 %2682, %v1461_v8  }
 0x1ee   : > { %1613 = vperm.xlu1 %2683, %v1462_v17  }
 0x1f1   : > { %1528 = vperm.xlu2 %2684, %v1445_v29  }
 0x1f4   : > { %2406 = vmatmul.msk.bf16.gmra.mxu0 %vm1087_vm2, %v1417_v4 }
 0x1f5   : > { %2415 = vmatmul.msk.bf16.gmra.mxu3 %vm1087_vm2, %v1426_v5  ;;  %1533 = vperm.xlu0 %2682, %v1446_v16  }
 0x1f6   : > { %1618 = vperm.xlu1 %2683, %v1463_v20  }
 0x1f9   : > { %1623 = vperm.xlu2 %2684, %v1464_v53  }
 0x1fd   : > { %1538 = vperm.xlu0 %2682, %v1447_v19  }
 0x1fe   : > { %1543 = vperm.xlu1 %2683, %v1448_v30  }
 0x204   : > { %2407 = vmatmul.msk.bf16.gmra.mxu0 %vm1087_vm2, %v1418_v13 }
 0x205   : > { %2416 = vmatmul.msk.bf16.gmra.mxu3 %vm1087_vm2, %v1427_v14 }
 0x20b   : > { %v1559_v43 = vpop.permute.xlu2 %1558 }
 0x20c   : > { %v1647_v51 = vmul.f32 %v3269_v40, %v1559_v43 }
 0x213   : > { %v1564_v56 = vpop.permute.xlu2 %1563 }
 0x214   : > { %2408 = vmatmul.msk.bf16.gmra.mxu0 %vm1087_vm2, %v1419_v26  ;;  %v1648_v57 = vmul.f32 %v3269_v40, %v1564_v56 }
 0x215   : > { %2417 = vmatmul.msk.bf16.gmra.mxu3 %vm1087_vm2, %v1428_v27 }
 0x21b   : > { %v1569_v7 = vpop.permute.xlu2 %1568 }
 0x21c   : > { %v1649_v10 = vmul.f32 %v3269_v40, %v1569_v7 }
 0x21f   : > { %v3264_v37 = vpop.permute.xlu0 %1548 }
 0x220   : > { %v1469_v36 = vpop.permute.xlu1 %1468 }
 0x221   : > { %v1629_v45 = vmul.f32 %v3269_v40, %v1469_v36 }
 0x223   : > { %v1494_v23 = vpop.permute.xlu2 %1493 }
 0x224   : > { %2409 = vmatmul.msk.bf16.gmra.mxu0 %vm1087_vm2, %v1420_v35  ;;  %v1634_v27 = vmul.f32 %v3269_v40, %v1494_v23 }
 0x227   : > { %v3274_v47 = vpop.permute.xlu0 %1553 }
 0x228   : > { %v1474_v44 = vpop.permute.xlu1 %1473 }
 0x229   : > { %v1630_v46 = vmul.f32 %v3269_v40, %v1474_v44 }
 0x22b   : > { %v1499_v43 = vpop.permute.xlu2 %1498 }
 0x22f   : > { %v1479_v61 = vpop.permute.xlu0 %1478 }
 0x230   : > { %v1484_v1 = vpop.permute.xlu1 %1483  ;;  %v1631_v3 = vmul.f32 %v3269_v40, %v1479_v61 }
 0x231   : > { %v1730_v42 = vpop.f32.mrf.mxu0  ;;  %v1632_v5 = vmul.f32 %v3269_v40, %v1484_v1 }
 0x232   : > { %v1731_v48 = vadd.f32 %v1730_v42, %v1629_v45 }
 0x233   : > { %v1594_v61 = vpop.permute.xlu2 %1593 }
 0x234   : > { %2410 = vmatmul.msk.bf16.gmra.mxu0 %vm1087_vm2, %v1421_v41  ;;  %v1810_v54 = vmax.f32 %v1731_v48, 0.0 }
 0x237   : > { %v1574_v14 = vpop.permute.xlu0 %1573 }
 0x238   : > { %v1775_v49 = vpop.f32.mrf.mxu3  ;;  %v1650_v15 = vmul.f32 %v3269_v40, %v1574_v14  ;;  %v1489_v19 = vpop.permute.xlu1 %1488 }
 0x239   : > { %v1732_v50 = vpop.f32.mrf.mxu0  ;;  %v1776_v58 = vadd.f32 %v1775_v49, %v1647_v51  ;;  %v1633_v25 = vmul.f32 %v3269_v40, %v1489_v19 }
 0x23a   : > { %v1733_v52 = vadd.f32 %v1732_v50, %v1630_v46  ;;  %v1635_v50 = vmul.f32 %v3269_v40, %v1499_v43 }
 0x23b   : > { %v1828_v63 = vmax.f32 %v1776_v58, 0.0 }
 0x23c   : > { %v1811_v55 = vmax.f32 %v1733_v52, 0.0 }
 0x23e   : > { %v1842_v59 = vpack.c.bf16 %v1811_v55, %v1810_v54 }
 0x23f   : > { %v1579_v29 = vpop.permute.xlu0 %1578 }
 0x240   : > { %2434 = vmatmul.msk.bf16.vlgmr.msra.gmra.mxu1 %vm1894_vm4, %v1842_v59  ;;  %v1777_v60 = vpop.f32.mrf.mxu3  ;;  %v1651_v32 = vmul.f32 %v3269_v40, %v1579_v29  ;;  %v1584_v36 = vpop.permute.xlu1 %1583 }
 0x241   : > { %v1735_v62 = vpop.f32.mrf.mxu0  ;;  %v1778_v0 = vadd.f32 %v1777_v60, %v1648_v57  ;;  %v1652_v38 = vmul.f32 %v3269_v40, %v1584_v36 }
 0x242   : > { %v1736_v6 = vadd.f32 %v1735_v62, %v1631_v3  ;;  %v1654_v62 = vmul.f32 %v3269_v40, %v1594_v61 }
 0x243   : > { %v1829_v2 = vmax.f32 %v1778_v0, 0.0 }
 0x244   : > { %v1812_v12 = vmax.f32 %v1736_v6, 0.0 }
 0x245   : > { %v3280_v4 = vpack.c.bf16 %v1829_v2, %v1828_v63 }
 0x247   : > { %v1504_v48 = vpop.permute.xlu0 %1503 }
 0x248   : > { %v1780_v8 = vpop.f32.mrf.mxu3  ;;  %v1636_v52 = vmul.f32 %v3269_v40, %v1504_v48  ;;  %v1589_v54 = vpop.permute.xlu1 %1588 }
 0x249   : > { %v1737_v9 = vpop.f32.mrf.mxu0  ;;  %v1781_v16 = vadd.f32 %v1780_v8, %v1649_v10  ;;  %v1653_v57 = vmul.f32 %v3269_v40, %v1589_v54 }
 0x24a   : > { %v1738_v11 = vadd.f32 %v1737_v9, %v1632_v5 }
 0x24b   : > { %v1830_v21 = vmax.f32 %v1781_v16, 0.0 }
 0x24c   : > { %v1813_v13 = vmax.f32 %v1738_v11, 0.0 }
 0x24e   : > { %v1843_v17 = vpack.c.bf16 %v1813_v13, %v1812_v12  ;;  %v1599_v13 = vpop.permute.xlu2 %1598 }
 0x24f   : > { %v1509_v2 = vpop.permute.xlu0 %1508  ;;  %v1655_v16 = vmul.f32 %v3269_v40, %v1599_v13 }
 0x250   : > { %2435 = vmatmul.msk.bf16.gmra.mxu1 %vm1894_vm4, %v1843_v17  ;;  %v1782_v18 = vpop.f32.mrf.mxu3  ;;  %v1514_v7 = vpop.permute.xlu1 %1513  ;;  %v1637_v9 = vmul.f32 %v3269_v40, %v1509_v2 }
 0x251   : > { %v1740_v20 = vpop.f32.mrf.mxu0  ;;  %v1783_v22 = vadd.f32 %v1782_v18, %v1650_v15  ;;  %v1638_v11 = vmul.f32 %v3269_v40, %v1514_v7 }
 0x252   : > { %v1741_v28 = vadd.f32 %v1740_v20, %v1633_v25 }
 0x253   : > { %v1831_v24 = vmax.f32 %v1783_v22, 0.0 }
 0x254   : > { %v1814_v34 = vmax.f32 %v1741_v28, 0.0 }
 0x255   : > { %v3287_v26 = vpack.c.bf16 %v1831_v24, %v1830_v21 }
 0x257   : > { %v1604_v20 = vpop.permute.xlu0 %1603 }
 0x258   : > { %v1785_v30 = vpop.f32.mrf.mxu3  ;;  %v1656_v21 = vmul.f32 %v3269_v40, %v1604_v20  ;;  %v1519_v25 = vpop.permute.xlu1 %1518 }
 0x259   : > { %v1742_v31 = vpop.f32.mrf.mxu0  ;;  %v1786_v39 = vadd.f32 %v1785_v30, %v1651_v32  ;;  %v1524_v30 = vpop.permute.xlu2 %1523  ;;  %v1639_v32 = vmul.f32 %v3269_v40, %v1519_v25 }
 0x25a   : > { %v1743_v33 = vadd.f32 %v1742_v31, %v1634_v27 }
 0x25b   : > { %v1832_v45 = vmax.f32 %v1786_v39, 0.0 }
 0x25c   : > { %v1815_v35 = vmax.f32 %v1743_v33, 0.0 }
 0x25e   : > { %v1844_v41 = vpack.c.bf16 %v1815_v35, %v1814_v34  ;;  %v1640_v34 = vmul.f32 %v3269_v40, %v1524_v30 }
 0x25f   : > { %v1609_v36 = vpop.permute.xlu0 %1608 }
 0x260   : > { %2436 = vmatmul.msk.bf16.gmra.mxu1 %vm1894_vm4, %v1844_v41  ;;  %v1787_v42 = vpop.f32.mrf.mxu3  ;;  %v1657_v41 = vmul.f32 %v3269_v40, %v1609_v36 }
 0x261   : > { %v1745_v44 = vpop.f32.mrf.mxu0  ;;  %v1788_v46 = vadd.f32 %v1787_v42, %v1652_v38 }
 0x262   : > { %v1746_v53 = vadd.f32 %v1745_v44, %v1635_v50 }
 0x263   : > { %v1833_v49 = vmax.f32 %v1788_v46, 0.0 }
 0x264   : > { %v1816_v59 = vmax.f32 %v1746_v53, 0.0 }
 0x265   : > { %v3294_v51 = vpack.c.bf16 %v1833_v49, %v1832_v45  ;;  %v1614_v45 = vpop.permute.xlu1 %1613 }
 0x266   : > { %v1658_v46 = vmul.f32 %v3269_v40, %v1614_v45 }
 0x268   : > { %v1790_v55 = vpop.f32.mrf.mxu3 }
 0x269   : > { %v1747_v56 = vpop.f32.mrf.mxu0  ;;  %v1791_v63 = vadd.f32 %v1790_v55, %v1653_v57 }
 0x26a   : > { %v1748_v58 = vadd.f32 %v1747_v56, %v1636_v52  ;;  %v1529_v52 = vpop.permute.xlu2 %1528  ;;  %v1534_v56 = vpop.permute.xlu0 %1533 }
 0x26b   : > { %v1834_v5 = vmax.f32 %v1791_v63, 0.0 }
 0x26c   : > { %v1817_v60 = vmax.f32 %v1748_v58, 0.0  ;;  %v1641_v58 = vmul.f32 %v3269_v40, %v1529_v52 }
 0x26d   : > { %v3318_v63 = vpop.permute.xlu1 %1618 }
 0x26e   : > { %v1845_v0 = vpack.c.bf16 %v1817_v60, %v1816_v59  ;;  %v1642_v60 = vmul.f32 %v3269_v40, %v1534_v56 }
 0x270   : > { %2437 = vmatmul.msk.bf16.gmra.mxu1 %vm1894_vm4, %v1845_v0  ;;  %v1792_v1 = vpop.f32.mrf.mxu3 }
 0x271   : > { %v1750_v3 = vpop.f32.mrf.mxu0  ;;  %v1793_v6 = vadd.f32 %v1792_v1, %v1654_v62 }
 0x272   : > { %v1751_v12 = vadd.f32 %v1750_v3, %v1637_v9 }
 0x273   : > { %v1835_v8 = vmax.f32 %v1793_v6, 0.0 }
 0x274   : > { %v1818_v18 = vmax.f32 %v1751_v12, 0.0 }
 0x275   : > { %v3301_v10 = vpack.c.bf16 %v1835_v8, %v1834_v5  ;;  %v1539_v5 = vpop.permute.xlu0 %1538  ;;  %v1544_v7 = vpop.permute.xlu1 %1543 }
 0x276   : > { %v1643_v8 = vmul.f32 %v3269_v40, %v1539_v5  ;;  %v1644_v9 = vmul.f32 %v3269_v40, %v1544_v7 }
 0x278   : > { %v1795_v14 = vpop.f32.mrf.mxu3 }
 0x279   : > { %v1752_v15 = vpop.f32.mrf.mxu0  ;;  %v1796_v22 = vadd.f32 %v1795_v14, %v1655_v16 }
 0x27a   : > { %v1753_v17 = vadd.f32 %v1752_v15, %v1638_v11 }
 0x27b   : > { %v1836_v28 = vmax.f32 %v1796_v22, 0.0 }
 0x27c   : > { %v1819_v19 = vmax.f32 %v1753_v17, 0.0 }
 0x27e   : > { %v1846_v23 = vpack.c.bf16 %v1819_v19, %v1818_v18  ;;  %v1645_v18 = vmul.f32 %v3269_v40, %v3264_v37  ;;  %v1646_v19 = vmul.f32 %v3269_v40, %v3274_v47 }
 0x280   : > { %2438 = vmatmul.msk.bf16.gmra.mxu1 %vm1894_vm4, %v1846_v23  ;;  %v1797_v24 = vpop.f32.mrf.mxu3 }
 0x281   : > { %v1755_v27 = vpop.f32.mrf.mxu0  ;;  %v1798_v29 = vadd.f32 %v1797_v24, %v1656_v21 }
 0x282   : > { %v1756_v35 = vadd.f32 %v1755_v27, %v1639_v32 }
 0x283   : > { %v1837_v31 = vmax.f32 %v1798_v29, 0.0 }
 0x284   : > { %v1820_v43 = vmax.f32 %v1756_v35, 0.0 }
 0x285   : > { %v3308_v33 = vpack.c.bf16 %v1837_v31, %v1836_v28  ;;  %v3332_v28 = vld [vmem:[%s3424_s5] ss:$0 sm:$0xff] }
 0x288   : > { %v1800_v38 = vpop.f32.mrf.mxu3 }
 0x289   : > { %v1757_v39 = vpop.f32.mrf.mxu0  ;;  %v1801_v48 = vadd.f32 %v1800_v38, %v1657_v41 }
 0x28a   : > { %v1758_v42 = vadd.f32 %v1757_v39, %v1640_v34 }
 0x28b   : > { %v1838_v54 = vmax.f32 %v1801_v48, 0.0 }
 0x28c   : > { %v1821_v44 = vmax.f32 %v1758_v42, 0.0 }
 0x28e   : > { %v1847_v49 = vpack.c.bf16 %v1821_v44, %v1820_v43 }
 0x290   : > { %2439 = vmatmul.msk.bf16.gmra.mxu1 %vm1894_vm4, %v1847_v49  ;;  %v1802_v50 = vpop.f32.mrf.mxu3 }
 0x291   : > { %v1760_v53 = vpop.f32.mrf.mxu0  ;;  %v1803_v55 = vadd.f32 %v1802_v50, %v1658_v46 }
 0x292   : > { %v1761_v61 = vadd.f32 %v1760_v53, %v1641_v58 }
 0x293   : > { %v1839_v57 = vmax.f32 %v1803_v55, 0.0 }
 0x294   : > { %v1822_v1 = vmax.f32 %v1761_v61, 0.0  ;;  %v1659_v61 = vmul.f32 %v3269_v40, %v3318_v63 }
 0x295   : > { %v3315_v59 = vpack.c.bf16 %v1839_v57, %v1838_v54 }
 0x298   : > { %v1805_v58 = vpop.f32.mrf.mxu3 }
 0x299   : > { %v1762_v62 = vpop.f32.mrf.mxu0 }
 0x29a   : > { %v1763_v0 = vadd.f32 %v1762_v62, %v1642_v60  ;;  %v1624_v60 = vpop.permute.xlu2 %1623 }
 0x29b   : > { %v1660_v62 = vmul.f32 %v3269_v40, %v1624_v60 }
 0x29c   : > { %v1823_v2 = vmax.f32 %v1763_v0, 0.0 }
 0x29e   : > { %v1848_v3 = vpack.c.bf16 %v1823_v2, %v1822_v1  ;;  %v1806_v1 = vadd.f32 %v1805_v58, %v1659_v61 }
 0x2a0   : > { %2440 = vmatmul.msk.bf16.gmra.mxu1 %vm1894_vm4, %v1848_v3  ;;  %v1840_v7 = vmax.f32 %v1806_v1, 0.0 }
 0x2a1   : > { %v1765_v6 = vpop.f32.mrf.mxu0 }
 0x2a2   : > { %v1766_v11 = vadd.f32 %v1765_v6, %v1643_v8 }
 0x2a4   : > { %v1824_v14 = vmax.f32 %v1766_v11, 0.0 }
 0x2a9   : > { %v1767_v12 = vpop.f32.mrf.mxu0 }
 0x2aa   : > { %v1768_v13 = vadd.f32 %v1767_v12, %v1644_v9 }
 0x2ac   : > { %v1825_v15 = vmax.f32 %v1768_v13, 0.0 }
 0x2ae   : > { %v1849_v16 = vpack.c.bf16 %v1825_v15, %v1824_v14 }
 0x2b0   : > { %2441 = vmatmul.msk.bf16.gmra.mxu1 %vm1894_vm4, %v1849_v16 }
 0x2b1   : > { %v1770_v17 = vpop.f32.mrf.mxu0 }
 0x2b2   : > { %v1771_v20 = vadd.f32 %v1770_v17, %v1645_v18 }
 0x2b4   : > { %v1826_v23 = vmax.f32 %v1771_v20, 0.0 }
 0x2b9   : > { %v1772_v21 = vpop.f32.mrf.mxu0 }
 0x2ba   : > { %v1773_v22 = vadd.f32 %v1772_v21, %v1646_v19 }
 0x2bc   : > { %v1827_v24 = vmax.f32 %v1773_v22, 0.0 }
 0x2bd   : > { %v1952_v25 = vpop.f32.mrf.mxu1 }
 0x2be   : > { %v1850_v27 = vpack.c.bf16 %v1827_v24, %v1826_v23  ;;  %v1953_v37 = vadd.f32 %v3332_v28, %v1952_v25 }
 0x2c0   : > { %2442 = vmatmul.msk.bf16.vlgmr.msra.gmra.mxu2 %vm1894_vm4, %v1850_v27 }
 0x2c5   : > { %v1954_v29 = vpop.f32.mrf.mxu1 }
 0x2c6   : > { %v1955_v47 = vadd.f32 %v3332_v28, %v1954_v29 }
 0x2c8   : > { %v2510_v30 = vpack.c.bf16 %v1955_v47, %v1953_v37 }
 0x2ca   : > { %2511 = vst [vmem:[%s2921_s18] sm:$0xff] %v2510_v30  }
 0x2cd   : > { %v1957_v31 = vpop.f32.mrf.mxu1 }
 0x2ce   : > { %v1958_v34 = vadd.f32 %v3332_v28, %v1957_v31 }
 0x2d0   : > { %2443 = vmatmul.msk.bf16.gmra.mxu2 %vm1894_vm4, %v3280_v4 }
 0x2d5   : > { %v1959_v32 = vpop.f32.mrf.mxu1 }
 0x2d6   : > { %v1960_v35 = vadd.f32 %v3332_v28, %v1959_v32 }
 0x2d8   : > { %v2515_v36 = vpack.c.bf16 %v1960_v35, %v1958_v34 }
 0x2da   : > { %2587 = vst [vmem:[%s2921_s18 + $0x8] sm:$0xff] %v2515_v36  }
 0x2dd   : > { %v1962_v38 = vpop.f32.mrf.mxu1 }
 0x2de   : > { %v1963_v41 = vadd.f32 %v3332_v28, %v1962_v38 }
 0x2e0   : > { %2444 = vmatmul.msk.bf16.gmra.mxu2 %vm1894_vm4, %v3287_v26 }
 0x2e5   : > { %v1964_v39 = vpop.f32.mrf.mxu1 }
 0x2e6   : > { %v1965_v42 = vadd.f32 %v3332_v28, %v1964_v39 }
 0x2e8   : > { %v2520_v43 = vpack.c.bf16 %v1965_v42, %v1963_v41 }
 0x2ea   : > { %2588 = vst [vmem:[%s2921_s18 + $0x10] sm:$0xff] %v2520_v43  }
 0x2ed   : > { %v1967_v4 = vpop.f32.mrf.mxu1 }
 0x2ee   : > { %v1968_v45 = vadd.f32 %v3332_v28, %v1967_v4 }
 0x2f0   : > { %2445 = vmatmul.msk.bf16.gmra.mxu2 %vm1894_vm4, %v3294_v51 }
 0x2f5   : > { %v1969_v44 = vpop.f32.mrf.mxu1 }
 0x2f6   : > { %v1970_v46 = vadd.f32 %v3332_v28, %v1969_v44 }
 0x2f8   : > { %v2525_v48 = vpack.c.bf16 %v1970_v46, %v1968_v45 }
 0x2fa   : > { %2589 = vst [vmem:[%s2921_s18 + $0x18] sm:$0xff] %v2525_v48  }
 0x2fd   : > { %v1972_v26 = vpop.f32.mrf.mxu1 }
 0x2fe   : > { %v1973_v50 = vadd.f32 %v3332_v28, %v1972_v26 }
 0x300   : > { %2446 = vmatmul.msk.bf16.gmra.mxu2 %vm1894_vm4, %v3301_v10 }
 0x305   : > { %v1974_v49 = vpop.f32.mrf.mxu1 }
 0x306   : > { %v1975_v52 = vadd.f32 %v3332_v28, %v1974_v49 }
 0x308   : > { %v2530_v53 = vpack.c.bf16 %v1975_v52, %v1973_v50 }
 0x30a   : > { %2590 = vst [vmem:[%s2921_s18 + $0x20] sm:$0xff] %v2530_v53  }
 0x30d   : > { %v1977_v51 = vpop.f32.mrf.mxu1 }
 0x30e   : > { %v1978_v55 = vadd.f32 %v3332_v28, %v1977_v51 }
 0x310   : > { %2447 = vmatmul.msk.bf16.gmra.mxu2 %vm1894_vm4, %v3308_v33  ;;  %v1807_v33 = vpop.f32.mrf.mxu3 }
 0x311   : > { %v1808_v2 = vadd.f32 %v1807_v33, %v1660_v62 }
 0x313   : > { %v1841_v8 = vmax.f32 %v1808_v2, 0.0 }
 0x315   : > { %v1979_v54 = vpop.f32.mrf.mxu1  ;;  %v1857_v9 = vpack.c.bf16 %v1841_v8, %v1840_v7 }
 0x316   : > { %v1980_v56 = vadd.f32 %v3332_v28, %v1979_v54 }
 0x318   : > { %v2535_v57 = vpack.c.bf16 %v1980_v56, %v1978_v55 }
 0x31a   : > { %2591 = vst [vmem:[%s2921_s18 + $0x28] sm:$0xff] %v2535_v57  }
 0x31d   : > { %v1982_v10 = vpop.f32.mrf.mxu1 }
 0x31e   : > { %v1983_v3 = vadd.f32 %v3332_v28, %v1982_v10 }
 0x320   : > { %2448 = vmatmul.msk.bf16.gmra.mxu2 %vm1894_vm4, %v3315_v59 }
 0x325   : > { %v1984_v0 = vpop.f32.mrf.mxu1 }
 0x326   : > { %v1985_v5 = vadd.f32 %v3332_v28, %v1984_v0 }
 0x328   : > { %v2540_v6 = vpack.c.bf16 %v1985_v5, %v1983_v3 }
 0x32a   : > { %2592 = vst [vmem:[%s2921_s18 + $0x30] sm:$0xff] %v2540_v6  }
 0x32d   : > { %v1987_v59 = vpop.f32.mrf.mxu1 }
 0x32e   : > { %v1988_v40 = vadd.f32 %v3332_v28, %v1987_v59 }
 0x330   : > { %2449 = vmatmul.msk.bf16.gmra.mxu2 %vm1894_vm4, %v1857_v9 }
 0x335   : > { %v1989_v63 = vpop.f32.mrf.mxu1 }
 0x336   : > { %v1990_v11 = vadd.f32 %v3332_v28, %v1989_v63 }
 0x338   : > { %v2545_v12 = vpack.c.bf16 %v1990_v11, %v1988_v40 }
 0x33a   : > { %2593 = vst [vmem:[%s2921_s18 + $0x38] sm:$0xff] %v2545_v12  }
 0x343   : > { %v1992_v13 = vpop.f32.mrf.mxu2 }
 0x344   : > { %v1993_v15 = vadd.f32 %v3332_v28, %v1992_v13 }
 0x34b   : > { %v1994_v14 = vpop.f32.mrf.mxu2 }
 0x34c   : > { %v1995_v16 = vadd.f32 %v3332_v28, %v1994_v14 }
 0x34e   : > { %v2550_v17 = vpack.c.bf16 %v1995_v16, %v1993_v15 }
 0x350   : > { %2594 = vst [vmem:[%s2921_s18 + $0x40] sm:$0xff] %v2550_v17  }
 0x353   : > { %v1997_v18 = vpop.f32.mrf.mxu2 }
 0x354   : > { %v1998_v20 = vadd.f32 %v3332_v28, %v1997_v18 }
 0x35b   : > { %v1999_v19 = vpop.f32.mrf.mxu2 }
 0x35c   : > { %v2000_v21 = vadd.f32 %v3332_v28, %v1999_v19 }
 0x35e   : > { %v2555_v22 = vpack.c.bf16 %v2000_v21, %v1998_v20 }
 0x360   : > { %2595 = vst [vmem:[%s2921_s18 + $0x48] sm:$0xff] %v2555_v22  }
 0x363   : > { %v2002_v23 = vpop.f32.mrf.mxu2 }
 0x364   : > { %v2003_v25 = vadd.f32 %v3332_v28, %v2002_v23 }
 0x36b   : > { %v2004_v24 = vpop.f32.mrf.mxu2 }
 0x36c   : > { %v2005_v27 = vadd.f32 %v3332_v28, %v2004_v24 }
 0x36e   : > { %v2560_v29 = vpack.c.bf16 %v2005_v27, %v2003_v25 }
 0x370   : > { %2596 = vst [vmem:[%s2921_s18 + $0x50] sm:$0xff] %v2560_v29  }
 0x373   : > { %v2007_v37 = vpop.f32.mrf.mxu2 }
 0x374   : > { %v2008_v30 = vadd.f32 %v3332_v28, %v2007_v37 }
 0x37b   : > { %v2009_v47 = vpop.f32.mrf.mxu2 }
 0x37c   : > { %v2010_v31 = vadd.f32 %v3332_v28, %v2009_v47 }
 0x37e   : > { %v2565_v32 = vpack.c.bf16 %v2010_v31, %v2008_v30 }
 0x380   : > { %2597 = vst [vmem:[%s2921_s18 + $0x58] sm:$0xff] %v2565_v32  }
 0x383   : > { %v2012_v34 = vpop.f32.mrf.mxu2 }
 0x384   : > { %v2013_v36 = vadd.f32 %v3332_v28, %v2012_v34 }
 0x38b   : > { %v2014_v35 = vpop.f32.mrf.mxu2 }
 0x38c   : > { %v2015_v38 = vadd.f32 %v3332_v28, %v2014_v35 }
 0x38e   : > { %v2570_v39 = vpack.c.bf16 %v2015_v38, %v2013_v36 }
 0x390   : > { %2598 = vst [vmem:[%s2921_s18 + $0x60] sm:$0xff] %v2570_v39  }
 0x393   : > { %v2017_v41 = vpop.f32.mrf.mxu2 }
 0x394   : > { %v2018_v43 = vadd.f32 %v3332_v28, %v2017_v41 }
 0x39b   : > { %v2019_v42 = vpop.f32.mrf.mxu2 }
 0x39c   : > { %v2020_v4 = vadd.f32 %v3332_v28, %v2019_v42 }
 0x39e   : > { %v2575_v44 = vpack.c.bf16 %v2020_v4, %v2018_v43 }
 0x3a0   : > { %2599 = vst [vmem:[%s2921_s18 + $0x68] sm:$0xff] %v2575_v44  }
 0x3a3   : > { %v2022_v45 = vpop.f32.mrf.mxu2 }
 0x3a4   : > { %v2023_v48 = vadd.f32 %v3332_v28, %v2022_v45 }
 0x3ab   : > { %v2024_v46 = vpop.f32.mrf.mxu2 }
 0x3ac   : > { %v2025_v26 = vadd.f32 %v3332_v28, %v2024_v46 }
 0x3ae   : > { %v2580_v49 = vpack.c.bf16 %v2025_v26, %v2023_v48 }
 0x3b0   : > { %2600 = vst [vmem:[%s2921_s18 + $0x70] sm:$0xff] %v2580_v49  }
 0x3b3   : > { %v2027_v50 = vpop.f32.mrf.mxu2 }
 0x3b4   : > { %v2028_v53 = vadd.f32 %v3332_v28, %v2027_v50 }
 0x3bb   : > { %v2029_v52 = vpop.f32.mrf.mxu2 }
 0x3bc   : > { %v2030_v51 = vadd.f32 %v3332_v28, %v2029_v52 }
 0x3be   : > { %v2585_v54 = vpack.c.bf16 %v2030_v51, %v2028_v53 }
 0x3c0   : > { %2601 = vst [vmem:[%s2921_s18 + $0x78] sm:$0xff] %v2585_v54  }
 0x3c1 PF: > { %s16_s27 = sadd.s32 1, %s2741_s27   ;;  %s3426_s21 = smov %s2721_s22 }
 0x3c2   : > { %p13_p0 = scmp.ge.s32.totalorder %s16_s27, 6   ;;  %s3427_s22 = smov %s2831_s10 }
 0x3c3   : > { %s3428_s23 = smov %s2733_s25  ;;  %s3429_s24 = smov %s2737_s26 }
 0x3c4   : > { %s3430_s25 = smov %s3433_s28  ;;  %s3431_s26 = smov %s3437_s29 }
 0x3c5   :  { %15 = sbr.rel (!%p13_p0) target bundleno = 4 (0x4), region = 128 }

</bundles_post_ra>
